<compile_context>
chip_gen: v7x
topology: tpu7x:2x2x1
jax: 0.10.0
libtpu: 0.0.40
codegen_flags: <defaults>
</compile_context>

<pallas_src>
import jax
import jax.numpy as jnp
from jax.experimental import pallas as pl
from jax.experimental.pallas import tpu as pltpu

# ----------------------------- model config ---------------------------------
INPUT_SIZE = 64
HIDDEN_SIZE = 128
NUM_BLOCKS = 4
BATCH = 128          # one full MXU M tile; BN stats are over this full batch
BN_EPS = 1e-5


# ------------------------------- kernel -------------------------------------
def _bn_train(y, gamma, beta):
    """BatchNorm1d, training mode, fused as y*scale + shift (all f32)."""
    mean = jnp.mean(y, axis=0, keepdims=True)
    var = jnp.mean(jnp.square(y - mean), axis=0, keepdims=True)
    scale = gamma * jax.lax.rsqrt(var + BN_EPS)
    shift = beta - scale * mean
    return y * scale + shift


def deepcubea_kernel(
    x_ref,                     # (B, INPUT_SIZE)             f32
    w1_ref, b1_ref,            # (INPUT_SIZE, H) bf16, (1, H) f32
    w2_ref, b2_ref,            # (H, H) bf16,          (1, H) f32
    wa_ref, g1_ref, be1_ref,   # (NB, H, H) bf16, (NB, H) f32, (NB, H) f32
    wb_ref, g2_ref, be2_ref,   # (NB, H, H) bf16, (NB, H) f32, (NB, H) f32
    wo_ref, bo_ref,            # (1, H) f32, (1, 1) f32
    out_ref,                   # (B, 1) f32
):
    # fc1 + relu  (bf16 MXU inputs, f32 accumulate)
    x = x_ref[...].astype(jnp.bfloat16)
    h = jnp.dot(x, w1_ref[...], preferred_element_type=jnp.float32) + b1_ref[...]
    h = jnp.maximum(h, 0.0)

    # fc2 + relu
    h = jnp.dot(h.astype(jnp.bfloat16), w2_ref[...],
                preferred_element_type=jnp.float32) + b2_ref[...]
    h = jnp.maximum(h, 0.0)

    # Residual blocks (static unroll, NUM_BLOCKS=4).  Weights / BN params are
    # sliced from the refs per block — only one (H, H) tile is live at a time.
    # Linear biases before BN are omitted: BN's batch-mean subtraction cancels
    # a per-feature constant bias exactly.
    for blk in range(NUM_BLOCKS):
        residual = h
        y = jnp.dot(h.astype(jnp.bfloat16), wa_ref[blk],
                    preferred_element_type=jnp.float32)
        y = _bn_train(y, g1_ref[blk:blk + 1, :], be1_ref[blk:blk + 1, :])
        y = jnp.maximum(y, 0.0)
        z = jnp.dot(y.astype(jnp.bfloat16), wb_ref[blk],
                    preferred_element_type=jnp.float32)
        z = _bn_train(z, g2_ref[blk:blk + 1, :], be2_ref[blk:blk + 1, :])
        h = jnp.maximum(z + residual, 0.0)

    # Output layer (H -> 1) as a lane reduction instead of an N=1 MXU matmul.
    out_ref[...] = (
        jnp.sum(h * wo_ref[...], axis=-1, keepdims=True) + bo_ref[...]
    )


# ------------------------------- wrapper -------------------------------------
@jax.jit
def deepcubea_forward(x, kernel_params):
    vmem = pl.BlockSpec(memory_space=pltpu.MemorySpace.VMEM)
    n_in = 1 + len(kernel_params)

    b = x.shape[0]
    flops = 2 * b * (
        INPUT_SIZE * HIDDEN_SIZE
        + HIDDEN_SIZE * HIDDEN_SIZE * (1 + 2 * NUM_BLOCKS)
        + HIDDEN_SIZE
    )
    bytes_accessed = int(
        sum(a.size * a.dtype.itemsize for a in (x, *kernel_params)) + b * 4
    )

    return pl.pallas_call(
        deepcubea_kernel,
        out_shape=jax.ShapeDtypeStruct((b, 1), jnp.float32),
        in_specs=[vmem] * n_in,
        out_specs=vmem,
        cost_estimate=pl.CostEstimate(
            flops=flops,
            transcendentals=2 * NUM_BLOCKS * HIDDEN_SIZE,
            bytes_accessed=bytes_accessed,
        ),
    )(x, *kernel_params)


# --------------------------- parameter init ----------------------------------
def init_params(key):
    ks = jax.random.split(key, 16)

    def linear(kw, kb, fan_in, fan_out):
        bound = 1.0 / jnp.sqrt(fan_in)
        w = jax.random.uniform(kw, (fan_in, fan_out), jnp.float32, -bound, bound)
        b = jax.random.uniform(kb, (1, fan_out), jnp.float32, -bound, bound)
        return w, b

    w1, b1 = linear(ks[0], ks[1], INPUT_SIZE, HIDDEN_SIZE)
    w2, b2 = linear(ks[2], ks[3], HIDDEN_SIZE, HIDDEN_SIZE)

    bound_h = 1.0 / jnp.sqrt(HIDDEN_SIZE)
    wa = jax.random.uniform(
        ks[4], (NUM_BLOCKS, HIDDEN_SIZE, HIDDEN_SIZE), jnp.float32, -bound_h, bound_h
    )
    ba = jax.random.uniform(
        ks[5], (NUM_BLOCKS, HIDDEN_SIZE), jnp.float32, -bound_h, bound_h
    )
    wb = jax.random.uniform(
        ks[6], (NUM_BLOCKS, HIDDEN_SIZE, HIDDEN_SIZE), jnp.float32, -bound_h, bound_h
    )
    bb = jax.random.uniform(
        ks[7], (NUM_BLOCKS, HIDDEN_SIZE), jnp.float32, -bound_h, bound_h
    )
    # BatchNorm affine params (deterministic, nontrivial)
    g1 = 1.0 + 0.1 * jax.random.normal(ks[8], (NUM_BLOCKS, HIDDEN_SIZE), jnp.float32)
    be1 = 0.1 * jax.random.normal(ks[9], (NUM_BLOCKS, HIDDEN_SIZE), jnp.float32)
    g2 = 1.0 + 0.1 * jax.random.normal(ks[10], (NUM_BLOCKS, HIDDEN_SIZE), jnp.float32)
    be2 = 0.1 * jax.random.normal(ks[11], (NUM_BLOCKS, HIDDEN_SIZE), jnp.float32)

    # Output layer stored as a (1, H) row (lane reduction in the kernel).
    wo = jax.random.uniform(
        ks[12], (1, HIDDEN_SIZE), jnp.float32, -bound_h, bound_h
    )
    bo = jax.random.uniform(ks[13], (1, 1), jnp.float32, -bound_h, bound_h)

    # Cast matmul weights to bf16 (MXU-native); biases / BN / output row f32.
    w1 = w1.astype(jnp.bfloat16)
    w2 = w2.astype(jnp.bfloat16)
    wa = wa.astype(jnp.bfloat16)
    wb = wb.astype(jnp.bfloat16)

    return (w1, b1, w2, b2, wa, ba, g1, be1, wb, bb, g2, be2, wo, bo)


# --------------------------- pure-JAX reference -------------------------------
def reference_forward(x, params):
    """Full-fidelity PyTorch semantics (incl. the pre-BN biases), using the
    same bf16 weights / bf16 MXU inputs as the kernel."""
    (w1, b1, w2, b2, wa, ba, g1, be1, wb, bb, g2, be2, wo, bo) = params
    f32 = jnp.float32

    def bn(y, gamma, beta):
        mean = jnp.mean(y, axis=0, keepdims=True)
        var = jnp.mean((y - mean) ** 2, axis=0, keepdims=True)
        return gamma * (y - mean) / jnp.sqrt(var + BN_EPS) + beta

    h = jax.nn.relu(
        jnp.dot(x.astype(jnp.bfloat16), w1, preferred_element_type=f32) + b1
    )
    h = jax.nn.relu(
        jnp.dot(h.astype(jnp.bfloat16), w2, preferred_element_type=f32) + b2
    )
    for blk in range(NUM_BLOCKS):
        res = h
        y = (jnp.dot(h.astype(jnp.bfloat16), wa[blk], preferred_element_type=f32)
             + ba[blk][None, :])
        y = jax.nn.relu(bn(y, g1[blk][None, :], be1[blk][None, :]))
        z = (jnp.dot(y.astype(jnp.bfloat16), wb[blk], preferred_element_type=f32)
             + bb[blk][None, :])
        z = bn(z, g2[blk][None, :], be2[blk][None, :])
        h = jax.nn.relu(z + res)
    return jnp.sum(h * wo, axis=-1, keepdims=True) + bo


# --------------------------------- main ---------------------------------------
if __name__ == "__main__":
    key = jax.random.PRNGKey(0)
    kx, kp = jax.random.split(key)

    x = jax.random.normal(kx, (BATCH, INPUT_SIZE), jnp.float32)
    params = init_params(kp)

    # Kernel does not take the residual-block linear biases (BN cancels them).
    (w1, b1, w2, b2, wa, ba, g1, be1, wb, bb, g2, be2, wo, bo) = params
    kernel_params = (w1, b1, w2, b2, wa, g1, be1, wb, g2, be2, wo, bo)

    out = deepcubea_forward(x, kernel_params)
    out = jax.block_until_ready(out)

    ref = reference_forward(x, params)
    assert out.shape == (BATCH, 1), out.shape
    assert jnp.allclose(out, ref, atol=5e-3, rtol=5e-3), (
        f"mismatch: max abs diff {jnp.max(jnp.abs(out - ref))}"
    )

    print("KERNEL_OK")
</pallas_src>

<mosaic_0001>
module attributes {stable_mosaic.version = 11 : i64} {
  func.func @deepcubea_kernel(%arg0: memref<128x64xf32, #tpu.memory_space<vmem>>, %arg1: memref<64x128xbf16, #tpu.memory_space<vmem>>, %arg2: memref<1x128xf32, #tpu.memory_space<vmem>>, %arg3: memref<128x128xbf16, #tpu.memory_space<vmem>>, %arg4: memref<1x128xf32, #tpu.memory_space<vmem>>, %arg5: memref<4x128x128xbf16, #tpu.memory_space<vmem>>, %arg6: memref<4x128xf32, #tpu.memory_space<vmem>>, %arg7: memref<4x128xf32, #tpu.memory_space<vmem>>, %arg8: memref<4x128x128xbf16, #tpu.memory_space<vmem>>, %arg9: memref<4x128xf32, #tpu.memory_space<vmem>>, %arg10: memref<4x128xf32, #tpu.memory_space<vmem>>, %arg11: memref<1x128xf32, #tpu.memory_space<vmem>>, %arg12: memref<1x1xf32, #tpu.memory_space<vmem>>, %arg13: memref<128x1xf32, #tpu.memory_space<vmem>>) attributes {dimension_semantics = [], scalar_prefetch = 0 : i64, scratch_operands = 0 : i64, tpu.core_type = #tpu.core_type<tc>} {
    %c0 = arith.constant 0 : index
    %c0_0 = arith.constant 0 : index
    %0 = vector.load %arg0[%c0, %c0_0] : memref<128x64xf32, #tpu.memory_space<vmem>>, vector<128x64xf32>
    %1 = arith.truncf %0 : vector<128x64xf32> to vector<128x64xbf16>
    %c0_1 = arith.constant 0 : index
    %c0_2 = arith.constant 0 : index
    %2 = vector.load %arg1[%c0_1, %c0_2] : memref<64x128xbf16, #tpu.memory_space<vmem>>, vector<64x128xbf16>
    %cst = arith.constant dense<0.000000e+00> : vector<128x128xf32>
    %3 = tpu.matmul %1, %2, %cst {dimension_numbers = #tpu.dot_dimension_numbers<[1], [0], [0], [1], [0, 0, 1, 1], [], []>} : vector<128x64xbf16>, vector<64x128xbf16>, vector<128x128xf32> -> vector<128x128xf32>
    %c0_3 = arith.constant 0 : index
    %c0_4 = arith.constant 0 : index
    %4 = vector.load %arg2[%c0_3, %c0_4] : memref<1x128xf32, #tpu.memory_space<vmem>>, vector<1x128xf32>
    %5 = vector.broadcast %4 : vector<1x128xf32> to vector<128x128xf32>
    %6 = arith.addf %3, %5 : vector<128x128xf32>
    %cst_5 = arith.constant 0.000000e+00 : f32
    %7 = vector.broadcast %cst_5 : f32 to vector<128x128xf32>
    %8 = arith.maximumf %6, %7 : vector<128x128xf32>
    %9 = arith.truncf %8 : vector<128x128xf32> to vector<128x128xbf16>
    %c0_6 = arith.constant 0 : index
    %c0_7 = arith.constant 0 : index
    %10 = vector.load %arg3[%c0_6, %c0_7] : memref<128x128xbf16, #tpu.memory_space<vmem>>, vector<128x128xbf16>
    %cst_8 = arith.constant dense<0.000000e+00> : vector<128x128xf32>
    %11 = tpu.matmul %9, %10, %cst_8 {dimension_numbers = #tpu.dot_dimension_numbers<[1], [0], [0], [1], [0, 0, 1, 1], [], []>} : vector<128x128xbf16>, vector<128x128xbf16>, vector<128x128xf32> -> vector<128x128xf32>
    %c0_9 = arith.constant 0 : index
    %c0_10 = arith.constant 0 : index
    %12 = vector.load %arg4[%c0_9, %c0_10] : memref<1x128xf32, #tpu.memory_space<vmem>>, vector<1x128xf32>
    %13 = vector.broadcast %12 : vector<1x128xf32> to vector<128x128xf32>
    %14 = arith.addf %11, %13 : vector<128x128xf32>
    %cst_11 = arith.constant 0.000000e+00 : f32
    %15 = vector.broadcast %cst_11 : f32 to vector<128x128xf32>
    %16 = arith.maximumf %14, %15 : vector<128x128xf32>
    %17 = arith.truncf %16 : vector<128x128xf32> to vector<128x128xbf16>
    %c0_12 = arith.constant 0 : index
    %c0_13 = arith.constant 0 : index
    %c0_14 = arith.constant 0 : index
    %18 = vector.load %arg5[%c0_12, %c0_13, %c0_14] : memref<4x128x128xbf16, #tpu.memory_space<vmem>>, vector<1x128x128xbf16>
    %19 = vector.shape_cast %18 : vector<1x128x128xbf16> to vector<128x128xbf16>
    %cst_15 = arith.constant dense<0.000000e+00> : vector<128x128xf32>
    %20 = tpu.matmul %17, %19, %cst_15 {dimension_numbers = #tpu.dot_dimension_numbers<[1], [0], [0], [1], [0, 0, 1, 1], [], []>} : vector<128x128xbf16>, vector<128x128xbf16>, vector<128x128xf32> -> vector<128x128xf32>
    %c0_16 = arith.constant 0 : index
    %c0_17 = arith.constant 0 : index
    %21 = vector.load %arg6[%c0_16, %c0_17] : memref<4x128xf32, #tpu.memory_space<vmem>>, vector<1x128xf32>
    %c0_18 = arith.constant 0 : index
    %c0_19 = arith.constant 0 : index
    %22 = vector.load %arg7[%c0_18, %c0_19] : memref<4x128xf32, #tpu.memory_space<vmem>>, vector<1x128xf32>
    %cst_20 = arith.constant dense<0.000000e+00> : vector<128xf32>
    %23 = vector.multi_reduction <add>, %20, %cst_20 [0] : vector<128x128xf32> to vector<128xf32>
    %24 = vector.shape_cast %23 : vector<128xf32> to vector<1x128xf32>
    %cst_21 = arith.constant 1.280000e+02 : f32
    %25 = vector.broadcast %cst_21 : f32 to vector<1x128xf32>
    %26 = arith.divf %24, %25 : vector<1x128xf32>
    %27 = vector.broadcast %26 : vector<1x128xf32> to vector<128x128xf32>
    %28 = arith.subf %20, %27 : vector<128x128xf32>
    %29 = arith.mulf %28, %28 : vector<128x128xf32>
    %cst_22 = arith.constant dense<0.000000e+00> : vector<128xf32>
    %30 = vector.multi_reduction <add>, %29, %cst_22 [0] : vector<128x128xf32> to vector<128xf32>
    %31 = vector.shape_cast %30 : vector<128xf32> to vector<1x128xf32>
    %cst_23 = arith.constant 1.280000e+02 : f32
    %32 = vector.broadcast %cst_23 : f32 to vector<1x128xf32>
    %33 = arith.divf %31, %32 : vector<1x128xf32>
    %cst_24 = arith.constant 9.99999974E-6 : f32
    %34 = vector.broadcast %cst_24 : f32 to vector<1x128xf32>
    %35 = arith.addf %33, %34 : vector<1x128xf32>
    %36 = math.rsqrt %35 : vector<1x128xf32>
    %37 = arith.mulf %21, %36 : vector<1x128xf32>
    %38 = arith.mulf %37, %26 : vector<1x128xf32>
    %39 = arith.subf %22, %38 : vector<1x128xf32>
    %40 = vector.broadcast %37 : vector<1x128xf32> to vector<128x128xf32>
    %41 = arith.mulf %20, %40 : vector<128x128xf32>
    %42 = vector.broadcast %39 : vector<1x128xf32> to vector<128x128xf32>
    %43 = arith.addf %41, %42 : vector<128x128xf32>
    %cst_25 = arith.constant 0.000000e+00 : f32
    %44 = vector.broadcast %cst_25 : f32 to vector<128x128xf32>
    %45 = arith.maximumf %43, %44 : vector<128x128xf32>
    %46 = arith.truncf %45 : vector<128x128xf32> to vector<128x128xbf16>
    %c0_26 = arith.constant 0 : index
    %c0_27 = arith.constant 0 : index
    %c0_28 = arith.constant 0 : index
    %47 = vector.load %arg8[%c0_26, %c0_27, %c0_28] : memref<4x128x128xbf16, #tpu.memory_space<vmem>>, vector<1x128x128xbf16>
    %48 = vector.shape_cast %47 : vector<1x128x128xbf16> to vector<128x128xbf16>
    %cst_29 = arith.constant dense<0.000000e+00> : vector<128x128xf32>
    %49 = tpu.matmul %46, %48, %cst_29 {dimension_numbers = #tpu.dot_dimension_numbers<[1], [0], [0], [1], [0, 0, 1, 1], [], []>} : vector<128x128xbf16>, vector<128x128xbf16>, vector<128x128xf32> -> vector<128x128xf32>
    %c0_30 = arith.constant 0 : index
    %c0_31 = arith.constant 0 : index
    %50 = vector.load %arg9[%c0_30, %c0_31] : memref<4x128xf32, #tpu.memory_space<vmem>>, vector<1x128xf32>
    %c0_32 = arith.constant 0 : index
    %c0_33 = arith.constant 0 : index
    %51 = vector.load %arg10[%c0_32, %c0_33] : memref<4x128xf32, #tpu.memory_space<vmem>>, vector<1x128xf32>
    %cst_34 = arith.constant dense<0.000000e+00> : vector<128xf32>
    %52 = vector.multi_reduction <add>, %49, %cst_34 [0] : vector<128x128xf32> to vector<128xf32>
    %53 = vector.shape_cast %52 : vector<128xf32> to vector<1x128xf32>
    %cst_35 = arith.constant 1.280000e+02 : f32
    %54 = vector.broadcast %cst_35 : f32 to vector<1x128xf32>
    %55 = arith.divf %53, %54 : vector<1x128xf32>
    %56 = vector.broadcast %55 : vector<1x128xf32> to vector<128x128xf32>
    %57 = arith.subf %49, %56 : vector<128x128xf32>
    %58 = arith.mulf %57, %57 : vector<128x128xf32>
    %cst_36 = arith.constant dense<0.000000e+00> : vector<128xf32>
    %59 = vector.multi_reduction <add>, %58, %cst_36 [0] : vector<128x128xf32> to vector<128xf32>
    %60 = vector.shape_cast %59 : vector<128xf32> to vector<1x128xf32>
    %cst_37 = arith.constant 1.280000e+02 : f32
    %61 = vector.broadcast %cst_37 : f32 to vector<1x128xf32>
    %62 = arith.divf %60, %61 : vector<1x128xf32>
    %cst_38 = arith.constant 9.99999974E-6 : f32
    %63 = vector.broadcast %cst_38 : f32 to vector<1x128xf32>
    %64 = arith.addf %62, %63 : vector<1x128xf32>
    %65 = math.rsqrt %64 : vector<1x128xf32>
    %66 = arith.mulf %50, %65 : vector<1x128xf32>
    %67 = arith.mulf %66, %55 : vector<1x128xf32>
    %68 = arith.subf %51, %67 : vector<1x128xf32>
    %69 = vector.broadcast %66 : vector<1x128xf32> to vector<128x128xf32>
    %70 = arith.mulf %49, %69 : vector<128x128xf32>
    %71 = vector.broadcast %68 : vector<1x128xf32> to vector<128x128xf32>
    %72 = arith.addf %70, %71 : vector<128x128xf32>
    %73 = arith.addf %72, %16 : vector<128x128xf32>
    %cst_39 = arith.constant 0.000000e+00 : f32
    %74 = vector.broadcast %cst_39 : f32 to vector<128x128xf32>
    %75 = arith.maximumf %73, %74 : vector<128x128xf32>
    %76 = arith.truncf %75 : vector<128x128xf32> to vector<128x128xbf16>
    %c1 = arith.constant 1 : index
    %c0_40 = arith.constant 0 : index
    %c0_41 = arith.constant 0 : index
    %77 = vector.load %arg5[%c1, %c0_40, %c0_41] : memref<4x128x128xbf16, #tpu.memory_space<vmem>>, vector<1x128x128xbf16>
    %78 = vector.shape_cast %77 : vector<1x128x128xbf16> to vector<128x128xbf16>
    %cst_42 = arith.constant dense<0.000000e+00> : vector<128x128xf32>
    %79 = tpu.matmul %76, %78, %cst_42 {dimension_numbers = #tpu.dot_dimension_numbers<[1], [0], [0], [1], [0, 0, 1, 1], [], []>} : vector<128x128xbf16>, vector<128x128xbf16>, vector<128x128xf32> -> vector<128x128xf32>
    %c1_43 = arith.constant 1 : index
    %c0_44 = arith.constant 0 : index
    %80 = vector.load %arg6[%c1_43, %c0_44] : memref<4x128xf32, #tpu.memory_space<vmem>>, vector<1x128xf32>
    %c1_45 = arith.constant 1 : index
    %c0_46 = arith.constant 0 : index
    %81 = vector.load %arg7[%c1_45, %c0_46] : memref<4x128xf32, #tpu.memory_space<vmem>>, vector<1x128xf32>
    %cst_47 = arith.constant dense<0.000000e+00> : vector<128xf32>
    %82 = vector.multi_reduction <add>, %79, %cst_47 [0] : vector<128x128xf32> to vector<128xf32>
    %83 = vector.shape_cast %82 : vector<128xf32> to vector<1x128xf32>
    %cst_48 = arith.constant 1.280000e+02 : f32
    %84 = vector.broadcast %cst_48 : f32 to vector<1x128xf32>
    %85 = arith.divf %83, %84 : vector<1x128xf32>
    %86 = vector.broadcast %85 : vector<1x128xf32> to vector<128x128xf32>
    %87 = arith.subf %79, %86 : vector<128x128xf32>
    %88 = arith.mulf %87, %87 : vector<128x128xf32>
    %cst_49 = arith.constant dense<0.000000e+00> : vector<128xf32>
    %89 = vector.multi_reduction <add>, %88, %cst_49 [0] : vector<128x128xf32> to vector<128xf32>
    %90 = vector.shape_cast %89 : vector<128xf32> to vector<1x128xf32>
    %cst_50 = arith.constant 1.280000e+02 : f32
    %91 = vector.broadcast %cst_50 : f32 to vector<1x128xf32>
    %92 = arith.divf %90, %91 : vector<1x128xf32>
    %cst_51 = arith.constant 9.99999974E-6 : f32
    %93 = vector.broadcast %cst_51 : f32 to vector<1x128xf32>
    %94 = arith.addf %92, %93 : vector<1x128xf32>
    %95 = math.rsqrt %94 : vector<1x128xf32>
    %96 = arith.mulf %80, %95 : vector<1x128xf32>
    %97 = arith.mulf %96, %85 : vector<1x128xf32>
    %98 = arith.subf %81, %97 : vector<1x128xf32>
    %99 = vector.broadcast %96 : vector<1x128xf32> to vector<128x128xf32>
    %100 = arith.mulf %79, %99 : vector<128x128xf32>
    %101 = vector.broadcast %98 : vector<1x128xf32> to vector<128x128xf32>
    %102 = arith.addf %100, %101 : vector<128x128xf32>
    %cst_52 = arith.constant 0.000000e+00 : f32
    %103 = vector.broadcast %cst_52 : f32 to vector<128x128xf32>
    %104 = arith.maximumf %102, %103 : vector<128x128xf32>
    %105 = arith.truncf %104 : vector<128x128xf32> to vector<128x128xbf16>
    %c1_53 = arith.constant 1 : index
    %c0_54 = arith.constant 0 : index
    %c0_55 = arith.constant 0 : index
    %106 = vector.load %arg8[%c1_53, %c0_54, %c0_55] : memref<4x128x128xbf16, #tpu.memory_space<vmem>>, vector<1x128x128xbf16>
    %107 = vector.shape_cast %106 : vector<1x128x128xbf16> to vector<128x128xbf16>
    %cst_56 = arith.constant dense<0.000000e+00> : vector<128x128xf32>
    %108 = tpu.matmul %105, %107, %cst_56 {dimension_numbers = #tpu.dot_dimension_numbers<[1], [0], [0], [1], [0, 0, 1, 1], [], []>} : vector<128x128xbf16>, vector<128x128xbf16>, vector<128x128xf32> -> vector<128x128xf32>
    %c1_57 = arith.constant 1 : index
    %c0_58 = arith.constant 0 : index
    %109 = vector.load %arg9[%c1_57, %c0_58] : memref<4x128xf32, #tpu.memory_space<vmem>>, vector<1x128xf32>
    %c1_59 = arith.constant 1 : index
    %c0_60 = arith.constant 0 : index
    %110 = vector.load %arg10[%c1_59, %c0_60] : memref<4x128xf32, #tpu.memory_space<vmem>>, vector<1x128xf32>
    %cst_61 = arith.constant dense<0.000000e+00> : vector<128xf32>
    %111 = vector.multi_reduction <add>, %108, %cst_61 [0] : vector<128x128xf32> to vector<128xf32>
    %112 = vector.shape_cast %111 : vector<128xf32> to vector<1x128xf32>
    %cst_62 = arith.constant 1.280000e+02 : f32
    %113 = vector.broadcast %cst_62 : f32 to vector<1x128xf32>
    %114 = arith.divf %112, %113 : vector<1x128xf32>
    %115 = vector.broadcast %114 : vector<1x128xf32> to vector<128x128xf32>
    %116 = arith.subf %108, %115 : vector<128x128xf32>
    %117 = arith.mulf %116, %116 : vector<128x128xf32>
    %cst_63 = arith.constant dense<0.000000e+00> : vector<128xf32>
    %118 = vector.multi_reduction <add>, %117, %cst_63 [0] : vector<128x128xf32> to vector<128xf32>
    %119 = vector.shape_cast %118 : vector<128xf32> to vector<1x128xf32>
    %cst_64 = arith.constant 1.280000e+02 : f32
    %120 = vector.broadcast %cst_64 : f32 to vector<1x128xf32>
    %121 = arith.divf %119, %120 : vector<1x128xf32>
    %cst_65 = arith.constant 9.99999974E-6 : f32
    %122 = vector.broadcast %cst_65 : f32 to vector<1x128xf32>
    %123 = arith.addf %121, %122 : vector<1x128xf32>
    %124 = math.rsqrt %123 : vector<1x128xf32>
    %125 = arith.mulf %109, %124 : vector<1x128xf32>
    %126 = arith.mulf %125, %114 : vector<1x128xf32>
    %127 = arith.subf %110, %126 : vector<1x128xf32>
    %128 = vector.broadcast %125 : vector<1x128xf32> to vector<128x128xf32>
    %129 = arith.mulf %108, %128 : vector<128x128xf32>
    %130 = vector.broadcast %127 : vector<1x128xf32> to vector<128x128xf32>
    %131 = arith.addf %129, %130 : vector<128x128xf32>
    %132 = arith.addf %131, %75 : vector<128x128xf32>
    %cst_66 = arith.constant 0.000000e+00 : f32
    %133 = vector.broadcast %cst_66 : f32 to vector<128x128xf32>
    %134 = arith.maximumf %132, %133 : vector<128x128xf32>
    %135 = arith.truncf %134 : vector<128x128xf32> to vector<128x128xbf16>
    %c2 = arith.constant 2 : index
    %c0_67 = arith.constant 0 : index
    %c0_68 = arith.constant 0 : index
    %136 = vector.load %arg5[%c2, %c0_67, %c0_68] : memref<4x128x128xbf16, #tpu.memory_space<vmem>>, vector<1x128x128xbf16>
    %137 = vector.shape_cast %136 : vector<1x128x128xbf16> to vector<128x128xbf16>
    %cst_69 = arith.constant dense<0.000000e+00> : vector<128x128xf32>
    %138 = tpu.matmul %135, %137, %cst_69 {dimension_numbers = #tpu.dot_dimension_numbers<[1], [0], [0], [1], [0, 0, 1, 1], [], []>} : vector<128x128xbf16>, vector<128x128xbf16>, vector<128x128xf32> -> vector<128x128xf32>
    %c2_70 = arith.constant 2 : index
    %c0_71 = arith.constant 0 : index
    %139 = vector.load %arg6[%c2_70, %c0_71] : memref<4x128xf32, #tpu.memory_space<vmem>>, vector<1x128xf32>
    %c2_72 = arith.constant 2 : index
    %c0_73 = arith.constant 0 : index
    %140 = vector.load %arg7[%c2_72, %c0_73] : memref<4x128xf32, #tpu.memory_space<vmem>>, vector<1x128xf32>
    %cst_74 = arith.constant dense<0.000000e+00> : vector<128xf32>
    %141 = vector.multi_reduction <add>, %138, %cst_74 [0] : vector<128x128xf32> to vector<128xf32>
    %142 = vector.shape_cast %141 : vector<128xf32> to vector<1x128xf32>
    %cst_75 = arith.constant 1.280000e+02 : f32
    %143 = vector.broadcast %cst_75 : f32 to vector<1x128xf32>
    %144 = arith.divf %142, %143 : vector<1x128xf32>
    %145 = vector.broadcast %144 : vector<1x128xf32> to vector<128x128xf32>
    %146 = arith.subf %138, %145 : vector<128x128xf32>
    %147 = arith.mulf %146, %146 : vector<128x128xf32>
    %cst_76 = arith.constant dense<0.000000e+00> : vector<128xf32>
    %148 = vector.multi_reduction <add>, %147, %cst_76 [0] : vector<128x128xf32> to vector<128xf32>
    %149 = vector.shape_cast %148 : vector<128xf32> to vector<1x128xf32>
    %cst_77 = arith.constant 1.280000e+02 : f32
    %150 = vector.broadcast %cst_77 : f32 to vector<1x128xf32>
    %151 = arith.divf %149, %150 : vector<1x128xf32>
    %cst_78 = arith.constant 9.99999974E-6 : f32
    %152 = vector.broadcast %cst_78 : f32 to vector<1x128xf32>
    %153 = arith.addf %151, %152 : vector<1x128xf32>
    %154 = math.rsqrt %153 : vector<1x128xf32>
    %155 = arith.mulf %139, %154 : vector<1x128xf32>
    %156 = arith.mulf %155, %144 : vector<1x128xf32>
    %157 = arith.subf %140, %156 : vector<1x128xf32>
    %158 = vector.broadcast %155 : vector<1x128xf32> to vector<128x128xf32>
    %159 = arith.mulf %138, %158 : vector<128x128xf32>
    %160 = vector.broadcast %157 : vector<1x128xf32> to vector<128x128xf32>
    %161 = arith.addf %159, %160 : vector<128x128xf32>
    %cst_79 = arith.constant 0.000000e+00 : f32
    %162 = vector.broadcast %cst_79 : f32 to vector<128x128xf32>
    %163 = arith.maximumf %161, %162 : vector<128x128xf32>
    %164 = arith.truncf %163 : vector<128x128xf32> to vector<128x128xbf16>
    %c2_80 = arith.constant 2 : index
    %c0_81 = arith.constant 0 : index
    %c0_82 = arith.constant 0 : index
    %165 = vector.load %arg8[%c2_80, %c0_81, %c0_82] : memref<4x128x128xbf16, #tpu.memory_space<vmem>>, vector<1x128x128xbf16>
    %166 = vector.shape_cast %165 : vector<1x128x128xbf16> to vector<128x128xbf16>
    %cst_83 = arith.constant dense<0.000000e+00> : vector<128x128xf32>
    %167 = tpu.matmul %164, %166, %cst_83 {dimension_numbers = #tpu.dot_dimension_numbers<[1], [0], [0], [1], [0, 0, 1, 1], [], []>} : vector<128x128xbf16>, vector<128x128xbf16>, vector<128x128xf32> -> vector<128x128xf32>
    %c2_84 = arith.constant 2 : index
    %c0_85 = arith.constant 0 : index
    %168 = vector.load %arg9[%c2_84, %c0_85] : memref<4x128xf32, #tpu.memory_space<vmem>>, vector<1x128xf32>
    %c2_86 = arith.constant 2 : index
    %c0_87 = arith.constant 0 : index
    %169 = vector.load %arg10[%c2_86, %c0_87] : memref<4x128xf32, #tpu.memory_space<vmem>>, vector<1x128xf32>
    %cst_88 = arith.constant dense<0.000000e+00> : vector<128xf32>
    %170 = vector.multi_reduction <add>, %167, %cst_88 [0] : vector<128x128xf32> to vector<128xf32>
    %171 = vector.shape_cast %170 : vector<128xf32> to vector<1x128xf32>
    %cst_89 = arith.constant 1.280000e+02 : f32
    %172 = vector.broadcast %cst_89 : f32 to vector<1x128xf32>
    %173 = arith.divf %171, %172 : vector<1x128xf32>
    %174 = vector.broadcast %173 : vector<1x128xf32> to vector<128x128xf32>
    %175 = arith.subf %167, %174 : vector<128x128xf32>
    %176 = arith.mulf %175, %175 : vector<128x128xf32>
    %cst_90 = arith.constant dense<0.000000e+00> : vector<128xf32>
    %177 = vector.multi_reduction <add>, %176, %cst_90 [0] : vector<128x128xf32> to vector<128xf32>
    %178 = vector.shape_cast %177 : vector<128xf32> to vector<1x128xf32>
    %cst_91 = arith.constant 1.280000e+02 : f32
    %179 = vector.broadcast %cst_91 : f32 to vector<1x128xf32>
    %180 = arith.divf %178, %179 : vector<1x128xf32>
    %cst_92 = arith.constant 9.99999974E-6 : f32
    %181 = vector.broadcast %cst_92 : f32 to vector<1x128xf32>
    %182 = arith.addf %180, %181 : vector<1x128xf32>
    %183 = math.rsqrt %182 : vector<1x128xf32>
    %184 = arith.mulf %168, %183 : vector<1x128xf32>
    %185 = arith.mulf %184, %173 : vector<1x128xf32>
    %186 = arith.subf %169, %185 : vector<1x128xf32>
    %187 = vector.broadcast %184 : vector<1x128xf32> to vector<128x128xf32>
    %188 = arith.mulf %167, %187 : vector<128x128xf32>
    %189 = vector.broadcast %186 : vector<1x128xf32> to vector<128x128xf32>
    %190 = arith.addf %188, %189 : vector<128x128xf32>
    %191 = arith.addf %190, %134 : vector<128x128xf32>
    %cst_93 = arith.constant 0.000000e+00 : f32
    %192 = vector.broadcast %cst_93 : f32 to vector<128x128xf32>
    %193 = arith.maximumf %191, %192 : vector<128x128xf32>
    %194 = arith.truncf %193 : vector<128x128xf32> to vector<128x128xbf16>
    %c3 = arith.constant 3 : index
    %c0_94 = arith.constant 0 : index
    %c0_95 = arith.constant 0 : index
    %195 = vector.load %arg5[%c3, %c0_94, %c0_95] : memref<4x128x128xbf16, #tpu.memory_space<vmem>>, vector<1x128x128xbf16>
    %196 = vector.shape_cast %195 : vector<1x128x128xbf16> to vector<128x128xbf16>
    %cst_96 = arith.constant dense<0.000000e+00> : vector<128x128xf32>
    %197 = tpu.matmul %194, %196, %cst_96 {dimension_numbers = #tpu.dot_dimension_numbers<[1], [0], [0], [1], [0, 0, 1, 1], [], []>} : vector<128x128xbf16>, vector<128x128xbf16>, vector<128x128xf32> -> vector<128x128xf32>
    %c3_97 = arith.constant 3 : index
    %c0_98 = arith.constant 0 : index
    %198 = vector.load %arg6[%c3_97, %c0_98] : memref<4x128xf32, #tpu.memory_space<vmem>>, vector<1x128xf32>
    %c3_99 = arith.constant 3 : index
    %c0_100 = arith.constant 0 : index
    %199 = vector.load %arg7[%c3_99, %c0_100] : memref<4x128xf32, #tpu.memory_space<vmem>>, vector<1x128xf32>
    %cst_101 = arith.constant dense<0.000000e+00> : vector<128xf32>
    %200 = vector.multi_reduction <add>, %197, %cst_101 [0] : vector<128x128xf32> to vector<128xf32>
    %201 = vector.shape_cast %200 : vector<128xf32> to vector<1x128xf32>
    %cst_102 = arith.constant 1.280000e+02 : f32
    %202 = vector.broadcast %cst_102 : f32 to vector<1x128xf32>
    %203 = arith.divf %201, %202 : vector<1x128xf32>
    %204 = vector.broadcast %203 : vector<1x128xf32> to vector<128x128xf32>
    %205 = arith.subf %197, %204 : vector<128x128xf32>
    %206 = arith.mulf %205, %205 : vector<128x128xf32>
    %cst_103 = arith.constant dense<0.000000e+00> : vector<128xf32>
    %207 = vector.multi_reduction <add>, %206, %cst_103 [0] : vector<128x128xf32> to vector<128xf32>
    %208 = vector.shape_cast %207 : vector<128xf32> to vector<1x128xf32>
    %cst_104 = arith.constant 1.280000e+02 : f32
    %209 = vector.broadcast %cst_104 : f32 to vector<1x128xf32>
    %210 = arith.divf %208, %209 : vector<1x128xf32>
    %cst_105 = arith.constant 9.99999974E-6 : f32
    %211 = vector.broadcast %cst_105 : f32 to vector<1x128xf32>
    %212 = arith.addf %210, %211 : vector<1x128xf32>
    %213 = math.rsqrt %212 : vector<1x128xf32>
    %214 = arith.mulf %198, %213 : vector<1x128xf32>
    %215 = arith.mulf %214, %203 : vector<1x128xf32>
    %216 = arith.subf %199, %215 : vector<1x128xf32>
    %217 = vector.broadcast %214 : vector<1x128xf32> to vector<128x128xf32>
    %218 = arith.mulf %197, %217 : vector<128x128xf32>
    %219 = vector.broadcast %216 : vector<1x128xf32> to vector<128x128xf32>
    %220 = arith.addf %218, %219 : vector<128x128xf32>
    %cst_106 = arith.constant 0.000000e+00 : f32
    %221 = vector.broadcast %cst_106 : f32 to vector<128x128xf32>
    %222 = arith.maximumf %220, %221 : vector<128x128xf32>
    %223 = arith.truncf %222 : vector<128x128xf32> to vector<128x128xbf16>
    %c3_107 = arith.constant 3 : index
    %c0_108 = arith.constant 0 : index
    %c0_109 = arith.constant 0 : index
    %224 = vector.load %arg8[%c3_107, %c0_108, %c0_109] : memref<4x128x128xbf16, #tpu.memory_space<vmem>>, vector<1x128x128xbf16>
    %225 = vector.shape_cast %224 : vector<1x128x128xbf16> to vector<128x128xbf16>
    %cst_110 = arith.constant dense<0.000000e+00> : vector<128x128xf32>
    %226 = tpu.matmul %223, %225, %cst_110 {dimension_numbers = #tpu.dot_dimension_numbers<[1], [0], [0], [1], [0, 0, 1, 1], [], []>} : vector<128x128xbf16>, vector<128x128xbf16>, vector<128x128xf32> -> vector<128x128xf32>
    %c3_111 = arith.constant 3 : index
    %c0_112 = arith.constant 0 : index
    %227 = vector.load %arg9[%c3_111, %c0_112] : memref<4x128xf32, #tpu.memory_space<vmem>>, vector<1x128xf32>
    %c3_113 = arith.constant 3 : index
    %c0_114 = arith.constant 0 : index
    %228 = vector.load %arg10[%c3_113, %c0_114] : memref<4x128xf32, #tpu.memory_space<vmem>>, vector<1x128xf32>
    %cst_115 = arith.constant dense<0.000000e+00> : vector<128xf32>
    %229 = vector.multi_reduction <add>, %226, %cst_115 [0] : vector<128x128xf32> to vector<128xf32>
    %230 = vector.shape_cast %229 : vector<128xf32> to vector<1x128xf32>
    %cst_116 = arith.constant 1.280000e+02 : f32
    %231 = vector.broadcast %cst_116 : f32 to vector<1x128xf32>
    %232 = arith.divf %230, %231 : vector<1x128xf32>
    %233 = vector.broadcast %232 : vector<1x128xf32> to vector<128x128xf32>
    %234 = arith.subf %226, %233 : vector<128x128xf32>
    %235 = arith.mulf %234, %234 : vector<128x128xf32>
    %cst_117 = arith.constant dense<0.000000e+00> : vector<128xf32>
    %236 = vector.multi_reduction <add>, %235, %cst_117 [0] : vector<128x128xf32> to vector<128xf32>
    %237 = vector.shape_cast %236 : vector<128xf32> to vector<1x128xf32>
    %cst_118 = arith.constant 1.280000e+02 : f32
    %238 = vector.broadcast %cst_118 : f32 to vector<1x128xf32>
    %239 = arith.divf %237, %238 : vector<1x128xf32>
    %cst_119 = arith.constant 9.99999974E-6 : f32
    %240 = vector.broadcast %cst_119 : f32 to vector<1x128xf32>
    %241 = arith.addf %239, %240 : vector<1x128xf32>
    %242 = math.rsqrt %241 : vector<1x128xf32>
    %243 = arith.mulf %227, %242 : vector<1x128xf32>
    %244 = arith.mulf %243, %232 : vector<1x128xf32>
    %245 = arith.subf %228, %244 : vector<1x128xf32>
    %246 = vector.broadcast %243 : vector<1x128xf32> to vector<128x128xf32>
    %247 = arith.mulf %226, %246 : vector<128x128xf32>
    %248 = vector.broadcast %245 : vector<1x128xf32> to vector<128x128xf32>
    %249 = arith.addf %247, %248 : vector<128x128xf32>
    %250 = arith.addf %249, %193 : vector<128x128xf32>
    %cst_120 = arith.constant 0.000000e+00 : f32
    %251 = vector.broadcast %cst_120 : f32 to vector<128x128xf32>
    %252 = arith.maximumf %250, %251 : vector<128x128xf32>
    %c0_121 = arith.constant 0 : index
    %c0_122 = arith.constant 0 : index
    %253 = vector.load %arg11[%c0_121, %c0_122] : memref<1x128xf32, #tpu.memory_space<vmem>>, vector<1x128xf32>
    %254 = vector.broadcast %253 : vector<1x128xf32> to vector<128x128xf32>
    %255 = arith.mulf %252, %254 : vector<128x128xf32>
    %cst_123 = arith.constant dense<0.000000e+00> : vector<128xf32>
    %256 = vector.multi_reduction <add>, %255, %cst_123 [1] : vector<128x128xf32> to vector<128xf32>
    %257 = vector.shape_cast %256 : vector<128xf32> to vector<128x1xf32>
    %c0_124 = arith.constant 0 : index
    %c0_125 = arith.constant 0 : index
    %258 = vector.load %arg12[%c0_124, %c0_125] : memref<1x1xf32, #tpu.memory_space<vmem>>, vector<1x1xf32>
    %259 = vector.broadcast %258 : vector<1x1xf32> to vector<128x1xf32>
    %260 = arith.addf %257, %259 : vector<128x1xf32>
    %c0_126 = arith.constant 0 : index
    %c0_127 = arith.constant 0 : index
    %261 = vector.load %arg13[%c0_126, %c0_127] : memref<128x1xf32, #tpu.memory_space<vmem>>, vector<128x1xf32>
    tpu.vector_store %arg13[%c0_126, %c0_127], %260 {strides = array<i32>} : memref<128x1xf32, #tpu.memory_space<vmem>>, vector<128x1xf32>,
    return
  }
}

</mosaic_0001>

<bundles_post_ra>
// kernel: deepcubea_forward.1
= control target key start
LH: loop header
LB: loop body
LE: loop exit
PB: predicated region body
PF: predicated region fallthrough
CT: control target
= control target key end

     0   :  { %s5277_s0 = inlined_call_operand.vmem [shape: f32[128,64], index: 0, kind: input, shape index: {}]   ;;  %s5278_s1 = inlined_call_operand.vmem [shape: bf16[64,128], index: 1, kind: input, shape index: {}]   ;;  %s5279_s2 = inlined_call_operand.vmem [shape: f32[1,128], index: 2, kind: input, shape index: {}]   ;;  %s5280_s3 = inlined_call_operand.vmem [shape: bf16[128,128], index: 3, kind: input, shape index: {}]   ;;  %s5281_s4 = inlined_call_operand.vmem [shape: f32[1,128], index: 4, kind: input, shape index: {}]   ;;  %s5282_s5 = inlined_call_operand.hbm [shape: bf16[4,128,128], index: 5, kind: input, shape index: {}]   ;;  %s5283_s6 = inlined_call_operand.vmem [shape: f32[4,128], index: 6, kind: input, shape index: {}]   ;;  %s5284_s7 = inlined_call_operand.vmem [shape: f32[4,128], index: 7, kind: input, shape index: {}]   ;;  %s5285_s8 = inlined_call_operand.hbm [shape: bf16[4,128,128], index: 8, kind: input, shape index: {}]   ;;  %s5286_s9 = inlined_call_operand.vmem [shape: f32[4,128], index: 9, kind: input, shape index: {}]   ;;  %s5287_s10 = inlined_call_operand.vmem [shape: f32[4,128], index: 10, kind: input, shape index: {}]   ;;  %s5288_s11 = inlined_call_operand.vmem [shape: f32[1,128], index: 11, kind: input, shape index: {}]   ;;  %s5289_s12 = inlined_call_operand.<no memory space> [shape: f32[1,1], index: 12, kind: input, shape index: {}]   ;;  %s5290_s13 = inlined_call_operand.vmem [shape: f32[128,1], index: 13, kind: output, shape index: {}]  }
   0x1   :  { %v18_v0 = vstv %s5289_s12 }
   0x2   :  { %19 = vst [vmem:[#allocation2] sm:$0x1] %v18_v0 }
   0x3   :  { %20 = vsyncpa [#allocation4], 0 }
   0x4   :  { %21 = vsyncpa [#allocation6], 0  ;;  %s3820_s27 = smov [#allocation3]   ;;  %s3772_s14 = scalar_lea.hbm %s5282_s5, 4096 }
   0x5   :  { %s37_s28 = sshll.u32 %s3820_s27, 4  ;;  %p3773_p0 = scmp.ne.s32.totalorder %s5282_s5, %s3772_s14  ;;  %s38_s28 = int_to_ptr.vmem [resolvable:$true] %s37_s28 }
   0x6   :  { %p3776_p1 = scmp.lt.u32.totalorder %s3772_s14, %s5282_s5 }
   0x8   :  { %p3778_p2 = pnand %p3776_p1, %p3773_p0 }
   0xa   :  { %3781 = shalt.err (!%p3778_p2)
}
   0xb   :  { %s3782_s12 = scalar_lea.vmem %s38_s28, 4096  ;;  %p3787_p4 = scmp.lt.s32.totalorder %s38_s28, %s38_s28 }
   0xc   :  { %p3783_p3 = scmp.ne.s32.totalorder %s38_s28, %s3782_s12  ;;  %p3788_p5 = scmp.lt.s32.totalorder %s3782_s12, %s3782_s12 }
   0xe   :  { %p3789_p6 = por %p3788_p5, %p3787_p4 }
  0x10   :  { %p3790_p7 = pnand %p3789_p6, %p3783_p3 }
  0x12   :  { %3793 = shalt.err (!%p3790_p7)
}
  0x13   :  { %s3821_s19 = smov 64   ;;  %s3822_s20 = smov 4  }
  0x14   :  { %43 = dma.hbm_to_vmem [thread:$0]  %s5282_s5, 4096, %s38_s28, [#allocation4], %s3821_s19, %s3821_s19, %s3822_s20  }
  0x15   :  { %s3823_s23 = smov [#allocation5]   ;;  %s3794_s27 = scalar_lea.hbm %s5285_s8, 4096 }
  0x16   :  { %s53_s24 = sshll.u32 %s3823_s23, 4  ;;  %p3795_p8 = scmp.ne.s32.totalorder %s5285_s8, %s3794_s27  ;;  %s54_s24 = int_to_ptr.vmem [resolvable:$true] %s53_s24 }
  0x17   :  { %p3798_p9 = scmp.lt.u32.totalorder %s3794_s27, %s5285_s8 }
  0x19   :  { %p3800_p10 = pnand %p3798_p9, %p3795_p8 }
  0x1b   :  { %3803 = shalt.err (!%p3800_p10)
}
  0x1c   :  { %s3804_s16 = scalar_lea.vmem %s54_s24, 4096  ;;  %p3809_p12 = scmp.lt.s32.totalorder %s54_s24, %s54_s24 }
  0x1d   :  { %p3805_p11 = scmp.ne.s32.totalorder %s54_s24, %s3804_s16  ;;  %p3810_p13 = scmp.lt.s32.totalorder %s3804_s16, %s3804_s16 }
  0x1f   :  { %p3811_p0 = por %p3810_p13, %p3809_p12 }
  0x21   :  { %p3812_p1 = pnand %p3811_p0, %p3805_p11 }
  0x23   :  { %3815 = shalt.err (!%p3812_p1)
}
  0x24   :  { %59 = dma.hbm_to_vmem [thread:$0]  %s5285_s8, 4096, %s54_s24, [#allocation6], %s3821_s19, %s3821_s19, %s3822_s20  }
  0x25   :  { %3816 = dma.done.wait [#allocation4], 4096  }
  0x26   :  { %3817 = vsyncadd [#allocation4], 4294963200 }
  0x27   :  { %3818 = dma.done.wait [#allocation6], 4096  }
  0x28   :  { %3819 = vsyncadd [#allocation6], 4294963200  ;;  %v3680_v1 = vld [vmem:[%s5278_s1] sm:$0xff]   ;;  %v3681_v2 = vld [vmem:[%s5278_s1 + $0x8] sm:$0xff]   ;;  %vm138_vm0 = vcmask 523264   ;;  %vm3081_vm1 = vcmask 7168  }
  0x29   :  { %3348 = vmatprep.subr.bf16.mxu0 %v3680_v1  ;;  %v3682_v3 = vld [vmem:[%s5278_s1 + $0x10] sm:$0xff]   ;;  %v75_v4 = vld [vmem:[%s5277_s0] sm:$0xff]  ;;  %v76_v5 = vld [vmem:[%s5277_s0 + $0x8] sm:$0xff] }
  0x2a   :  { %3349 = vmatpush3.bf16.msra.mxu0 %v3680_v1  ;;  %v91_v6 = vpack.c.bf16 %v76_v5, %v75_v4  ;;  %v3683_v7 = vld [vmem:[%s5278_s1 + $0x18] sm:$0xff]   ;;  %v77_v8 = vld [vmem:[%s5277_s0 + $0x10] sm:$0xff]  ;;  %v79_v10 = vld [vmem:[%s5277_s0 + $0x20] sm:$0xff] }
  0x2b   :  { %3350 = vmatprep.subr.bf16.mxu0 %v3681_v2  ;;  %v78_v9 = vld [vmem:[%s5277_s0 + $0x18] sm:$0xff]  ;;  %v3684_v11 = vld [vmem:[%s5280_s3] sm:$0xff]   ;;  %v3685_v12 = vld [vmem:[%s5280_s3 + $0x8] sm:$0xff]  }
  0x2c   :  { %3356 = vmatprep.mubr.msk.bf16.mxu0 %vm138_vm0, %v91_v6  ;;  %v80_v13 = vld [vmem:[%s5277_s0 + $0x28] sm:$0xff]  ;;  %3372 = vmatprep.subr.bf16.mxu1 %v3684_v11  ;;  %v92_v14 = vpack.c.bf16 %v78_v9, %v77_v8  ;;  %v3686_v15 = vld [vmem:[%s5280_s3 + $0x10] sm:$0xff]   ;;  %v3687_v17 = vld [vmem:[%s5280_s3 + $0x18] sm:$0xff]  }
  0x2d   :  { %3373 = vmatpush3.bf16.msra.mxu1 %v3684_v11  ;;  %v93_v16 = vpack.c.bf16 %v80_v13, %v79_v10  ;;  %v81_v18 = vld [vmem:[%s5277_s0 + $0x30] sm:$0xff]  ;;  %v82_v19 = vld [vmem:[%s5277_s0 + $0x38] sm:$0xff]  ;;  %v83_v20 = vld [vmem:[%s5277_s0 + $0x40] sm:$0xff] }
  0x2e   :  { %3351 = vmatpush3.bf16.msra.mxu0 %v3681_v2  ;;  %3374 = vmatprep.subr.bf16.mxu1 %v3685_v12  ;;  %v84_v21 = vld [vmem:[%s5277_s0 + $0x48] sm:$0xff]  ;;  %v3688_v22 = vld [vmem:[%s5280_s3 + $0x20] sm:$0xff]   ;;  %v94_v23 = vpack.c.bf16 %v82_v19, %v81_v18  ;;  %v85_v26 = vld [vmem:[%s5277_s0 + $0x50] sm:$0xff] }
  0x2f   :  { %3352 = vmatprep.subr.bf16.mxu0 %v3682_v3  ;;  %v95_v24 = vpack.c.bf16 %v84_v21, %v83_v20  ;;  %v3689_v25 = vld [vmem:[%s5280_s3 + $0x28] sm:$0xff]   ;;  %v86_v27 = vld [vmem:[%s5277_s0 + $0x58] sm:$0xff]  ;;  %v87_v28 = vld [vmem:[%s5277_s0 + $0x60] sm:$0xff] }
  0x30   :  { %v88_v29 = vld [vmem:[%s5277_s0 + $0x68] sm:$0xff]  ;;  %v96_v30 = vpack.c.bf16 %v86_v27, %v85_v26  ;;  %v89_v32 = vld [vmem:[%s5277_s0 + $0x70] sm:$0xff]  ;;  %v90_v33 = vld [vmem:[%s5277_s0 + $0x78] sm:$0xff] }
  0x31   :  { %3375 = vmatpush3.bf16.msra.mxu1 %v3685_v12  ;;  %v97_v31 = vpack.c.bf16 %v88_v29, %v87_v28  ;;  %v98_v34 = vpack.c.bf16 %v90_v33, %v89_v32  ;;  %v3690_v35 = vld [vmem:[%s5280_s3 + $0x30] sm:$0xff]   ;;  %v3691_v36 = vld [vmem:[%s5280_s3 + $0x38] sm:$0xff]   ;;  %v3692_v37 = vld [vmem:[#allocation3] sm:$0xff]  }
  0x32   :  { %3353 = vmatpush3.bf16.msra.mxu0 %v3682_v3  ;;  %3376 = vmatprep.subr.bf16.mxu1 %v3686_v15  ;;  %v3693_v38 = vld [vmem:[#allocation3 + $0x8] sm:$0xff]   ;;  %v3694_v39 = vld [vmem:[#allocation3 + $0x10] sm:$0xff]   ;;  %v3695_v40 = vld [vmem:[#allocation3 + $0x18] sm:$0xff]  }
  0x33   :  { %3354 = vmatprep.subr.bf16.mxu0 %v3683_v7  ;;  %v3696_v41 = vld [vmem:[#allocation3 + $0x20] sm:$0xff]   ;;  %v3697_v42 = vld [vmem:[#allocation3 + $0x28] sm:$0xff]   ;;  %v3104_v43 = vld [vmem:[%s5279_s2] ss:$0 sm:$0xff] }
  0x35   :  { %3377 = vmatpush3.bf16.msra.mxu1 %v3686_v15 }
  0x36   :  { %3355 = vmatpush3.bf16.msra.mxu0 %v3683_v7  ;;  %3378 = vmatprep.subr.bf16.mxu1 %v3687_v17 }
  0x37   :  { %3404 = vmatprep.subr.bf16.mxu0 %v3692_v37 }
  0x39   :  { %3357 = vmatmul.mubr.msk.bf16.vlgmr.msra.gmra.mrb[0].mxu0 %vm138_vm0, %v92_v14  ;;  %3379 = vmatpush3.bf16.msra.mxu1 %v3687_v17 }
  0x3a   :  { %3360 = vmatprep.mubr.msk.bf16.mxu0 %vm138_vm0, %v93_v16  ;;  %3380 = vmatprep.subr.bf16.mxu1 %v3688_v22 }
  0x3b   :  { %3405 = vmatpush3.bf16.msra.mxu0 %v3692_v37  ;;  %v3699_v37 = vld [vmem:[#allocation3 + $0x38] sm:$0xff]  }
  0x3c   :  { %3406 = vmatprep.subr.bf16.mxu0 %v3693_v38 }
  0x3d   :  { %3381 = vmatpush3.bf16.msra.mxu1 %v3688_v22 }
  0x3e   :  { %3382 = vmatprep.subr.bf16.mxu1 %v3689_v25 }
  0x3f   :  { %3407 = vmatpush3.bf16.msra.mxu0 %v3693_v38  ;;  %v3117_v38 = vld [vmem:[%s5281_s4] ss:$0 sm:$0xff] }
  0x40   :  { %3408 = vmatprep.subr.bf16.mxu0 %v3694_v39 }
  0x41   :  { %3361 = vmatmul.mubr.msk.bf16.gmra.mrb[4].mxu0 %vm138_vm0, %v94_v23  ;;  %3383 = vmatpush3.bf16.msra.mxu1 %v3689_v25 }
  0x42   :  { %3364 = vmatprep.mubr.msk.bf16.mxu0 %vm138_vm0, %v95_v24  ;;  %3384 = vmatprep.subr.bf16.mxu1 %v3690_v35 }
  0x43   :  { %3409 = vmatpush3.bf16.msra.mxu0 %v3694_v39 }
  0x44   :  { %3410 = vmatprep.subr.bf16.mxu0 %v3695_v40 }
  0x45   :  { %3385 = vmatpush3.bf16.msra.mxu1 %v3690_v35 }
  0x46   :  { %3386 = vmatprep.subr.bf16.mxu1 %v3691_v36 }
  0x47   :  { %3411 = vmatpush3.bf16.msra.mxu0 %v3695_v40 }
  0x48   :  { %3412 = vmatprep.subr.bf16.mxu0 %v3696_v41 }
  0x49   :  { %3365 = vmatmul.mubr.msk.bf16.gmra.mrb[8].mxu0 %vm138_vm0, %v96_v30  ;;  %3387 = vmatpush3.bf16.msra.mxu1 %v3691_v36  ;;  %v3698_v36 = vld [vmem:[#allocation3 + $0x30] sm:$0xff]  }
  0x4a   :  { %3368 = vmatprep.mubr.msk.bf16.mxu0 %vm138_vm0, %v97_v31 }
  0x4b   :  { %3413 = vmatpush3.bf16.msra.mxu0 %v3696_v41 }
  0x4c   :  { %3414 = vmatprep.subr.bf16.mxu0 %v3697_v42 }
  0x4f   :  { %3415 = vmatpush3.bf16.msra.mxu0 %v3697_v42 }
  0x50   :  { %3416 = vmatprep.subr.bf16.mxu0 %v3698_v36 }
  0x51   :  { %3369 = vmatmul.mubr.msk.bf16.gmra.mrb[12].mxu0 %vm138_vm0, %v98_v34 }
  0x53   :  { %3417 = vmatpush3.bf16.msra.mxu0 %v3698_v36  ;;  %v3705_v36 = vld [vmem:[#allocation5 + $0x28] sm:$0xff]  }
  0x54   :  { %3418 = vmatprep.subr.bf16.mxu0 %v3699_v37 }
  0x57   :  { %3419 = vmatpush3.bf16.msra.mxu0 %v3699_v37  ;;  %v3706_v37 = vld [vmem:[#allocation5 + $0x30] sm:$0xff]  }
 0x10c   :  { %v3358_v44 = vpop.f32.mrb[0].mxu0 }
 0x10d   :  { %v206_v45 = vadd.f32 %v3358_v44, %v3104_v43  ;;  %v197_v46 = vpop.f32.mrb[1].mxu0 }
 0x10e   :  { %v198_v47 = vadd.f32 %v3104_v43, %v197_v46  ;;  %v3359_v48 = vpop.f32.mrb[2].mxu0 }
 0x10f   :  { %v209_v49 = vadd.f32 %v3359_v48, %v3104_v43  ;;  %v200_v50 = vpop.f32.mrb[3].mxu0  ;;  %v262_v52 = vmax.f32 %v206_v45, 0.0 }
 0x110   :  { %v201_v51 = vadd.f32 %v3104_v43, %v200_v50  ;;  %v260_v54 = vmax.f32 %v198_v47, 0.0 }
 0x111   :  { %v263_v53 = vmax.f32 %v209_v49, 0.0 }
 0x112   :  { %v261_v55 = vmax.f32 %v201_v51, 0.0 }
 0x113   :  { %v277_v56 = vpack.c.bf16 %v263_v53, %v262_v52 }
 0x114   :  { %v3362_v57 = vpop.f32.mrb[4].mxu0  ;;  %v276_v58 = vpack.c.bf16 %v261_v55, %v260_v54 }
 0x115   :  { %v222_v59 = vadd.f32 %v3362_v57, %v3104_v43  ;;  %v213_v60 = vpop.f32.mrb[5].mxu0 }
 0x116   :  { %v214_v61 = vadd.f32 %v3104_v43, %v213_v60  ;;  %v3363_v62 = vpop.f32.mrb[6].mxu0  ;;  %3388 = vmatprep.mubr.bf16.mxu1 %v276_v58 }
 0x117   :  { %v225_v63 = vadd.f32 %v3363_v62, %v3104_v43  ;;  %v216_v0 = vpop.f32.mrb[7].mxu0  ;;  %3389 = vmatmul.mubr.bf16.vlgmr.msra.gmra.mrb[0].mxu1 %v277_v56  ;;  %v266_v2 = vmax.f32 %v222_v59, 0.0 }
 0x118   :  { %v217_v1 = vadd.f32 %v3104_v43, %v216_v0  ;;  %v264_v4 = vmax.f32 %v214_v61, 0.0 }
 0x119   :  { %v267_v3 = vmax.f32 %v225_v63, 0.0 }
 0x11a   :  { %v265_v5 = vmax.f32 %v217_v1, 0.0 }
 0x11b   :  { %v279_v6 = vpack.c.bf16 %v267_v3, %v266_v2 }
 0x11c   :  { %v278_v7 = vpack.c.bf16 %v265_v5, %v264_v4  ;;  %v3366_v8 = vpop.f32.mrb[8].mxu0 }
 0x11d   :  { %v238_v9 = vadd.f32 %v3366_v8, %v3104_v43  ;;  %v229_v10 = vpop.f32.mrb[9].mxu0 }
 0x11e   :  { %v230_v11 = vadd.f32 %v3104_v43, %v229_v10  ;;  %v3367_v12 = vpop.f32.mrb[10].mxu0  ;;  %3392 = vmatprep.mubr.bf16.mxu1 %v278_v7 }
 0x11f   :  { %v241_v13 = vadd.f32 %v3367_v12, %v3104_v43  ;;  %v232_v14 = vpop.f32.mrb[11].mxu0  ;;  %3393 = vmatmul.mubr.bf16.gmra.mrb[4].mxu1 %v279_v6  ;;  %v270_v16 = vmax.f32 %v238_v9, 0.0 }
 0x120   :  { %v233_v15 = vadd.f32 %v3104_v43, %v232_v14  ;;  %v268_v18 = vmax.f32 %v230_v11, 0.0 }
 0x121   :  { %v271_v17 = vmax.f32 %v241_v13, 0.0 }
 0x122   :  { %v269_v19 = vmax.f32 %v233_v15, 0.0 }
 0x123   :  { %v281_v20 = vpack.c.bf16 %v271_v17, %v270_v16 }
 0x124   :  { %v280_v21 = vpack.c.bf16 %v269_v19, %v268_v18  ;;  %v3370_v22 = vpop.f32.mrb[12].mxu0 }
 0x125   :  { %v254_v23 = vadd.f32 %v3370_v22, %v3104_v43  ;;  %v245_v24 = vpop.f32.mrb[13].mxu0 }
 0x126   :  { %v246_v25 = vadd.f32 %v3104_v43, %v245_v24  ;;  %v3371_v26 = vpop.f32.mrb[14].mxu0  ;;  %3396 = vmatprep.mubr.bf16.mxu1 %v280_v21 }
 0x127   :  { %v257_v27 = vadd.f32 %v3371_v26, %v3104_v43  ;;  %v248_v28 = vpop.f32.mrb[15].mxu0  ;;  %3397 = vmatmul.mubr.bf16.gmra.mrb[8].mxu1 %v281_v20  ;;  %v274_v30 = vmax.f32 %v254_v23, 0.0 }
 0x128   :  { %v249_v29 = vadd.f32 %v3104_v43, %v248_v28  ;;  %v272_v32 = vmax.f32 %v246_v25, 0.0 }
 0x129   :  { %v275_v31 = vmax.f32 %v257_v27, 0.0 }
 0x12a   :  { %v273_v33 = vmax.f32 %v249_v29, 0.0 }
 0x12b   :  { %v283_v34 = vpack.c.bf16 %v275_v31, %v274_v30  ;;  %v3700_v31 = vld [vmem:[#allocation5] sm:$0xff]  }
 0x12c   :  { %v282_v35 = vpack.c.bf16 %v273_v33, %v272_v32  ;;  %3436 = vmatprep.subr.bf16.mxu1 %v3700_v31  ;;  %v3701_v32 = vld [vmem:[#allocation5 + $0x8] sm:$0xff]   ;;  %v3702_v33 = vld [vmem:[#allocation5 + $0x10] sm:$0xff]  }
 0x12d   :  { %3437 = vmatpush3.bf16.msra.mxu1 %v3700_v31 }
 0x12e   :  { %3400 = vmatprep.mubr.bf16.mxu1 %v282_v35  ;;  %3438 = vmatprep.subr.bf16.mxu1 %v3701_v32  ;;  %v3704_v35 = vld [vmem:[#allocation5 + $0x20] sm:$0xff]  }
 0x12f   :  { %3401 = vmatmul.mubr.bf16.gmra.mrb[12].mxu1 %v283_v34  ;;  %v3703_v34 = vld [vmem:[#allocation5 + $0x18] sm:$0xff]  }
 0x131   :  { %3439 = vmatpush3.bf16.msra.mxu1 %v3701_v32 }
 0x132   :  { %3440 = vmatprep.subr.bf16.mxu1 %v3702_v33 }
 0x135   :  { %3441 = vmatpush3.bf16.msra.mxu1 %v3702_v33 }
 0x136   :  { %3442 = vmatprep.subr.bf16.mxu1 %v3703_v34 }
 0x139   :  { %3443 = vmatpush3.bf16.msra.mxu1 %v3703_v34 }
 0x13a   :  { %3444 = vmatprep.subr.bf16.mxu1 %v3704_v35 }
 0x13d   :  { %3445 = vmatpush3.bf16.msra.mxu1 %v3704_v35 }
 0x13e   :  { %3446 = vmatprep.subr.bf16.mxu1 %v3705_v36 }
 0x141   :  { %3447 = vmatpush3.bf16.msra.mxu1 %v3705_v36 }
 0x142   :  { %3448 = vmatprep.subr.bf16.mxu1 %v3706_v37 }
 0x145   :  { %3449 = vmatpush3.bf16.msra.mxu1 %v3706_v37 }
 0x1ea   :  { %v3390_v39 = vpop.f32.mrb[0].mxu1 }
 0x1eb   :  { %v389_v40 = vpop.f32.mrb[1].mxu1  ;;  %v4021_v43 = vadd.f32 %v3390_v39, %v3117_v38 }
 0x1ec   :  { %v4019_v41 = vadd.f32 %v3117_v38, %v389_v40  ;;  %v3391_v42 = vpop.f32.mrb[2].mxu1 }
 0x1ed   :  { %v4023_v44 = vadd.f32 %v3391_v42, %v3117_v38  ;;  %v392_v45 = vpop.f32.mrb[3].mxu1  ;;  %v5304_v50 = vmax.f32 %v4021_v43, 0.0 }
 0x1ee   :  { %v4025_v46 = vadd.f32 %v3117_v38, %v392_v45  ;;  %v5306_v48 = vmax.f32 %v4019_v41, 0.0 }
 0x1ef   :  { %v5303_v47 = vmax.f32 %v4023_v44, 0.0 }
 0x1f0   :  { %v5305_v49 = vmax.f32 %v4025_v46, 0.0 }
 0x1f1   :  { %v469_v53 = vpack.c.bf16 %v5303_v47, %v5304_v50 }
 0x1f2   :  { %v468_v51 = vpack.c.bf16 %v5305_v49, %v5306_v48  ;;  %v3394_v52 = vpop.f32.mrb[4].mxu1 }
 0x1f3   :  { %v405_v54 = vpop.f32.mrb[5].mxu1  ;;  %v4041_v57 = vadd.f32 %v3394_v52, %v3117_v38 }
 0x1f4   :  { %v4039_v55 = vadd.f32 %v3117_v38, %v405_v54  ;;  %v3395_v56 = vpop.f32.mrb[6].mxu1  ;;  %3420 = vmatprep.mubr.bf16.mxu0 %v468_v51 }
 0x1f5   :  { %v4043_v58 = vadd.f32 %v3395_v56, %v3117_v38  ;;  %v408_v59 = vpop.f32.mrb[7].mxu1  ;;  %3421 = vmatmul.mubr.bf16.vlgmr.msra.gmra.mrb[16].mxu0 %v469_v53  ;;  %v5300_v0 = vmax.f32 %v4041_v57, 0.0 }
 0x1f6   :  { %v4045_v60 = vadd.f32 %v3117_v38, %v408_v59  ;;  %v5302_v62 = vmax.f32 %v4039_v55, 0.0 }
 0x1f7   :  { %v5299_v61 = vmax.f32 %v4043_v58, 0.0 }
 0x1f8   :  { %v5301_v63 = vmax.f32 %v4045_v60, 0.0 }
 0x1f9   :  { %v471_v3 = vpack.c.bf16 %v5299_v61, %v5300_v0 }
 0x1fa   :  { %v470_v1 = vpack.c.bf16 %v5301_v63, %v5302_v62  ;;  %v3398_v2 = vpop.f32.mrb[8].mxu1 }
 0x1fb   :  { %v421_v4 = vpop.f32.mrb[9].mxu1  ;;  %v4061_v7 = vadd.f32 %v3398_v2, %v3117_v38 }
 0x1fc   :  { %v4059_v5 = vadd.f32 %v3117_v38, %v421_v4  ;;  %v3399_v6 = vpop.f32.mrb[10].mxu1  ;;  %3424 = vmatprep.mubr.bf16.mxu0 %v470_v1 }
 0x1fd   :  { %5379 = vst [vmem:[#allocation9_spill] sm:$0xff] %v4061_v7  ;;  %v4063_v8 = vadd.f32 %v3399_v6, %v3117_v38  ;;  %v424_v9 = vpop.f32.mrb[11].mxu1  ;;  %3425 = vmatmul.mubr.bf16.gmra.mrb[20].mxu0 %v471_v3  ;;  %v5296_v14 = vmax.f32 %v4061_v7, 0.0 }
 0x1fe   :  { %v4065_v10 = vadd.f32 %v3117_v38, %v424_v9  ;;  %v5298_v12 = vmax.f32 %v4059_v5, 0.0 }
 0x1ff   :  { %5380 = vst [vmem:[#allocation10_spill] sm:$0xff] %v4063_v8  ;;  %v5295_v11 = vmax.f32 %v4063_v8, 0.0 }
 0x200   :  { %v5297_v13 = vmax.f32 %v4065_v10, 0.0 }
 0x201   :  { %v473_v17 = vpack.c.bf16 %v5295_v11, %v5296_v14 }
 0x202   :  { %v472_v15 = vpack.c.bf16 %v5297_v13, %v5298_v12  ;;  %v3402_v16 = vpop.f32.mrb[12].mxu1 }
 0x203   :  { %v437_v18 = vpop.f32.mrb[13].mxu1  ;;  %v4081_v21 = vadd.f32 %v3402_v16, %v3117_v38 }
 0x204   :  { %v4079_v19 = vadd.f32 %v3117_v38, %v437_v18  ;;  %v3403_v20 = vpop.f32.mrb[14].mxu1  ;;  %3428 = vmatprep.mubr.bf16.mxu0 %v472_v15 }
 0x205   :  { %5382 = vst [vmem:[#allocation12_spill] sm:$0xff] %v4081_v21  ;;  %v4083_v22 = vadd.f32 %v3403_v20, %v3117_v38  ;;  %v440_v23 = vpop.f32.mrb[15].mxu1  ;;  %3429 = vmatmul.mubr.bf16.gmra.mrb[24].mxu0 %v473_v17  ;;  %v5292_v28 = vmax.f32 %v4081_v21, 0.0 }
 0x206   :  { %5381 = vst [vmem:[#allocation11_spill] sm:$0xff] %v4079_v19  ;;  %v4085_v24 = vadd.f32 %v3117_v38, %v440_v23  ;;  %v5294_v26 = vmax.f32 %v4079_v19, 0.0  ;;  %v3707_v38 = vld [vmem:[#allocation5 + $0x38] sm:$0xff]  }
 0x207   :  { %5383 = vst [vmem:[#allocation13_spill] sm:$0xff] %v4083_v22  ;;  %v5291_v25 = vmax.f32 %v4083_v22, 0.0  ;;  %3450 = vmatprep.subr.bf16.mxu1 %v3707_v38 }
 0x208   :  { %5384 = vst [vmem:[#allocation14_spill] sm:$0xff] %v4085_v24  ;;  %v5293_v27 = vmax.f32 %v4085_v24, 0.0  ;;  %3451 = vmatpush3.bf16.msra.mxu1 %v3707_v38 }
 0x209   :  { %v475_v30 = vpack.c.bf16 %v5291_v25, %v5292_v28 }
 0x20a   :  { %v474_v29 = vpack.c.bf16 %v5293_v27, %v5294_v26 }
 0x20c   :  { %3432 = vmatprep.mubr.bf16.mxu0 %v474_v29 }
 0x20d   :  { %3433 = vmatmul.mubr.bf16.gmra.mrb[28].mxu0 %v475_v30 }
 0x2c8   :  { %v4099_v39 = vpop.f32.mrb[16].mxu0 }
 0x2c9   :  { %v4101_v40 = vpop.f32.mrb[17].mxu0 }
 0x2ca   :  { %v4103_v42 = vpop.f32.mrb[18].mxu0 }
 0x2cb   :  { %v4105_v45 = vpop.f32.mrb[19].mxu0 }
 0x2cc   :  { %v639_v51 = vadd.f32 %v4105_v45, %v4101_v40 }
 0x2ce   :  { %v640_v52 = vadd.f32 %v4099_v39, %v639_v51 }
 0x2d0   :  { %v4110_v53 = vpop.f32.mrb[20].mxu0  ;;  %v641_v54 = vadd.f32 %v4103_v42, %v640_v52 }
 0x2d1   :  { %v4113_v56 = vpop.f32.mrb[21].mxu0 }
 0x2d2   :  { %v642_v59 = vadd.f32 %v641_v54, %v4113_v56  ;;  %v4116_v1 = vpop.f32.mrb[22].mxu0 }
 0x2d3   :  { %v4118_v2 = vpop.f32.mrb[23].mxu0 }
 0x2d4   :  { %v643_v3 = vadd.f32 %v642_v59, %v4118_v2 }
 0x2d6   :  { %v644_v4 = vadd.f32 %v4110_v53, %v643_v3 }
 0x2d8   :  { %v4122_v6 = vpop.f32.mrb[24].mxu0  ;;  %v645_v9 = vadd.f32 %v4116_v1, %v644_v4 }
 0x2d9   :  { %v4125_v15 = vpop.f32.mrb[25].mxu0 }
 0x2da   :  { %v646_v16 = vadd.f32 %v645_v9, %v4125_v15  ;;  %v4128_v17 = vpop.f32.mrb[26].mxu0 }
 0x2db   :  { %v4130_v18 = vpop.f32.mrb[27].mxu0 }
 0x2dc   :  { %v647_v20 = vadd.f32 %v646_v16, %v4130_v18 }
 0x2de   :  { %v648_v23 = vadd.f32 %v4122_v6, %v647_v20 }
 0x2e0   :  { %v4134_v29 = vpop.f32.mrb[28].mxu0  ;;  %v649_v30 = vadd.f32 %v4128_v17, %v648_v23 }
 0x2e1   :  { %v4137_v31 = vpop.f32.mrb[29].mxu0 }
 0x2e2   :  { %v650_v32 = vadd.f32 %v649_v30, %v4137_v31  ;;  %v4140_v33 = vpop.f32.mrb[30].mxu0 }
 0x2e3   :  { %v4142_v34 = vpop.f32.mrb[31].mxu0 }
 0x2e4   :  { %v651_v35 = vadd.f32 %v650_v32, %v4142_v34 }
 0x2e6   :  { %v652_v36 = vadd.f32 %v4134_v29, %v651_v35 }
 0x2e8   :  { %v653_v37 = vadd.f32 %v4140_v33, %v652_v36 }
 0x2ea   :  { %v654_v38 = vrot.slane %v653_v37, 4 }
 0x2ec   :  { %v655_v51 = vadd.f32 %v654_v38, %v653_v37 }
 0x2ee   :  { %v656_v52 = vrot.slane %v655_v51, 2 }
 0x2f0   :  { %v657_v54 = vadd.f32 %v656_v52, %v655_v51 }
 0x2f2   :  { %v658_v59 = vrot.slane %v657_v54, 1 }
 0x2f4   :  { %v659_v3 = vadd.f32 %v658_v59, %v657_v54 }
 0x2f6   :  { %v4147_v4 = vmul.f32 0.0078125, %v659_v3 }
 0x2f8   :  { %v662_v9 = vsub.f32 %v4101_v40, %v4147_v4  ;;  %v663_v16 = vsub.f32 %v4105_v45, %v4147_v4  ;;  %v664_v20 = vsub.f32 %v4099_v39, %v4147_v4  ;;  %v665_v23 = vsub.f32 %v4103_v42, %v4147_v4 }
 0x2f9   :  { %v666_v30 = vsub.f32 %v4113_v56, %v4147_v4  ;;  %v667_v32 = vsub.f32 %v4118_v2, %v4147_v4  ;;  %v668_v35 = vsub.f32 %v4110_v53, %v4147_v4  ;;  %v669_v36 = vsub.f32 %v4116_v1, %v4147_v4 }
 0x2fa   :  { %v670_v37 = vsub.f32 %v4125_v15, %v4147_v4  ;;  %v671_v38 = vsub.f32 %v4130_v18, %v4147_v4  ;;  %v672_v51 = vsub.f32 %v4122_v6, %v4147_v4  ;;  %v673_v52 = vsub.f32 %v4128_v17, %v4147_v4 }
 0x2fb   :  { %v674_v54 = vsub.f32 %v4137_v31, %v4147_v4  ;;  %v675_v59 = vsub.f32 %v4142_v34, %v4147_v4  ;;  %v676_v3 = vsub.f32 %v4134_v29, %v4147_v4  ;;  %v677_v25 = vsub.f32 %v4140_v33, %v4147_v4 }
 0x2fc   :  { %v678_v28 = vmul.f32 %v662_v9, %v662_v9  ;;  %v679_v27 = vmul.f32 %v663_v16, %v663_v16  ;;  %v680_v26 = vmul.f32 %v664_v20, %v664_v20  ;;  %v681_v14 = vmul.f32 %v665_v23, %v665_v23 }
 0x2fd   :  { %v682_v12 = vmul.f32 %v666_v30, %v666_v30  ;;  %v683_v0 = vmul.f32 %v667_v32, %v667_v32  ;;  %v684_v62 = vmul.f32 %v668_v35, %v668_v35  ;;  %v685_v50 = vmul.f32 %v669_v36, %v669_v36  ;;  %v638_v30 = vld [vmem:[%s5284_s7] sm:$0x1] }
 0x2fe   :  { %v694_v11 = vadd.f32 %v679_v27, %v678_v28  ;;  %v686_v48 = vmul.f32 %v670_v37, %v670_v37  ;;  %v687_v21 = vmul.f32 %v671_v38, %v671_v38  ;;  %v688_v19 = vmul.f32 %v672_v51, %v672_v51 }
 0x2ff   :  { %v689_v9 = vmul.f32 %v673_v52, %v673_v52  ;;  %v690_v20 = vmul.f32 %v674_v54, %v674_v54  ;;  %v691_v28 = vmul.f32 %v675_v59, %v675_v59 }
 0x300   :  { %v695_v13 = vadd.f32 %v694_v11, %v680_v26  ;;  %v692_v26 = vmul.f32 %v676_v3, %v676_v3 }
 0x302   :  { %v696_v61 = vadd.f32 %v695_v13, %v681_v14  ;;  %v693_v14 = vmul.f32 %v677_v25, %v677_v25 }
 0x304   :  { %v697_v63 = vadd.f32 %v696_v61, %v682_v12 }
 0x306   :  { %v698_v47 = vadd.f32 %v697_v63, %v683_v0 }
 0x308   :  { %v699_v49 = vadd.f32 %v698_v47, %v684_v62 }
 0x30a   :  { %v700_v22 = vadd.f32 %v699_v49, %v685_v50 }
 0x30c   :  { %v701_v24 = vadd.f32 %v700_v22, %v686_v48 }
 0x30e   :  { %v702_v8 = vadd.f32 %v701_v24, %v687_v21  ;;  %v721_v21 = vlaneseq }
 0x310   :  { %v703_v16 = vadd.f32 %v702_v8, %v688_v19  ;;  %v722_v8 = vshrl.u32 %v721_v21, 7  ;;  %v637_v19 = vld [vmem:[%s5283_s6] sm:$0x1] }
 0x312   :  { %v704_v27 = vadd.f32 %v703_v16, %v689_v9  ;;  %v4184_v24 = vsub.s32 0, %v722_v8 }
 0x314   :  { %v705_v11 = vadd.f32 %v704_v27, %v690_v20 }
 0x316   :  { %v706_v13 = vadd.f32 %v705_v11, %v691_v28 }
 0x318   :  { %v707_v61 = vadd.f32 %v706_v13, %v692_v26 }
 0x31a   :  { %v708_v12 = vadd.f32 %v707_v61, %v693_v14 }
 0x31c   :  { %v709_v63 = vrot.slane %v708_v12, 4 }
 0x31e   :  { %v710_v0 = vadd.f32 %v709_v63, %v708_v12 }
 0x320   :  { %v711_v47 = vrot.slane %v710_v0, 2 }
 0x322   :  { %v712_v62 = vadd.f32 %v711_v47, %v710_v0 }
 0x324   :  { %v713_v49 = vrot.slane %v712_v62, 1 }
 0x326   :  { %v714_v50 = vadd.f32 %v713_v49, %v712_v62 }
 0x328   :  { %v715_v48 = vmul.f32 0.0078125, %v714_v50 }
 0x32a   :  { %v716_v22 = vadd.f32 1e-05, %v715_v48 }
 0x32c   :  { %3756 = vrsqrt.f32 %v716_v22 }
 0x336   :  { %v3757_v25 = vpop.eup %3756 }
 0x337   :  { %v718_v23 = vmul.f32 %v3757_v25, %v637_v19 }
 0x339   :  { %v719_v32 = vmul.f32 %v718_v23, %v4147_v4  ;;  %v724_v35 = vrot.slane %v718_v23, %v4184_v24 }
 0x33b   :  { %v720_v36 = vsub.f32 %v638_v30, %v719_v32  ;;  %v738_v37 = vmul.f32 %v724_v35, %v4142_v34  ;;  %v725_v38 = vmul.f32 %v724_v35, %v4101_v40  ;;  %v726_v51 = vmul.f32 %v724_v35, %v4105_v45 }
 0x33c   :  { %v727_v52 = vmul.f32 %v4099_v39, %v724_v35  ;;  %v728_v54 = vmul.f32 %v4103_v42, %v724_v35  ;;  %v729_v59 = vmul.f32 %v724_v35, %v4113_v56  ;;  %v730_v3 = vmul.f32 %v724_v35, %v4118_v2 }
 0x33d   :  { %v744_v9 = vrot.slane %v720_v36, %v4184_v24  ;;  %v731_v4 = vmul.f32 %v4110_v53, %v724_v35  ;;  %v732_v16 = vmul.f32 %v4116_v1, %v724_v35  ;;  %v733_v34 = vmul.f32 %v724_v35, %v4125_v15 }
 0x33e   :  { %v734_v40 = vmul.f32 %v724_v35, %v4130_v18  ;;  %v735_v45 = vmul.f32 %v4122_v6, %v724_v35  ;;  %v736_v39 = vmul.f32 %v4128_v17, %v724_v35  ;;  %v737_v42 = vmul.f32 %v724_v35, %v4137_v31 }
 0x33f   :  { %v758_v20 = vadd.f32 %v744_v9, %v738_v37  ;;  %v745_v56 = vadd.f32 %v744_v9, %v725_v38  ;;  %v746_v27 = vadd.f32 %v744_v9, %v726_v51  ;;  %v747_v2 = vadd.f32 %v744_v9, %v727_v52 }
 0x340   :  { %v748_v28 = vadd.f32 %v744_v9, %v728_v54  ;;  %v749_v11 = vadd.f32 %v744_v9, %v729_v59  ;;  %v750_v26 = vadd.f32 %v744_v9, %v730_v3  ;;  %v751_v53 = vadd.f32 %v744_v9, %v731_v4 }
 0x341   :  { %v761_v13 = vmax.f32 %v745_v56, 0.0  ;;  %v762_v1 = vmax.f32 %v746_v27, 0.0  ;;  %v763_v14 = vmax.f32 %v747_v2, 0.0  ;;  %v752_v15 = vadd.f32 %v744_v9, %v732_v16  ;;  %v3708_v16 = vld [vmem:[#allocation3 + $0x40] sm:$0xff]  }
 0x342   :  { %v764_v61 = vmax.f32 %v748_v28, 0.0  ;;  %v765_v18 = vmax.f32 %v749_v11, 0.0  ;;  %v766_v12 = vmax.f32 %v750_v26, 0.0  ;;  %v767_v6 = vmax.f32 %v751_v53, 0.0  ;;  %3468 = vmatprep.subr.bf16.mxu0 %v3708_v16 }
 0x343   :  { %v777_v63 = vpack.c.bf16 %v762_v1, %v761_v13  ;;  %v768_v17 = vmax.f32 %v752_v15, 0.0  ;;  %v753_v0 = vadd.f32 %v744_v9, %v733_v34  ;;  %v754_v31 = vadd.f32 %v744_v9, %v734_v40  ;;  %3469 = vmatpush3.bf16.msra.mxu0 %v3708_v16  ;;  %v3710_v34 = vld [vmem:[#allocation3 + $0x50] sm:$0xff]  }
 0x344   :  { %v778_v47 = vpack.c.bf16 %v764_v61, %v763_v14  ;;  %v779_v62 = vpack.c.bf16 %v766_v12, %v765_v18  ;;  %v755_v49 = vadd.f32 %v744_v9, %v735_v45  ;;  %v756_v50 = vadd.f32 %v744_v9, %v736_v39  ;;  %v3714_v40 = vld [vmem:[#allocation3 + $0x70] sm:$0xff]   ;;  %v3715_v39 = vld [vmem:[#allocation3 + $0x78] sm:$0xff]  }
 0x345   :  { %3452 = vmatprep.mubr.bf16.mxu1 %v777_v63  ;;  %v780_v48 = vpack.c.bf16 %v768_v17, %v767_v6  ;;  %v769_v22 = vmax.f32 %v753_v0, 0.0  ;;  %v770_v21 = vmax.f32 %v754_v31, 0.0  ;;  %v757_v8 = vadd.f32 %v744_v9, %v737_v42 }
 0x346   :  { %3453 = vmatmul.mubr.bf16.vlgmr.msra.gmra.mrb[16].mxu1 %v778_v47  ;;  %v771_v19 = vmax.f32 %v755_v49, 0.0  ;;  %v772_v25 = vmax.f32 %v756_v50, 0.0  ;;  %v774_v23 = vmax.f32 %v758_v20, 0.0  ;;  %v739_v30 = vmul.f32 %v4134_v29, %v724_v35  ;;  %v3709_v29 = vld [vmem:[#allocation3 + $0x48] sm:$0xff]  }
 0x347   :  { %3456 = vmatprep.mubr.bf16.mxu1 %v779_v62  ;;  %v781_v32 = vpack.c.bf16 %v770_v21, %v769_v22  ;;  %v773_v36 = vmax.f32 %v757_v8, 0.0  ;;  %v740_v37 = vmul.f32 %v4140_v33, %v724_v35  ;;  %3470 = vmatprep.subr.bf16.mxu0 %v3709_v29  ;;  %v3711_v33 = vld [vmem:[#allocation3 + $0x58] sm:$0xff]   ;;  %v3712_v35 = vld [vmem:[#allocation3 + $0x60] sm:$0xff]  }
 0x348   :  { %v782_v38 = vpack.c.bf16 %v772_v25, %v771_v19  ;;  %v759_v51 = vadd.f32 %v744_v9, %v739_v30  ;;  %3471 = vmatpush3.bf16.msra.mxu0 %v3709_v29 }
 0x349   :  { %v783_v52 = vpack.c.bf16 %v774_v23, %v773_v36  ;;  %v760_v54 = vadd.f32 %v744_v9, %v740_v37  ;;  %3472 = vmatprep.subr.bf16.mxu0 %v3710_v34  ;;  %v3713_v9 = vld [vmem:[#allocation3 + $0x68] sm:$0xff]  }
 0x34a   :  { %v775_v59 = vmax.f32 %v759_v51, 0.0 }
 0x34b   :  { %v776_v3 = vmax.f32 %v760_v54, 0.0 }
 0x34c   :  { %3473 = vmatpush3.bf16.msra.mxu0 %v3710_v34 }
 0x34d   :  { %v784_v4 = vpack.c.bf16 %v776_v3, %v775_v59  ;;  %3474 = vmatprep.subr.bf16.mxu0 %v3711_v33 }
 0x34e   :  { %3457 = vmatmul.mubr.bf16.gmra.mrb[20].mxu1 %v780_v48 }
 0x34f   :  { %3460 = vmatprep.mubr.bf16.mxu1 %v781_v32 }
 0x350   :  { %3475 = vmatpush3.bf16.msra.mxu0 %v3711_v33 }
 0x351   :  { %3476 = vmatprep.subr.bf16.mxu0 %v3712_v35 }
 0x354   :  { %3477 = vmatpush3.bf16.msra.mxu0 %v3712_v35 }
 0x355   :  { %3478 = vmatprep.subr.bf16.mxu0 %v3713_v9 }
 0x356   :  { %3461 = vmatmul.mubr.bf16.gmra.mrb[24].mxu1 %v782_v38 }
 0x357   :  { %3464 = vmatprep.mubr.bf16.mxu1 %v783_v52 }
 0x358   :  { %3479 = vmatpush3.bf16.msra.mxu0 %v3713_v9 }
 0x359   :  { %3480 = vmatprep.subr.bf16.mxu0 %v3714_v40 }
 0x35c   :  { %3481 = vmatpush3.bf16.msra.mxu0 %v3714_v40 }
 0x35d   :  { %3482 = vmatprep.subr.bf16.mxu0 %v3715_v39 }
 0x35e   :  { %3465 = vmatmul.mubr.bf16.gmra.mrb[28].mxu1 %v784_v4 }
 0x360   :  { %3483 = vmatpush3.bf16.msra.mxu0 %v3715_v39 }
 0x419   :  { %v4208_v45 = vpop.f32.mrb[16].mxu1 }
 0x41a   :  { %v4210_v42 = vpop.f32.mrb[17].mxu1 }
 0x41b   :  { %v4212_v20 = vpop.f32.mrb[18].mxu1 }
 0x41c   :  { %v4214_v56 = vpop.f32.mrb[19].mxu1 }
 0x41d   :  { %v948_v27 = vadd.f32 %v4214_v56, %v4210_v42 }
 0x41f   :  { %v949_v2 = vadd.f32 %v4208_v45, %v948_v27 }
 0x421   :  { %v4219_v28 = vpop.f32.mrb[20].mxu1  ;;  %v950_v11 = vadd.f32 %v4212_v20, %v949_v2 }
 0x422   :  { %v4222_v26 = vpop.f32.mrb[21].mxu1 }
 0x423   :  { %v951_v53 = vadd.f32 %v950_v11, %v4222_v26  ;;  %v4225_v13 = vpop.f32.mrb[22].mxu1 }
 0x424   :  { %v4227_v1 = vpop.f32.mrb[23].mxu1 }
 0x425   :  { %v952_v14 = vadd.f32 %v951_v53, %v4227_v1 }
 0x427   :  { %v953_v15 = vadd.f32 %v4219_v28, %v952_v14 }
 0x429   :  { %v4231_v61 = vpop.f32.mrb[24].mxu1  ;;  %v954_v18 = vadd.f32 %v4225_v13, %v953_v15 }
 0x42a   :  { %v4234_v12 = vpop.f32.mrb[25].mxu1 }
 0x42b   :  { %v955_v6 = vadd.f32 %v954_v18, %v4234_v12  ;;  %v4237_v63 = vpop.f32.mrb[26].mxu1 }
 0x42c   :  { %v4239_v17 = vpop.f32.mrb[27].mxu1 }
 0x42d   :  { %v956_v0 = vadd.f32 %v955_v6, %v4239_v17 }
 0x42f   :  { %v957_v31 = vadd.f32 %v4231_v61, %v956_v0 }
 0x431   :  { %v4243_v47 = vpop.f32.mrb[28].mxu1  ;;  %v958_v62 = vadd.f32 %v4237_v63, %v957_v31 }
 0x432   :  { %v4246_v49 = vpop.f32.mrb[29].mxu1 }
 0x433   :  { %v959_v50 = vadd.f32 %v958_v62, %v4246_v49  ;;  %v4249_v48 = vpop.f32.mrb[30].mxu1 }
 0x434   :  { %v4251_v22 = vpop.f32.mrb[31].mxu1 }
 0x435   :  { %v960_v21 = vadd.f32 %v959_v50, %v4251_v22 }
 0x437   :  { %v961_v8 = vadd.f32 %v4243_v47, %v960_v21 }
 0x439   :  { %v962_v19 = vadd.f32 %v4249_v48, %v961_v8 }
 0x43b   :  { %v963_v25 = vrot.slane %v962_v19, 4 }
 0x43d   :  { %v964_v23 = vadd.f32 %v963_v25, %v962_v19 }
 0x43f   :  { %v965_v30 = vrot.slane %v964_v23, 2 }
 0x441   :  { %v966_v32 = vadd.f32 %v965_v30, %v964_v23 }
 0x443   :  { %v967_v36 = vrot.slane %v966_v32, 1 }
 0x445   :  { %v968_v37 = vadd.f32 %v967_v36, %v966_v32 }
 0x447   :  { %v969_v38 = vmul.f32 0.0078125, %v968_v37 }
 0x449   :  { %v970_v51 = vsub.f32 %v4210_v42, %v969_v38  ;;  %v971_v52 = vsub.f32 %v4214_v56, %v969_v38  ;;  %v972_v54 = vsub.f32 %v4208_v45, %v969_v38  ;;  %v973_v59 = vsub.f32 %v4212_v20, %v969_v38 }
 0x44a   :  { %v974_v3 = vsub.f32 %v4222_v26, %v969_v38  ;;  %v975_v4 = vsub.f32 %v4227_v1, %v969_v38  ;;  %v976_v16 = vsub.f32 %v4219_v28, %v969_v38  ;;  %v977_v29 = vsub.f32 %v4225_v13, %v969_v38 }
 0x44b   :  { %v978_v34 = vsub.f32 %v4234_v12, %v969_v38  ;;  %v979_v33 = vsub.f32 %v4239_v17, %v969_v38  ;;  %v980_v35 = vsub.f32 %v4231_v61, %v969_v38  ;;  %v981_v9 = vsub.f32 %v4237_v63, %v969_v38 }
 0x44c   :  { %v982_v40 = vsub.f32 %v4246_v49, %v969_v38  ;;  %v983_v39 = vsub.f32 %v4251_v22, %v969_v38  ;;  %v984_v27 = vsub.f32 %v4243_v47, %v969_v38  ;;  %v985_v2 = vsub.f32 %v4249_v48, %v969_v38 }
 0x44d   :  { %v986_v11 = vmul.f32 %v970_v51, %v970_v51  ;;  %v987_v53 = vmul.f32 %v971_v52, %v971_v52  ;;  %v988_v14 = vmul.f32 %v972_v54, %v972_v54  ;;  %v989_v18 = vmul.f32 %v973_v59, %v973_v59 }
 0x44e   :  { %v990_v0 = vmul.f32 %v974_v3, %v974_v3  ;;  %v991_v62 = vmul.f32 %v975_v4, %v975_v4  ;;  %v992_v21 = vmul.f32 %v976_v16, %v976_v16  ;;  %v993_v19 = vmul.f32 %v977_v29, %v977_v29 }
 0x44f   :  { %v1002_v15 = vadd.f32 %v987_v53, %v986_v11  ;;  %v994_v23 = vmul.f32 %v978_v34, %v978_v34  ;;  %v995_v32 = vmul.f32 %v979_v33, %v979_v33  ;;  %v996_v37 = vmul.f32 %v980_v35, %v980_v35 }
 0x450   :  { %v997_v51 = vmul.f32 %v981_v9, %v981_v9  ;;  %v998_v54 = vmul.f32 %v982_v40, %v982_v40  ;;  %v999_v59 = vmul.f32 %v983_v39, %v983_v39  ;;  %v1000_v3 = vmul.f32 %v984_v27, %v984_v27  ;;  %v947_v39 = vld [vmem:[%s5287_s10] sm:$0x1] }
 0x451   :  { %v1003_v6 = vadd.f32 %v1002_v15, %v988_v14  ;;  %v1001_v4 = vmul.f32 %v985_v2, %v985_v2 }
 0x453   :  { %v1004_v31 = vadd.f32 %v1003_v6, %v989_v18 }
 0x455   :  { %v1005_v50 = vadd.f32 %v1004_v31, %v990_v0 }
 0x457   :  { %v1006_v8 = vadd.f32 %v1005_v50, %v991_v62 }
 0x459   :  { %v1007_v25 = vadd.f32 %v1006_v8, %v992_v21 }
 0x45b   :  { %v1008_v30 = vadd.f32 %v1007_v25, %v993_v19 }
 0x45d   :  { %v1009_v36 = vadd.f32 %v1008_v30, %v994_v23 }
 0x45f   :  { %v1010_v7 = vadd.f32 %v1009_v36, %v995_v32 }
 0x461   :  { %v1011_v52 = vadd.f32 %v1010_v7, %v996_v37  ;;  %v946_v7 = vld [vmem:[%s5286_s9] sm:$0x1] }
 0x463   :  { %v1012_v11 = vadd.f32 %v1011_v52, %v997_v51 }
 0x465   :  { %v1013_v53 = vadd.f32 %v1012_v11, %v998_v54 }
 0x467   :  { %v1014_v14 = vadd.f32 %v1013_v53, %v999_v59  ;;  %v5388_v53 = vmax.f32 %v4023_v44, 0.0 }
 0x469   :  { %v1015_v15 = vadd.f32 %v1014_v14, %v1000_v3  ;;  %v5389_v14 = vmax.f32 %v4039_v55, 0.0 }
 0x46b   :  { %v1016_v16 = vadd.f32 %v1015_v15, %v1001_v4 }
 0x46d   :  { %v1017_v18 = vrot.slane %v1016_v16, 4 }
 0x46f   :  { %v1018_v29 = vadd.f32 %v1017_v18, %v1016_v16 }
 0x471   :  { %v1019_v6 = vrot.slane %v1018_v29, 2 }
 0x473   :  { %v1020_v34 = vadd.f32 %v1019_v6, %v1018_v29 }
 0x475   :  { %v1021_v0 = vrot.slane %v1020_v34, 1 }
 0x477   :  { %v1022_v33 = vadd.f32 %v1021_v0, %v1020_v34 }
 0x479   :  { %v1023_v31 = vmul.f32 0.0078125, %v1022_v33 }
 0x47b   :  { %v1024_v35 = vadd.f32 1e-05, %v1023_v31  ;;  %v5392_v31 = vmax.f32 %v4043_v58, 0.0 }
 0x47d   :  { %3758 = vrsqrt.f32 %v1024_v35 }
 0x487   :  { %v3759_v9 = vpop.eup %3758 }
 0x488   :  { %v1026_v40 = vmul.f32 %v3759_v9, %v946_v7 }
 0x48a   :  { %v1027_v27 = vmul.f32 %v1026_v40, %v969_v38  ;;  %v1032_v2 = vrot.slane %v1026_v40, %v4184_v24  ;;  %v5393_v40 = vmax.f32 %v4059_v5, 0.0 }
 0x48c   :  { %v1028_v62 = vsub.f32 %v947_v39, %v1027_v27  ;;  %v1046_v50 = vmul.f32 %v1032_v2, %v4251_v22  ;;  %v1033_v21 = vmul.f32 %v1032_v2, %v4210_v42  ;;  %v1034_v8 = vmul.f32 %v1032_v2, %v4214_v56 }
 0x48d   :  { %v1035_v19 = vmul.f32 %v4208_v45, %v1032_v2  ;;  %v1036_v25 = vmul.f32 %v4212_v20, %v1032_v2  ;;  %v1037_v23 = vmul.f32 %v1032_v2, %v4222_v26  ;;  %v1038_v30 = vmul.f32 %v1032_v2, %v4227_v1 }
 0x48e   :  { %v1052_v32 = vrot.slane %v1028_v62, %v4184_v24  ;;  %v1039_v38 = vmul.f32 %v4219_v28, %v1032_v2  ;;  %v1040_v36 = vmul.f32 %v4225_v13, %v1032_v2  ;;  %v1041_v22 = vmul.f32 %v1032_v2, %v4234_v12 }
 0x48f   :  { %v1042_v42 = vmul.f32 %v1032_v2, %v4239_v17  ;;  %v1043_v56 = vmul.f32 %v4231_v61, %v1032_v2  ;;  %v1044_v45 = vmul.f32 %v4237_v63, %v1032_v2  ;;  %v1045_v20 = vmul.f32 %v1032_v2, %v4246_v49 }
 0x490   :  { %v1066_v37 = vadd.f32 %v1052_v32, %v1046_v50  ;;  %v1053_v26 = vadd.f32 %v1052_v32, %v1033_v21  ;;  %v1054_v51 = vadd.f32 %v1052_v32, %v1034_v8  ;;  %v1055_v1 = vadd.f32 %v1052_v32, %v1035_v19 }
 0x491   :  { %v1056_v52 = vadd.f32 %v1052_v32, %v1036_v25  ;;  %v1057_v54 = vadd.f32 %v1052_v32, %v1037_v23  ;;  %v1058_v11 = vadd.f32 %v1052_v32, %v1038_v30  ;;  %v1059_v28 = vadd.f32 %v1052_v32, %v1039_v38  ;;  %v5395_v38 = vld [vmem:[#allocation9_spill] sm:$0xff] }
 0x492   :  { %v5385_v13 = vmax.f32 %v4019_v41, 0.0  ;;  %v5386_v12 = vmax.f32 %v4025_v46, 0.0  ;;  %v5387_v61 = vmax.f32 %v4021_v43, 0.0  ;;  %v1060_v49 = vadd.f32 %v1052_v32, %v1040_v36 }
 0x493   :  { %v4308_v3 = vadd.f32 %v1056_v52, %v5388_v53  ;;  %v4312_v4 = vadd.f32 %v1057_v54, %v5389_v14  ;;  %v5390_v41 = vmax.f32 %v4045_v60, 0.0  ;;  %v5391_v60 = vmax.f32 %v4041_v57, 0.0 }
 0x494   :  { %v4296_v59 = vadd.f32 %v1053_v26, %v5385_v13  ;;  %v4300_v17 = vadd.f32 %v1054_v51, %v5386_v12  ;;  %v4304_v63 = vadd.f32 %v1055_v1, %v5387_v61  ;;  %v1061_v34 = vadd.f32 %v1052_v32, %v1041_v22  ;;  %v5407_v13 = vld [vmem:[#allocation12_spill] sm:$0xff] }
 0x495   :  { %v4316_v15 = vadd.f32 %v1058_v11, %v5390_v41  ;;  %v5325_v18 = vmax.f32 %v4308_v3, 0.0  ;;  %v5324_v44 = vmax.f32 %v4312_v4, 0.0  ;;  %v4330_v6 = vadd.f32 %v1059_v28, %v5391_v60 }
 0x496   :  { %v5328_v46 = vmax.f32 %v4296_v59, 0.0  ;;  %v5327_v16 = vmax.f32 %v4300_v17, 0.0  ;;  %v5326_v43 = vmax.f32 %v4304_v63, 0.0  ;;  %v1062_v0 = vadd.f32 %v1052_v32, %v1042_v42 }
 0x497   :  { %v5323_v29 = vmax.f32 %v4316_v15, 0.0  ;;  %v4338_v35 = vadd.f32 %v1060_v49, %v5392_v31  ;;  %v1063_v7 = vadd.f32 %v1052_v32, %v1043_v56  ;;  %v1064_v9 = vadd.f32 %v1052_v32, %v1044_v45  ;;  %v5401_v56 = vld [vmem:[#allocation11_spill] sm:$0xff]  ;;  %v3719_v31 = vld [vmem:[#allocation5 + $0x58] sm:$0xff]  }
 0x498   :  { %v1101_v55 = vpack.c.bf16 %v5327_v16, %v5328_v46  ;;  %v1102_v33 = vpack.c.bf16 %v5325_v18, %v5326_v43  ;;  %v4346_v39 = vadd.f32 %v1061_v34, %v5393_v40  ;;  %v5394_v27 = vmax.f32 %v4065_v10, 0.0  ;;  %v3716_v34 = vld [vmem:[#allocation5 + $0x40] sm:$0xff]  }
 0x499   :  { %v1103_v57 = vpack.c.bf16 %v5323_v29, %v5324_v44  ;;  %v1065_v50 = vadd.f32 %v1052_v32, %v1045_v20  ;;  %v1047_v58 = vmul.f32 %v4243_v47, %v1032_v2  ;;  %v1048_v21 = vmul.f32 %v4249_v48, %v1032_v2  ;;  %v5398_v48 = vld [vmem:[#allocation10_spill] sm:$0xff]  ;;  %3500 = vmatprep.subr.bf16.mxu1 %v3716_v34 }
 0x49a   :  { %3484 = vmatprep.mubr.bf16.mxu0 %v1101_v55  ;;  %v4350_v62 = vadd.f32 %v1062_v0, %v5394_v27  ;;  %v5322_v8 = vmax.f32 %v4330_v6, 0.0  ;;  %v5321_v19 = vmax.f32 %v4338_v35, 0.0  ;;  %v5320_v5 = vmax.f32 %v4346_v39, 0.0  ;;  %v5404_v20 = vld [vmem:[#allocation14_spill] sm:$0xff]  ;;  %3501 = vmatpush3.bf16.msra.mxu1 %v3716_v34  ;;  %v3723_v27 = vld [vmem:[#allocation5 + $0x78] sm:$0xff]  }
 0x49b   :  { %3485 = vmatmul.mubr.bf16.vlgmr.msra.gmra.mrb[32].mxu0 %v1102_v33  ;;  %v1067_v25 = vadd.f32 %v1052_v32, %v1047_v58  ;;  %v1068_v30 = vadd.f32 %v1052_v32, %v1048_v21  ;;  %v5396_v47 = vmax.f32 %v5395_v38, 0.0  ;;  %v5399_v2 = vmax.f32 %v5398_v48, 0.0  ;;  %v3717_v0 = vld [vmem:[#allocation5 + $0x48] sm:$0xff]   ;;  %v3718_v33 = vld [vmem:[#allocation5 + $0x50] sm:$0xff]  }
 0x49c   :  { %3488 = vmatprep.mubr.bf16.mxu0 %v1103_v57  ;;  %v5319_v23 = vmax.f32 %v4350_v62, 0.0  ;;  %v1104_v10 = vpack.c.bf16 %v5321_v19, %v5322_v8  ;;  %v5402_v32 = vmax.f32 %v5401_v56, 0.0  ;;  %v5405_v26 = vmax.f32 %v5404_v20, 0.0  ;;  %3502 = vmatprep.subr.bf16.mxu1 %v3717_v0  ;;  %v3722_v57 = vld [vmem:[#allocation5 + $0x70] sm:$0xff]  }
 0x49d   :  { %v4364_v36 = vadd.f32 %v1063_v7, %v5396_v47  ;;  %v4368_v22 = vadd.f32 %v1064_v9, %v5399_v2  ;;  %v5408_v12 = vmax.f32 %v5407_v13, 0.0  ;;  %v3720_v7 = vld [vmem:[#allocation5 + $0x60] sm:$0xff]   ;;  %v3721_v9 = vld [vmem:[#allocation5 + $0x68] sm:$0xff]  }
 0x49e   :  { %v1105_v42 = vpack.c.bf16 %v5319_v23, %v5320_v5  ;;  %v4376_v45 = vadd.f32 %v1065_v50, %v5402_v32  ;;  %v4380_v51 = vadd.f32 %v1066_v37, %v5405_v26  ;;  %v5410_v37 = vld [vmem:[#allocation13_spill] sm:$0xff]  ;;  %3503 = vmatpush3.bf16.msra.mxu1 %v3717_v0 }
 0x49f   :  { %5397 = vst [vmem:[#allocation9_spill] sm:$0xff] %v4364_v36  ;;  %5400 = vst [vmem:[#allocation10_spill] sm:$0xff] %v4368_v22  ;;  %v5318_v1 = vmax.f32 %v4364_v36, 0.0  ;;  %v5317_v52 = vmax.f32 %v4368_v22, 0.0  ;;  %v4392_v61 = vadd.f32 %v1067_v25, %v5408_v12  ;;  %v5411_v49 = vmax.f32 %v5410_v37, 0.0  ;;  %3504 = vmatprep.subr.bf16.mxu1 %v3718_v33 }
 0x4a0   :  { %5403 = vst [vmem:[#allocation11_spill] sm:$0xff] %v4376_v45  ;;  %5406 = vst [vmem:[#allocation14_spill] sm:$0xff] %v4380_v51  ;;  %v5316_v54 = vmax.f32 %v4376_v45, 0.0  ;;  %v5315_v11 = vmax.f32 %v4380_v51, 0.0 }
 0x4a1   :  { %v1106_v28 = vpack.c.bf16 %v5317_v52, %v5318_v1  ;;  %5409 = vst [vmem:[#allocation12_spill] sm:$0xff] %v4392_v61  ;;  %v4396_v53 = vadd.f32 %v1068_v30, %v5411_v49  ;;  %v5314_v41 = vmax.f32 %v4392_v61, 0.0 }
 0x4a2   :  { %v1107_v14 = vpack.c.bf16 %v5315_v11, %v5316_v54  ;;  %3505 = vmatpush3.bf16.msra.mxu1 %v3718_v33 }
 0x4a3   :  { %3489 = vmatmul.mubr.bf16.gmra.mrb[36].mxu0 %v1104_v10  ;;  %5412 = vst [vmem:[#allocation13_spill] sm:$0xff] %v4396_v53  ;;  %v5313_v55 = vmax.f32 %v4396_v53, 0.0  ;;  %3506 = vmatprep.subr.bf16.mxu1 %v3719_v31 }
 0x4a4   :  { %3492 = vmatprep.mubr.bf16.mxu0 %v1105_v42 }
 0x4a5   :  { %v1108_v60 = vpack.c.bf16 %v5313_v55, %v5314_v41 }
 0x4a6   :  { %3507 = vmatpush3.bf16.msra.mxu1 %v3719_v31 }
 0x4a7   :  { %3508 = vmatprep.subr.bf16.mxu1 %v3720_v7 }
 0x4aa   :  { %3509 = vmatpush3.bf16.msra.mxu1 %v3720_v7 }
 0x4ab   :  { %3493 = vmatmul.mubr.bf16.gmra.mrb[40].mxu0 %v1106_v28  ;;  %3510 = vmatprep.subr.bf16.mxu1 %v3721_v9 }
 0x4ac   :  { %3496 = vmatprep.mubr.bf16.mxu0 %v1107_v14 }
 0x4ae   :  { %3511 = vmatpush3.bf16.msra.mxu1 %v3721_v9 }
 0x4af   :  { %3512 = vmatprep.subr.bf16.mxu1 %v3722_v57 }
 0x4b2   :  { %3513 = vmatpush3.bf16.msra.mxu1 %v3722_v57 }
 0x4b3   :  { %3497 = vmatmul.mubr.bf16.gmra.mrb[44].mxu0 %v1108_v60  ;;  %3514 = vmatprep.subr.bf16.mxu1 %v3723_v27 }
 0x4b6   :  { %3515 = vmatpush3.bf16.msra.mxu1 %v3723_v27 }
 0x56e   :  { %v4408_v40 = vpop.f32.mrb[32].mxu0 }
 0x56f   :  { %v4410_v50 = vpop.f32.mrb[33].mxu0 }
 0x570   :  { %v4412_v58 = vpop.f32.mrb[34].mxu0 }
 0x571   :  { %v4414_v21 = vpop.f32.mrb[35].mxu0 }
 0x572   :  { %v1273_v25 = vadd.f32 %v4414_v21, %v4410_v50 }
 0x574   :  { %v1274_v30 = vadd.f32 %v4408_v40, %v1273_v25 }
 0x576   :  { %v4419_v10 = vpop.f32.mrb[36].mxu0  ;;  %v1275_v38 = vadd.f32 %v4412_v58, %v1274_v30 }
 0x577   :  { %v4422_v47 = vpop.f32.mrb[37].mxu0 }
 0x578   :  { %v1276_v48 = vadd.f32 %v1275_v38, %v4422_v47  ;;  %v4425_v2 = vpop.f32.mrb[38].mxu0 }
 0x579   :  { %v4427_v42 = vpop.f32.mrb[39].mxu0 }
 0x57a   :  { %v1277_v56 = vadd.f32 %v1276_v48, %v4427_v42 }
 0x57c   :  { %v1278_v32 = vadd.f32 %v4419_v10, %v1277_v56 }
 0x57e   :  { %v4431_v20 = vpop.f32.mrb[40].mxu0  ;;  %v1279_v26 = vadd.f32 %v4425_v2, %v1278_v32 }
 0x57f   :  { %v4434_v28 = vpop.f32.mrb[41].mxu0 }
 0x580   :  { %v1280_v13 = vadd.f32 %v1279_v26, %v4434_v28  ;;  %v4437_v12 = vpop.f32.mrb[42].mxu0 }
 0x581   :  { %v4439_v37 = vpop.f32.mrb[43].mxu0 }
 0x582   :  { %v1281_v49 = vadd.f32 %v1280_v13, %v4439_v37 }
 0x584   :  { %v1282_v14 = vadd.f32 %v4431_v20, %v1281_v49 }
 0x586   :  { %v4443_v60 = vpop.f32.mrb[44].mxu0  ;;  %v1283_v34 = vadd.f32 %v4437_v12, %v1282_v14 }
 0x587   :  { %v4446_v0 = vpop.f32.mrb[45].mxu0 }
 0x588   :  { %v1284_v33 = vadd.f32 %v1283_v34, %v4446_v0  ;;  %v4449_v31 = vpop.f32.mrb[46].mxu0 }
 0x589   :  { %v4451_v7 = vpop.f32.mrb[47].mxu0 }
 0x58a   :  { %v1285_v9 = vadd.f32 %v1284_v33, %v4451_v7 }
 0x58c   :  { %v1286_v57 = vadd.f32 %v4443_v60, %v1285_v9 }
 0x58e   :  { %v1287_v27 = vadd.f32 %v4449_v31, %v1286_v57 }
 0x590   :  { %v1288_v25 = vrot.slane %v1287_v27, 4 }
 0x592   :  { %v1289_v30 = vadd.f32 %v1288_v25, %v1287_v27 }
 0x594   :  { %v1290_v38 = vrot.slane %v1289_v30, 2 }
 0x596   :  { %v1291_v48 = vadd.f32 %v1290_v38, %v1289_v30 }
 0x598   :  { %v1292_v56 = vrot.slane %v1291_v48, 1 }
 0x59a   :  { %v1293_v32 = vadd.f32 %v1292_v56, %v1291_v48 }
 0x59c   :  { %v1294_v26 = vmul.f32 0.0078125, %v1293_v32 }
 0x59e   :  { %v1295_v13 = vsub.f32 %v4410_v50, %v1294_v26  ;;  %v1296_v49 = vsub.f32 %v4414_v21, %v1294_v26  ;;  %v1297_v14 = vsub.f32 %v4408_v40, %v1294_v26  ;;  %v1298_v34 = vsub.f32 %v4412_v58, %v1294_v26 }
 0x59f   :  { %v1299_v33 = vsub.f32 %v4422_v47, %v1294_v26  ;;  %v1300_v9 = vsub.f32 %v4427_v42, %v1294_v26  ;;  %v1301_v57 = vsub.f32 %v4419_v10, %v1294_v26  ;;  %v1302_v27 = vsub.f32 %v4425_v2, %v1294_v26 }
 0x5a0   :  { %v1303_v25 = vsub.f32 %v4434_v28, %v1294_v26  ;;  %v1304_v30 = vsub.f32 %v4439_v37, %v1294_v26  ;;  %v1305_v38 = vsub.f32 %v4431_v20, %v1294_v26  ;;  %v1306_v48 = vsub.f32 %v4437_v12, %v1294_v26 }
 0x5a1   :  { %v1307_v56 = vsub.f32 %v4446_v0, %v1294_v26  ;;  %v1308_v32 = vsub.f32 %v4451_v7, %v1294_v26  ;;  %v1309_v55 = vsub.f32 %v4443_v60, %v1294_v26  ;;  %v1310_v41 = vsub.f32 %v4449_v31, %v1294_v26 }
 0x5a2   :  { %v1311_v11 = vmul.f32 %v1295_v13, %v1295_v13  ;;  %v1312_v54 = vmul.f32 %v1296_v49, %v1296_v49  ;;  %v1313_v52 = vmul.f32 %v1297_v14, %v1297_v14  ;;  %v1314_v23 = vmul.f32 %v1298_v34, %v1298_v34 }
 0x5a3   :  { %v1315_v19 = vmul.f32 %v1299_v33, %v1299_v33  ;;  %v1316_v29 = vmul.f32 %v1300_v9, %v1300_v9  ;;  %v1317_v18 = vmul.f32 %v1301_v57, %v1301_v57  ;;  %v1318_v16 = vmul.f32 %v1302_v27, %v1302_v27 }
 0x5a4   :  { %v1327_v1 = vadd.f32 %v1312_v54, %v1311_v11  ;;  %v1319_v53 = vmul.f32 %v1303_v25, %v1303_v25  ;;  %v1320_v51 = vmul.f32 %v1304_v30, %v1304_v30  ;;  %v1321_v22 = vmul.f32 %v1305_v38, %v1305_v38 }
 0x5a5   :  { %v1322_v13 = vmul.f32 %v1306_v48, %v1306_v48  ;;  %v1323_v14 = vmul.f32 %v1307_v56, %v1307_v56  ;;  %v1324_v11 = vmul.f32 %v1308_v32, %v1308_v32 }
 0x5a6   :  { %v1328_v5 = vadd.f32 %v1327_v1, %v1313_v52  ;;  %v1325_v52 = vmul.f32 %v1309_v55, %v1309_v55 }
 0x5a8   :  { %v1329_v8 = vadd.f32 %v1328_v5, %v1314_v23  ;;  %v1326_v23 = vmul.f32 %v1310_v41, %v1310_v41 }
 0x5aa   :  { %v1330_v44 = vadd.f32 %v1329_v8, %v1315_v19 }
 0x5ac   :  { %v1331_v43 = vadd.f32 %v1330_v44, %v1316_v29 }
 0x5ae   :  { %v1332_v46 = vadd.f32 %v1331_v43, %v1317_v18 }
 0x5b0   :  { %v1333_v61 = vadd.f32 %v1332_v46, %v1318_v16 }
 0x5b2   :  { %v1334_v45 = vadd.f32 %v1333_v61, %v1319_v53 }
 0x5b4   :  { %v1335_v36 = vadd.f32 %v1334_v45, %v1320_v51  ;;  %v1272_v51 = vld [vmem:[%s5284_s7 + $0x1] sm:$0x1] }
 0x5b6   :  { %v1336_v49 = vadd.f32 %v1335_v36, %v1321_v22  ;;  %v1271_v36 = vld [vmem:[%s5283_s6 + $0x1] sm:$0x1] }
 0x5b8   :  { %v1337_v54 = vadd.f32 %v1336_v49, %v1322_v13 }
 0x5ba   :  { %v1338_v1 = vadd.f32 %v1337_v54, %v1323_v14 }
 0x5bc   :  { %v1339_v5 = vadd.f32 %v1338_v1, %v1324_v11 }
 0x5be   :  { %v1340_v8 = vadd.f32 %v1339_v5, %v1325_v52 }
 0x5c0   :  { %v1341_v19 = vadd.f32 %v1340_v8, %v1326_v23 }
 0x5c2   :  { %v1342_v44 = vrot.slane %v1341_v19, 4 }
 0x5c4   :  { %v1343_v29 = vadd.f32 %v1342_v44, %v1341_v19 }
 0x5c6   :  { %v1344_v43 = vrot.slane %v1343_v29, 2 }
 0x5c8   :  { %v1345_v18 = vadd.f32 %v1344_v43, %v1343_v29 }
 0x5ca   :  { %v1346_v46 = vrot.slane %v1345_v18, 1 }
 0x5cc   :  { %v1347_v16 = vadd.f32 %v1346_v46, %v1345_v18 }
 0x5ce   :  { %v1348_v61 = vmul.f32 0.0078125, %v1347_v16 }
 0x5d0   :  { %v1349_v53 = vadd.f32 1e-05, %v1348_v61 }
 0x5d2   :  { %3760 = vrsqrt.f32 %v1349_v53 }
 0x5dc   :  { %v3761_v22 = vpop.eup %3760 }
 0x5dd   :  { %v1351_v45 = vmul.f32 %v3761_v22, %v1271_v36 }
 0x5df   :  { %v1352_v41 = vmul.f32 %v1351_v45, %v1294_v26  ;;  %v1357_v55 = vrot.slane %v1351_v45, %v4184_v24 }
 0x5e1   :  { %v1353_v34 = vsub.f32 %v1272_v51, %v1352_v41  ;;  %v1371_v33 = vmul.f32 %v1357_v55, %v4451_v7  ;;  %v1358_v9 = vmul.f32 %v1357_v55, %v4410_v50  ;;  %v1359_v57 = vmul.f32 %v1357_v55, %v4414_v21 }
 0x5e2   :  { %v1360_v27 = vmul.f32 %v4408_v40, %v1357_v55  ;;  %v1361_v25 = vmul.f32 %v4412_v58, %v1357_v55  ;;  %v1362_v30 = vmul.f32 %v1357_v55, %v4422_v47  ;;  %v1363_v38 = vmul.f32 %v1357_v55, %v4427_v42 }
 0x5e3   :  { %v1377_v48 = vrot.slane %v1353_v34, %v4184_v24  ;;  %v1364_v26 = vmul.f32 %v4419_v10, %v1357_v55  ;;  %v1365_v56 = vmul.f32 %v4425_v2, %v1357_v55  ;;  %v1366_v7 = vmul.f32 %v1357_v55, %v4434_v28 }
 0x5e4   :  { %v1367_v50 = vmul.f32 %v1357_v55, %v4439_v37  ;;  %v1368_v21 = vmul.f32 %v4431_v20, %v1357_v55  ;;  %v1369_v40 = vmul.f32 %v4437_v12, %v1357_v55  ;;  %v1370_v58 = vmul.f32 %v1357_v55, %v4446_v0 }
 0x5e5   :  { %v1391_v32 = vadd.f32 %v1377_v48, %v1371_v33  ;;  %v1378_v47 = vadd.f32 %v1377_v48, %v1358_v9  ;;  %v1379_v13 = vadd.f32 %v1377_v48, %v1359_v57  ;;  %v1380_v42 = vadd.f32 %v1377_v48, %v1360_v27 }
 0x5e6   :  { %v1381_v49 = vadd.f32 %v1377_v48, %v1361_v25  ;;  %v1382_v14 = vadd.f32 %v1377_v48, %v1362_v30  ;;  %v1383_v54 = vadd.f32 %v1377_v48, %v1363_v38  ;;  %v1384_v10 = vadd.f32 %v1377_v48, %v1364_v26  ;;  %v3724_v26 = vld [vmem:[#allocation3 + $0x80] sm:$0xff]  }
 0x5e7   :  { %v1394_v11 = vmax.f32 %v1378_v47, 0.0  ;;  %v1395_v2 = vmax.f32 %v1379_v13, 0.0  ;;  %v1396_v1 = vmax.f32 %v1380_v42, 0.0  ;;  %v1385_v28 = vadd.f32 %v1377_v48, %v1365_v56  ;;  %3532 = vmatprep.subr.bf16.mxu0 %v3724_v26  ;;  %v3726_v56 = vld [vmem:[#allocation3 + $0x90] sm:$0xff]  }
 0x5e8   :  { %v1397_v52 = vmax.f32 %v1381_v49, 0.0  ;;  %v1398_v37 = vmax.f32 %v1382_v14, 0.0  ;;  %v1399_v5 = vmax.f32 %v1383_v54, 0.0  ;;  %v1400_v20 = vmax.f32 %v1384_v10, 0.0  ;;  %3533 = vmatpush3.bf16.msra.mxu0 %v3724_v26 }
 0x5e9   :  { %v1410_v23 = vpack.c.bf16 %v1395_v2, %v1394_v11  ;;  %v1401_v12 = vmax.f32 %v1385_v28, 0.0  ;;  %v1386_v8 = vadd.f32 %v1377_v48, %v1366_v7  ;;  %v1387_v0 = vadd.f32 %v1377_v48, %v1367_v50  ;;  %v3730_v7 = vld [vmem:[#allocation3 + $0xb0] sm:$0xff]  }
 0x5ea   :  { %v1411_v19 = vpack.c.bf16 %v1397_v52, %v1396_v1  ;;  %v1412_v44 = vpack.c.bf16 %v1399_v5, %v1398_v37  ;;  %v1388_v29 = vadd.f32 %v1377_v48, %v1368_v21  ;;  %v1389_v43 = vadd.f32 %v1377_v48, %v1369_v40  ;;  %v3731_v21 = vld [vmem:[#allocation3 + $0xb8] sm:$0xff]  }
 0x5eb   :  { %3516 = vmatprep.mubr.bf16.mxu1 %v1410_v23  ;;  %v1413_v18 = vpack.c.bf16 %v1401_v12, %v1400_v20  ;;  %v1402_v46 = vmax.f32 %v1386_v8, 0.0  ;;  %v1403_v16 = vmax.f32 %v1387_v0, 0.0  ;;  %v1390_v61 = vadd.f32 %v1377_v48, %v1370_v58 }
 0x5ec   :  { %3517 = vmatmul.mubr.bf16.vlgmr.msra.gmra.mrb[32].mxu1 %v1411_v19  ;;  %v1404_v53 = vmax.f32 %v1388_v29, 0.0  ;;  %v1405_v36 = vmax.f32 %v1389_v43, 0.0  ;;  %v1407_v22 = vmax.f32 %v1391_v32, 0.0  ;;  %v1372_v45 = vmul.f32 %v4443_v60, %v1357_v55  ;;  %v3725_v60 = vld [vmem:[#allocation3 + $0x88] sm:$0xff]  }
 0x5ed   :  { %3520 = vmatprep.mubr.bf16.mxu1 %v1412_v44  ;;  %v1414_v51 = vpack.c.bf16 %v1403_v16, %v1402_v46  ;;  %v1406_v41 = vmax.f32 %v1390_v61, 0.0  ;;  %v1373_v34 = vmul.f32 %v4449_v31, %v1357_v55  ;;  %3534 = vmatprep.subr.bf16.mxu0 %v3725_v60  ;;  %v3727_v31 = vld [vmem:[#allocation3 + $0x98] sm:$0xff]   ;;  %v3728_v55 = vld [vmem:[#allocation3 + $0xa0] sm:$0xff]  }
 0x5ee   :  { %v1415_v33 = vpack.c.bf16 %v1405_v36, %v1404_v53  ;;  %v1392_v9 = vadd.f32 %v1377_v48, %v1372_v45  ;;  %3535 = vmatpush3.bf16.msra.mxu0 %v3725_v60 }
 0x5ef   :  { %v1416_v57 = vpack.c.bf16 %v1407_v22, %v1406_v41  ;;  %v1393_v27 = vadd.f32 %v1377_v48, %v1373_v34  ;;  %3536 = vmatprep.subr.bf16.mxu0 %v3726_v56  ;;  %v3729_v48 = vld [vmem:[#allocation3 + $0xa8] sm:$0xff]  }
 0x5f0   :  { %v1408_v25 = vmax.f32 %v1392_v9, 0.0 }
 0x5f1   :  { %v1409_v30 = vmax.f32 %v1393_v27, 0.0 }
 0x5f2   :  { %3537 = vmatpush3.bf16.msra.mxu0 %v3726_v56 }
 0x5f3   :  { %v1417_v38 = vpack.c.bf16 %v1409_v30, %v1408_v25  ;;  %3538 = vmatprep.subr.bf16.mxu0 %v3727_v31 }
 0x5f4   :  { %3521 = vmatmul.mubr.bf16.gmra.mrb[36].mxu1 %v1413_v18 }
 0x5f5   :  { %3524 = vmatprep.mubr.bf16.mxu1 %v1414_v51 }
 0x5f6   :  { %3539 = vmatpush3.bf16.msra.mxu0 %v3727_v31 }
 0x5f7   :  { %3540 = vmatprep.subr.bf16.mxu0 %v3728_v55 }
 0x5fa   :  { %3541 = vmatpush3.bf16.msra.mxu0 %v3728_v55 }
 0x5fb   :  { %3542 = vmatprep.subr.bf16.mxu0 %v3729_v48 }
 0x5fc   :  { %3525 = vmatmul.mubr.bf16.gmra.mrb[40].mxu1 %v1415_v33 }
 0x5fd   :  { %3528 = vmatprep.mubr.bf16.mxu1 %v1416_v57 }
 0x5fe   :  { %3543 = vmatpush3.bf16.msra.mxu0 %v3729_v48 }
 0x5ff   :  { %3544 = vmatprep.subr.bf16.mxu0 %v3730_v7 }
 0x602   :  { %3545 = vmatpush3.bf16.msra.mxu0 %v3730_v7 }
 0x603   :  { %3546 = vmatprep.subr.bf16.mxu0 %v3731_v21 }
 0x604   :  { %3529 = vmatmul.mubr.bf16.gmra.mrb[44].mxu1 %v1417_v38 }
 0x606   :  { %3547 = vmatpush3.bf16.msra.mxu0 %v3731_v21 }
 0x6bf   :  { %v4496_v50 = vpop.f32.mrb[32].mxu1 }
 0x6c0   :  { %v4498_v40 = vpop.f32.mrb[33].mxu1 }
 0x6c1   :  { %v4500_v58 = vpop.f32.mrb[34].mxu1 }
 0x6c2   :  { %v4502_v32 = vpop.f32.mrb[35].mxu1 }
 0x6c3   :  { %v1582_v47 = vadd.f32 %v4502_v32, %v4498_v40 }
 0x6c5   :  { %v1583_v13 = vadd.f32 %v4496_v50, %v1582_v47 }
 0x6c7   :  { %v4507_v42 = vpop.f32.mrb[36].mxu1  ;;  %v1584_v49 = vadd.f32 %v4500_v58, %v1583_v13 }
 0x6c8   :  { %v4510_v14 = vpop.f32.mrb[37].mxu1 }
 0x6c9   :  { %v1585_v54 = vadd.f32 %v1584_v49, %v4510_v14  ;;  %v4513_v10 = vpop.f32.mrb[38].mxu1 }
 0x6ca   :  { %v4515_v11 = vpop.f32.mrb[39].mxu1 }
 0x6cb   :  { %v1586_v2 = vadd.f32 %v1585_v54, %v4515_v11 }
 0x6cd   :  { %v1587_v1 = vadd.f32 %v4507_v42, %v1586_v2 }
 0x6cf   :  { %v4519_v28 = vpop.f32.mrb[40].mxu1  ;;  %v1588_v52 = vadd.f32 %v4513_v10, %v1587_v1 }
 0x6d0   :  { %v4522_v37 = vpop.f32.mrb[41].mxu1 }
 0x6d1   :  { %v1589_v5 = vadd.f32 %v1588_v52, %v4522_v37  ;;  %v4525_v20 = vpop.f32.mrb[42].mxu1 }
 0x6d2   :  { %v4527_v23 = vpop.f32.mrb[43].mxu1 }
 0x6d3   :  { %v1590_v12 = vadd.f32 %v1589_v5, %v4527_v23 }
 0x6d5   :  { %v1591_v8 = vadd.f32 %v4519_v28, %v1590_v12 }
 0x6d7   :  { %v4531_v0 = vpop.f32.mrb[44].mxu1  ;;  %v1592_v19 = vadd.f32 %v4525_v20, %v1591_v8 }
 0x6d8   :  { %v4534_v44 = vpop.f32.mrb[45].mxu1 }
 0x6d9   :  { %v1593_v29 = vadd.f32 %v1592_v19, %v4534_v44  ;;  %v4537_v43 = vpop.f32.mrb[46].mxu1 }
 0x6da   :  { %v4539_v18 = vpop.f32.mrb[47].mxu1 }
 0x6db   :  { %v1594_v46 = vadd.f32 %v1593_v29, %v4539_v18 }
 0x6dd   :  { %v1595_v16 = vadd.f32 %v4531_v0, %v1594_v46 }
 0x6df   :  { %v1596_v61 = vadd.f32 %v4537_v43, %v1595_v16 }
 0x6e1   :  { %v1597_v53 = vrot.slane %v1596_v61, 4 }
 0x6e3   :  { %v1598_v36 = vadd.f32 %v1597_v53, %v1596_v61 }
 0x6e5   :  { %v1599_v22 = vrot.slane %v1598_v36, 2 }
 0x6e7   :  { %v1600_v45 = vadd.f32 %v1599_v22, %v1598_v36 }
 0x6e9   :  { %v1601_v51 = vrot.slane %v1600_v45, 1 }
 0x6eb   :  { %v1602_v41 = vadd.f32 %v1601_v51, %v1600_v45 }
 0x6ed   :  { %v1603_v34 = vmul.f32 0.0078125, %v1602_v41 }
 0x6ef   :  { %v1604_v33 = vsub.f32 %v4498_v40, %v1603_v34  ;;  %v1605_v9 = vsub.f32 %v4502_v32, %v1603_v34  ;;  %v1606_v57 = vsub.f32 %v4496_v50, %v1603_v34  ;;  %v1607_v27 = vsub.f32 %v4500_v58, %v1603_v34 }
 0x6f0   :  { %v1608_v25 = vsub.f32 %v4510_v14, %v1603_v34  ;;  %v1609_v30 = vsub.f32 %v4515_v11, %v1603_v34  ;;  %v1610_v38 = vsub.f32 %v4507_v42, %v1603_v34  ;;  %v1611_v26 = vsub.f32 %v4513_v10, %v1603_v34 }
 0x6f1   :  { %v1612_v60 = vsub.f32 %v4522_v37, %v1603_v34  ;;  %v1613_v56 = vsub.f32 %v4527_v23, %v1603_v34  ;;  %v1614_v31 = vsub.f32 %v4519_v28, %v1603_v34  ;;  %v1615_v55 = vsub.f32 %v4525_v20, %v1603_v34 }
 0x6f2   :  { %v1616_v48 = vsub.f32 %v4534_v44, %v1603_v34  ;;  %v1617_v7 = vsub.f32 %v4539_v18, %v1603_v34  ;;  %v1618_v21 = vsub.f32 %v4531_v0, %v1603_v34  ;;  %v1619_v47 = vsub.f32 %v4537_v43, %v1603_v34 }
 0x6f3   :  { %v1620_v13 = vmul.f32 %v1604_v33, %v1604_v33  ;;  %v1621_v49 = vmul.f32 %v1605_v9, %v1605_v9  ;;  %v1622_v54 = vmul.f32 %v1606_v57, %v1606_v57  ;;  %v1623_v1 = vmul.f32 %v1607_v27, %v1607_v27 }
 0x6f4   :  { %v1624_v5 = vmul.f32 %v1608_v25, %v1608_v25  ;;  %v1625_v8 = vmul.f32 %v1609_v30, %v1609_v30  ;;  %v1626_v29 = vmul.f32 %v1610_v38, %v1610_v38  ;;  %v1627_v16 = vmul.f32 %v1611_v26, %v1611_v26 }
 0x6f5   :  { %v1636_v2 = vadd.f32 %v1621_v49, %v1620_v13  ;;  %v1628_v53 = vmul.f32 %v1612_v60, %v1612_v60  ;;  %v1629_v22 = vmul.f32 %v1613_v56, %v1613_v56  ;;  %v1630_v51 = vmul.f32 %v1614_v31, %v1614_v31 }
 0x6f6   :  { %v1631_v33 = vmul.f32 %v1615_v55, %v1615_v55  ;;  %v1632_v57 = vmul.f32 %v1616_v48, %v1616_v48  ;;  %v1633_v27 = vmul.f32 %v1617_v7, %v1617_v7  ;;  %v1634_v25 = vmul.f32 %v1618_v21, %v1618_v21  ;;  %v1580_v55 = vld [vmem:[%s5286_s9 + $0x1] sm:$0x1] }
 0x6f7   :  { %v1637_v52 = vadd.f32 %v1636_v2, %v1622_v54  ;;  %v1635_v30 = vmul.f32 %v1619_v47, %v1619_v47  ;;  %v1581_v21 = vld [vmem:[%s5287_s10 + $0x1] sm:$0x1] }
 0x6f9   :  { %v1638_v12 = vadd.f32 %v1637_v52, %v1623_v1 }
 0x6fb   :  { %v1639_v19 = vadd.f32 %v1638_v12, %v1624_v5 }
 0x6fd   :  { %v1640_v46 = vadd.f32 %v1639_v19, %v1625_v8 }
 0x6ff   :  { %v1641_v61 = vadd.f32 %v1640_v46, %v1626_v29 }
 0x701   :  { %v1642_v36 = vadd.f32 %v1641_v61, %v1627_v16 }
 0x703   :  { %v1643_v45 = vadd.f32 %v1642_v36, %v1628_v53 }
 0x705   :  { %v1644_v41 = vadd.f32 %v1643_v45, %v1629_v22 }
 0x707   :  { %v1645_v9 = vadd.f32 %v1644_v41, %v1630_v51 }
 0x709   :  { %v1646_v13 = vadd.f32 %v1645_v9, %v1631_v33 }
 0x70b   :  { %v1647_v49 = vadd.f32 %v1646_v13, %v1632_v57 }
 0x70d   :  { %v1648_v54 = vadd.f32 %v1647_v49, %v1633_v27  ;;  %v5416_v49 = vmax.f32 %v4308_v3, 0.0 }
 0x70f   :  { %v1649_v2 = vadd.f32 %v1648_v54, %v1634_v25  ;;  %v5417_v54 = vmax.f32 %v4312_v4, 0.0 }
 0x711   :  { %v1650_v38 = vadd.f32 %v1649_v2, %v1635_v30 }
 0x713   :  { %v1651_v1 = vrot.slane %v1650_v38, 4 }
 0x715   :  { %v1652_v26 = vadd.f32 %v1651_v1, %v1650_v38 }
 0x717   :  { %v1653_v52 = vrot.slane %v1652_v26, 2 }
 0x719   :  { %v1654_v60 = vadd.f32 %v1653_v52, %v1652_v26 }
 0x71b   :  { %v1655_v5 = vrot.slane %v1654_v60, 1 }
 0x71d   :  { %v1656_v56 = vadd.f32 %v1655_v5, %v1654_v60 }
 0x71f   :  { %v1657_v12 = vmul.f32 0.0078125, %v1656_v56 }
 0x721   :  { %v1658_v31 = vadd.f32 1e-05, %v1657_v12  ;;  %v5420_v12 = vmax.f32 %v4338_v35, 0.0 }
 0x723   :  { %3762 = vrsqrt.f32 %v1658_v31 }
 0x72d   :  { %v3763_v48 = vpop.eup %3762 }
 0x72e   :  { %v1660_v7 = vmul.f32 %v3763_v48, %v1580_v55 }
 0x730   :  { %v1661_v47 = vmul.f32 %v1660_v7, %v1603_v34  ;;  %v1666_v8 = vrot.slane %v1660_v7, %v4184_v24  ;;  %v5421_v7 = vmax.f32 %v4346_v39, 0.0 }
 0x732   :  { %v1662_v19 = vsub.f32 %v1581_v21, %v1661_v47  ;;  %v1680_v29 = vmul.f32 %v1666_v8, %v4539_v18  ;;  %v1667_v46 = vmul.f32 %v1666_v8, %v4498_v40  ;;  %v1668_v16 = vmul.f32 %v1666_v8, %v4502_v32 }
 0x733   :  { %v1669_v61 = vmul.f32 %v4496_v50, %v1666_v8  ;;  %v1670_v53 = vmul.f32 %v4500_v58, %v1666_v8  ;;  %v1671_v36 = vmul.f32 %v1666_v8, %v4510_v14  ;;  %v1672_v22 = vmul.f32 %v1666_v8, %v4515_v11 }
 0x734   :  { %v1686_v45 = vrot.slane %v1662_v19, %v4184_v24  ;;  %v1673_v34 = vmul.f32 %v4507_v42, %v1666_v8  ;;  %v1674_v51 = vmul.f32 %v4513_v10, %v1666_v8  ;;  %v1675_v18 = vmul.f32 %v1666_v8, %v4522_v37 }
 0x735   :  { %v1676_v40 = vmul.f32 %v1666_v8, %v4527_v23  ;;  %v1677_v32 = vmul.f32 %v4519_v28, %v1666_v8  ;;  %v1678_v50 = vmul.f32 %v4525_v20, %v1666_v8  ;;  %v1679_v58 = vmul.f32 %v1666_v8, %v4534_v44 }
 0x736   :  { %v1700_v41 = vadd.f32 %v1686_v45, %v1680_v29  ;;  %v1687_v14 = vadd.f32 %v1686_v45, %v1667_v46  ;;  %v1688_v33 = vadd.f32 %v1686_v45, %v1668_v16  ;;  %v1689_v11 = vadd.f32 %v1686_v45, %v1669_v61 }
 0x737   :  { %v1690_v9 = vadd.f32 %v1686_v45, %v1670_v53  ;;  %v1691_v57 = vadd.f32 %v1686_v45, %v1671_v36  ;;  %v1692_v13 = vadd.f32 %v1686_v45, %v1672_v22  ;;  %v1693_v42 = vadd.f32 %v1686_v45, %v1673_v34  ;;  %v5423_v34 = vld [vmem:[#allocation9_spill] sm:$0xff] }
 0x738   :  { %v5413_v10 = vmax.f32 %v4296_v59, 0.0  ;;  %v5414_v37 = vmax.f32 %v4300_v17, 0.0  ;;  %v5415_v28 = vmax.f32 %v4304_v63, 0.0  ;;  %v1694_v44 = vadd.f32 %v1686_v45, %v1674_v51 }
 0x739   :  { %v4596_v25 = vadd.f32 %v1690_v9, %v5416_v49  ;;  %v4600_v30 = vadd.f32 %v1691_v57, %v5417_v54  ;;  %v5418_v59 = vmax.f32 %v4316_v15, 0.0  ;;  %v5419_v15 = vmax.f32 %v4330_v6, 0.0 }
 0x73a   :  { %v4584_v27 = vadd.f32 %v1687_v14, %v5413_v10  ;;  %v4588_v23 = vadd.f32 %v1688_v33, %v5414_v37  ;;  %v4592_v20 = vadd.f32 %v1689_v11, %v5415_v28  ;;  %v1695_v60 = vadd.f32 %v1686_v45, %v1675_v18  ;;  %v5435_v10 = vld [vmem:[#allocation12_spill] sm:$0xff] }
 0x73b   :  { %v4604_v2 = vadd.f32 %v1692_v13, %v5418_v59  ;;  %v5347_v1 = vmax.f32 %v4596_v25, 0.0  ;;  %v5346_v3 = vmax.f32 %v4600_v30, 0.0  ;;  %v4618_v52 = vadd.f32 %v1693_v42, %v5419_v15 }
 0x73c   :  { %v5350_v17 = vmax.f32 %v4584_v27, 0.0  ;;  %v5349_v38 = vmax.f32 %v4588_v23, 0.0  ;;  %v5348_v63 = vmax.f32 %v4592_v20, 0.0  ;;  %v1696_v5 = vadd.f32 %v1686_v45, %v1676_v40 }
 0x73d   :  { %v5345_v26 = vmax.f32 %v4604_v2, 0.0  ;;  %v4626_v31 = vadd.f32 %v1694_v44, %v5420_v12  ;;  %v1697_v55 = vadd.f32 %v1686_v45, %v1677_v32  ;;  %v1698_v48 = vadd.f32 %v1686_v45, %v1678_v50  ;;  %v5429_v32 = vld [vmem:[#allocation11_spill] sm:$0xff]  ;;  %v3735_v12 = vld [vmem:[#allocation5 + $0x98] sm:$0xff]  }
 0x73e   :  { %v1735_v4 = vpack.c.bf16 %v5349_v38, %v5350_v17  ;;  %v1736_v56 = vpack.c.bf16 %v5347_v1, %v5348_v63  ;;  %v4634_v21 = vadd.f32 %v1695_v60, %v5421_v7  ;;  %v5422_v47 = vmax.f32 %v4350_v62, 0.0  ;;  %v3732_v60 = vld [vmem:[#allocation5 + $0x80] sm:$0xff]  }
 0x73f   :  { %v1737_v6 = vpack.c.bf16 %v5345_v26, %v5346_v3  ;;  %v1699_v29 = vadd.f32 %v1686_v45, %v1679_v58  ;;  %v1681_v35 = vmul.f32 %v4531_v0, %v1666_v8  ;;  %v1682_v46 = vmul.f32 %v4537_v43, %v1666_v8  ;;  %v5426_v43 = vld [vmem:[#allocation10_spill] sm:$0xff]  ;;  %3564 = vmatprep.subr.bf16.mxu1 %v3732_v60 }
 0x740   :  { %3548 = vmatprep.mubr.bf16.mxu0 %v1735_v4  ;;  %v4638_v19 = vadd.f32 %v1696_v5, %v5422_v47  ;;  %v5344_v16 = vmax.f32 %v4618_v52, 0.0  ;;  %v5343_v61 = vmax.f32 %v4626_v31, 0.0  ;;  %v5342_v39 = vmax.f32 %v4634_v21, 0.0  ;;  %v5432_v58 = vld [vmem:[#allocation14_spill] sm:$0xff]  ;;  %3565 = vmatpush3.bf16.msra.mxu1 %v3732_v60  ;;  %v3739_v47 = vld [vmem:[#allocation5 + $0xb8] sm:$0xff]  }
 0x741   :  { %3549 = vmatmul.mubr.bf16.vlgmr.msra.gmra.mrb[48].mxu0 %v1736_v56  ;;  %v1701_v53 = vadd.f32 %v1686_v45, %v1681_v35  ;;  %v1702_v22 = vadd.f32 %v1686_v45, %v1682_v46  ;;  %v5424_v0 = vmax.f32 %v5423_v34, 0.0  ;;  %v5427_v8 = vmax.f32 %v5426_v43, 0.0  ;;  %v3733_v5 = vld [vmem:[#allocation5 + $0x88] sm:$0xff]   ;;  %v3734_v56 = vld [vmem:[#allocation5 + $0x90] sm:$0xff]  }
 0x742   :  { %3552 = vmatprep.mubr.bf16.mxu0 %v1737_v6  ;;  %v5341_v36 = vmax.f32 %v4638_v19, 0.0  ;;  %v1738_v62 = vpack.c.bf16 %v5343_v61, %v5344_v16  ;;  %v5430_v45 = vmax.f32 %v5429_v32, 0.0  ;;  %v5433_v14 = vmax.f32 %v5432_v58, 0.0  ;;  %3566 = vmatprep.subr.bf16.mxu1 %v3733_v5  ;;  %v3738_v6 = vld [vmem:[#allocation5 + $0xb0] sm:$0xff]  }
 0x743   :  { %v4652_v51 = vadd.f32 %v1697_v55, %v5424_v0  ;;  %v4656_v18 = vadd.f32 %v1698_v48, %v5427_v8  ;;  %v5436_v37 = vmax.f32 %v5435_v10, 0.0  ;;  %v3736_v55 = vld [vmem:[#allocation5 + $0xa0] sm:$0xff]   ;;  %v3737_v48 = vld [vmem:[#allocation5 + $0xa8] sm:$0xff]  }
 0x744   :  { %v1739_v40 = vpack.c.bf16 %v5341_v36, %v5342_v39  ;;  %v4664_v50 = vadd.f32 %v1699_v29, %v5430_v45  ;;  %v4668_v33 = vadd.f32 %v1700_v41, %v5433_v14  ;;  %v5438_v41 = vld [vmem:[#allocation13_spill] sm:$0xff]  ;;  %3567 = vmatpush3.bf16.msra.mxu1 %v3733_v5 }
 0x745   :  { %5425 = vst [vmem:[#allocation9_spill] sm:$0xff] %v4652_v51  ;;  %5428 = vst [vmem:[#allocation10_spill] sm:$0xff] %v4656_v18  ;;  %v5340_v11 = vmax.f32 %v4652_v51, 0.0  ;;  %v5339_v9 = vmax.f32 %v4656_v18, 0.0  ;;  %v4680_v28 = vadd.f32 %v1701_v53, %v5436_v37  ;;  %v5439_v44 = vmax.f32 %v5438_v41, 0.0  ;;  %3568 = vmatprep.subr.bf16.mxu1 %v3734_v56 }
 0x746   :  { %5431 = vst [vmem:[#allocation11_spill] sm:$0xff] %v4664_v50  ;;  %5434 = vst [vmem:[#allocation14_spill] sm:$0xff] %v4668_v33  ;;  %v5338_v57 = vmax.f32 %v4664_v50, 0.0  ;;  %v5337_v13 = vmax.f32 %v4668_v33, 0.0 }
 0x747   :  { %v1740_v42 = vpack.c.bf16 %v5339_v9, %v5340_v11  ;;  %5437 = vst [vmem:[#allocation12_spill] sm:$0xff] %v4680_v28  ;;  %v4684_v49 = vadd.f32 %v1702_v22, %v5439_v44  ;;  %v5336_v59 = vmax.f32 %v4680_v28, 0.0 }
 0x748   :  { %v1741_v54 = vpack.c.bf16 %v5337_v13, %v5338_v57  ;;  %3569 = vmatpush3.bf16.msra.mxu1 %v3734_v56 }
 0x749   :  { %3553 = vmatmul.mubr.bf16.gmra.mrb[52].mxu0 %v1738_v62  ;;  %5440 = vst [vmem:[#allocation13_spill] sm:$0xff] %v4684_v49  ;;  %v5335_v4 = vmax.f32 %v4684_v49, 0.0  ;;  %3570 = vmatprep.subr.bf16.mxu1 %v3735_v12 }
 0x74a   :  { %3556 = vmatprep.mubr.bf16.mxu0 %v1739_v40 }
 0x74b   :  { %v1742_v15 = vpack.c.bf16 %v5335_v4, %v5336_v59 }
 0x74c   :  { %3571 = vmatpush3.bf16.msra.mxu1 %v3735_v12 }
 0x74d   :  { %3572 = vmatprep.subr.bf16.mxu1 %v3736_v55 }
 0x750   :  { %3573 = vmatpush3.bf16.msra.mxu1 %v3736_v55 }
 0x751   :  { %3557 = vmatmul.mubr.bf16.gmra.mrb[56].mxu0 %v1740_v42  ;;  %3574 = vmatprep.subr.bf16.mxu1 %v3737_v48 }
 0x752   :  { %3560 = vmatprep.mubr.bf16.mxu0 %v1741_v54 }
 0x754   :  { %3575 = vmatpush3.bf16.msra.mxu1 %v3737_v48 }
 0x755   :  { %3576 = vmatprep.subr.bf16.mxu1 %v3738_v6 }
 0x758   :  { %3577 = vmatpush3.bf16.msra.mxu1 %v3738_v6 }
 0x759   :  { %3561 = vmatmul.mubr.bf16.gmra.mrb[60].mxu0 %v1742_v15  ;;  %3578 = vmatprep.subr.bf16.mxu1 %v3739_v47 }
 0x75c   :  { %3579 = vmatpush3.bf16.msra.mxu1 %v3739_v47 }
 0x814   :  { %v4696_v7 = vpop.f32.mrb[48].mxu0 }
 0x815   :  { %v4698_v29 = vpop.f32.mrb[49].mxu0 }
 0x816   :  { %v4700_v35 = vpop.f32.mrb[50].mxu0 }
 0x817   :  { %v4702_v46 = vpop.f32.mrb[51].mxu0 }
 0x818   :  { %v1907_v53 = vadd.f32 %v4702_v46, %v4698_v29 }
 0x81a   :  { %v1908_v22 = vadd.f32 %v4696_v7, %v1907_v53 }
 0x81c   :  { %v4707_v62 = vpop.f32.mrb[52].mxu0  ;;  %v1909_v34 = vadd.f32 %v4700_v35, %v1908_v22 }
 0x81d   :  { %v4710_v0 = vpop.f32.mrb[53].mxu0 }
 0x81e   :  { %v1910_v43 = vadd.f32 %v1909_v34, %v4710_v0  ;;  %v4713_v8 = vpop.f32.mrb[54].mxu0 }
 0x81f   :  { %v4715_v40 = vpop.f32.mrb[55].mxu0 }
 0x820   :  { %v1911_v32 = vadd.f32 %v1910_v43, %v4715_v40 }
 0x822   :  { %v1912_v45 = vadd.f32 %v4707_v62, %v1911_v32 }
 0x824   :  { %v4719_v58 = vpop.f32.mrb[56].mxu0  ;;  %v1913_v14 = vadd.f32 %v4713_v8, %v1912_v45 }
 0x825   :  { %v4722_v42 = vpop.f32.mrb[57].mxu0 }
 0x826   :  { %v1914_v10 = vadd.f32 %v1913_v14, %v4722_v42  ;;  %v4725_v37 = vpop.f32.mrb[58].mxu0 }
 0x827   :  { %v4727_v41 = vpop.f32.mrb[59].mxu0 }
 0x828   :  { %v1915_v44 = vadd.f32 %v1914_v10, %v4727_v41 }
 0x82a   :  { %v1916_v54 = vadd.f32 %v4719_v58, %v1915_v44 }
 0x82c   :  { %v4731_v15 = vpop.f32.mrb[60].mxu0  ;;  %v1917_v60 = vadd.f32 %v4725_v37, %v1916_v54 }
 0x82d   :  { %v4734_v5 = vpop.f32.mrb[61].mxu0 }
 0x82e   :  { %v1918_v56 = vadd.f32 %v1917_v60, %v4734_v5  ;;  %v4737_v12 = vpop.f32.mrb[62].mxu0 }
 0x82f   :  { %v4739_v55 = vpop.f32.mrb[63].mxu0 }
 0x830   :  { %v1919_v48 = vadd.f32 %v1918_v56, %v4739_v55 }
 0x832   :  { %v1920_v6 = vadd.f32 %v4731_v15, %v1919_v48 }
 0x834   :  { %v1921_v47 = vadd.f32 %v4737_v12, %v1920_v6 }
 0x836   :  { %v1922_v53 = vrot.slane %v1921_v47, 4 }
 0x838   :  { %v1923_v22 = vadd.f32 %v1922_v53, %v1921_v47 }
 0x83a   :  { %v1924_v34 = vrot.slane %v1923_v22, 2 }
 0x83c   :  { %v1925_v43 = vadd.f32 %v1924_v34, %v1923_v22 }
 0x83e   :  { %v1926_v32 = vrot.slane %v1925_v43, 1 }
 0x840   :  { %v1927_v45 = vadd.f32 %v1926_v32, %v1925_v43 }
 0x842   :  { %v1928_v14 = vmul.f32 0.0078125, %v1927_v45 }
 0x844   :  { %v1929_v10 = vsub.f32 %v4698_v29, %v1928_v14  ;;  %v1930_v44 = vsub.f32 %v4702_v46, %v1928_v14  ;;  %v1931_v54 = vsub.f32 %v4696_v7, %v1928_v14  ;;  %v1932_v60 = vsub.f32 %v4700_v35, %v1928_v14 }
 0x845   :  { %v1933_v56 = vsub.f32 %v4710_v0, %v1928_v14  ;;  %v1934_v48 = vsub.f32 %v4715_v40, %v1928_v14  ;;  %v1935_v6 = vsub.f32 %v4707_v62, %v1928_v14  ;;  %v1936_v47 = vsub.f32 %v4713_v8, %v1928_v14 }
 0x846   :  { %v1937_v53 = vsub.f32 %v4722_v42, %v1928_v14  ;;  %v1938_v22 = vsub.f32 %v4727_v41, %v1928_v14  ;;  %v1939_v34 = vsub.f32 %v4719_v58, %v1928_v14  ;;  %v1940_v43 = vsub.f32 %v4725_v37, %v1928_v14 }
 0x847   :  { %v1941_v32 = vsub.f32 %v4734_v5, %v1928_v14  ;;  %v1942_v45 = vsub.f32 %v4739_v55, %v1928_v14  ;;  %v1943_v4 = vsub.f32 %v4731_v15, %v1928_v14  ;;  %v1944_v59 = vsub.f32 %v4737_v12, %v1928_v14 }
 0x848   :  { %v1945_v13 = vmul.f32 %v1929_v10, %v1929_v10  ;;  %v1946_v57 = vmul.f32 %v1930_v44, %v1930_v44  ;;  %v1947_v9 = vmul.f32 %v1931_v54, %v1931_v54  ;;  %v1948_v36 = vmul.f32 %v1932_v60, %v1932_v60 }
 0x849   :  { %v1949_v61 = vmul.f32 %v1933_v56, %v1933_v56  ;;  %v1950_v26 = vmul.f32 %v1934_v48, %v1934_v48  ;;  %v1951_v1 = vmul.f32 %v1935_v6, %v1935_v6  ;;  %v1952_v38 = vmul.f32 %v1936_v47, %v1936_v47 }
 0x84a   :  { %v1961_v11 = vadd.f32 %v1946_v57, %v1945_v13  ;;  %v1953_v49 = vmul.f32 %v1937_v53, %v1937_v53  ;;  %v1954_v33 = vmul.f32 %v1938_v22, %v1938_v22  ;;  %v1955_v18 = vmul.f32 %v1939_v34, %v1939_v34 }
 0x84b   :  { %v1956_v10 = vmul.f32 %v1940_v43, %v1940_v43  ;;  %v1957_v54 = vmul.f32 %v1941_v32, %v1941_v32  ;;  %v1958_v13 = vmul.f32 %v1942_v45, %v1942_v45 }
 0x84c   :  { %v1962_v39 = vadd.f32 %v1961_v11, %v1947_v9  ;;  %v1959_v9 = vmul.f32 %v1943_v4, %v1943_v4 }
 0x84e   :  { %v1963_v16 = vadd.f32 %v1962_v39, %v1948_v36  ;;  %v1960_v36 = vmul.f32 %v1944_v59, %v1944_v59 }
 0x850   :  { %v1964_v3 = vadd.f32 %v1963_v16, %v1949_v61 }
 0x852   :  { %v1965_v63 = vadd.f32 %v1964_v3, %v1950_v26 }
 0x854   :  { %v1966_v17 = vadd.f32 %v1965_v63, %v1951_v1 }
 0x856   :  { %v1967_v28 = vadd.f32 %v1966_v17, %v1952_v38 }
 0x858   :  { %v1968_v50 = vadd.f32 %v1967_v28, %v1953_v49 }
 0x85a   :  { %v1969_v51 = vadd.f32 %v1968_v50, %v1954_v33  ;;  %v1906_v33 = vld [vmem:[%s5284_s7 + $0x2] sm:$0x1] }
 0x85c   :  { %v1970_v44 = vadd.f32 %v1969_v51, %v1955_v18  ;;  %v1905_v51 = vld [vmem:[%s5283_s6 + $0x2] sm:$0x1] }
 0x85e   :  { %v1971_v57 = vadd.f32 %v1970_v44, %v1956_v10 }
 0x860   :  { %v1972_v11 = vadd.f32 %v1971_v57, %v1957_v54 }
 0x862   :  { %v1973_v39 = vadd.f32 %v1972_v11, %v1958_v13 }
 0x864   :  { %v1974_v16 = vadd.f32 %v1973_v39, %v1959_v9 }
 0x866   :  { %v1975_v61 = vadd.f32 %v1974_v16, %v1960_v36 }
 0x868   :  { %v1976_v3 = vrot.slane %v1975_v61, 4 }
 0x86a   :  { %v1977_v26 = vadd.f32 %v1976_v3, %v1975_v61 }
 0x86c   :  { %v1978_v63 = vrot.slane %v1977_v26, 2 }
 0x86e   :  { %v1979_v1 = vadd.f32 %v1978_v63, %v1977_v26 }
 0x870   :  { %v1980_v17 = vrot.slane %v1979_v1, 1 }
 0x872   :  { %v1981_v38 = vadd.f32 %v1980_v17, %v1979_v1 }
 0x874   :  { %v1982_v28 = vmul.f32 0.0078125, %v1981_v38 }
 0x876   :  { %v1983_v49 = vadd.f32 1e-05, %v1982_v28 }
 0x878   :  { %3764 = vrsqrt.f32 %v1983_v49 }
 0x882   :  { %v3765_v18 = vpop.eup %3764 }
 0x883   :  { %v1985_v50 = vmul.f32 %v3765_v18, %v1905_v51 }
 0x885   :  { %v1986_v59 = vmul.f32 %v1985_v50, %v1928_v14  ;;  %v1991_v4 = vrot.slane %v1985_v50, %v4184_v24 }
 0x887   :  { %v1987_v60 = vsub.f32 %v1906_v33, %v1986_v59  ;;  %v2005_v56 = vmul.f32 %v1991_v4, %v4739_v55  ;;  %v1992_v48 = vmul.f32 %v1991_v4, %v4698_v29  ;;  %v1993_v6 = vmul.f32 %v1991_v4, %v4702_v46 }
 0x888   :  { %v1994_v47 = vmul.f32 %v4696_v7, %v1991_v4  ;;  %v1995_v53 = vmul.f32 %v4700_v35, %v1991_v4  ;;  %v1996_v22 = vmul.f32 %v1991_v4, %v4710_v0  ;;  %v1997_v34 = vmul.f32 %v1991_v4, %v4715_v40 }
 0x889   :  { %v2011_v43 = vrot.slane %v1987_v60, %v4184_v24  ;;  %v1998_v14 = vmul.f32 %v4707_v62, %v1991_v4  ;;  %v1999_v32 = vmul.f32 %v4713_v8, %v1991_v4  ;;  %v2000_v55 = vmul.f32 %v1991_v4, %v4722_v42 }
 0x88a   :  { %v2001_v29 = vmul.f32 %v1991_v4, %v4727_v41  ;;  %v2002_v46 = vmul.f32 %v4719_v58, %v1991_v4  ;;  %v2003_v7 = vmul.f32 %v4725_v37, %v1991_v4  ;;  %v2004_v35 = vmul.f32 %v1991_v4, %v4734_v5 }
 0x88b   :  { %v2025_v45 = vadd.f32 %v2011_v43, %v2005_v56  ;;  %v2012_v0 = vadd.f32 %v2011_v43, %v1992_v48  ;;  %v2013_v10 = vadd.f32 %v2011_v43, %v1993_v6  ;;  %v2014_v40 = vadd.f32 %v2011_v43, %v1994_v47 }
 0x88c   :  { %v2015_v44 = vadd.f32 %v2011_v43, %v1995_v53  ;;  %v2016_v54 = vadd.f32 %v2011_v43, %v1996_v22  ;;  %v2017_v57 = vadd.f32 %v2011_v43, %v1997_v34  ;;  %v2018_v62 = vadd.f32 %v2011_v43, %v1998_v14  ;;  %v3740_v14 = vld [vmem:[#allocation3 + $0xc0] sm:$0xff]  }
 0x88d   :  { %v2028_v13 = vmax.f32 %v2012_v0, 0.0  ;;  %v2029_v8 = vmax.f32 %v2013_v10, 0.0  ;;  %v2030_v11 = vmax.f32 %v2014_v40, 0.0  ;;  %v2019_v42 = vadd.f32 %v2011_v43, %v1999_v32  ;;  %3596 = vmatprep.subr.bf16.mxu0 %v3740_v14  ;;  %v3742_v32 = vld [vmem:[#allocation3 + $0xd0] sm:$0xff]  }
 0x88e   :  { %v2031_v9 = vmax.f32 %v2015_v44, 0.0  ;;  %v2032_v41 = vmax.f32 %v2016_v54, 0.0  ;;  %v2033_v39 = vmax.f32 %v2017_v57, 0.0  ;;  %v2034_v58 = vmax.f32 %v2018_v62, 0.0  ;;  %3597 = vmatpush3.bf16.msra.mxu0 %v3740_v14 }
 0x88f   :  { %v2044_v36 = vpack.c.bf16 %v2029_v8, %v2028_v13  ;;  %v2035_v37 = vmax.f32 %v2019_v42, 0.0  ;;  %v2020_v16 = vadd.f32 %v2011_v43, %v2000_v55  ;;  %v2021_v5 = vadd.f32 %v2011_v43, %v2001_v29  ;;  %v3746_v55 = vld [vmem:[#allocation3 + $0xf0] sm:$0xff]  }
 0x890   :  { %v2045_v61 = vpack.c.bf16 %v2031_v9, %v2030_v11  ;;  %v2046_v3 = vpack.c.bf16 %v2033_v39, %v2032_v41  ;;  %v2022_v26 = vadd.f32 %v2011_v43, %v2002_v46  ;;  %v2023_v63 = vadd.f32 %v2011_v43, %v2003_v7  ;;  %v3747_v46 = vld [vmem:[#allocation3 + $0xf8] sm:$0xff]  }
 0x891   :  { %3580 = vmatprep.mubr.bf16.mxu1 %v2044_v36  ;;  %v2047_v1 = vpack.c.bf16 %v2035_v37, %v2034_v58  ;;  %v2036_v17 = vmax.f32 %v2020_v16, 0.0  ;;  %v2037_v38 = vmax.f32 %v2021_v5, 0.0  ;;  %v2024_v28 = vadd.f32 %v2011_v43, %v2004_v35 }
 0x892   :  { %3581 = vmatmul.mubr.bf16.vlgmr.msra.gmra.mrb[48].mxu1 %v2045_v61  ;;  %v2038_v49 = vmax.f32 %v2022_v26, 0.0  ;;  %v2039_v51 = vmax.f32 %v2023_v63, 0.0  ;;  %v2041_v18 = vmax.f32 %v2025_v45, 0.0  ;;  %v2006_v50 = vmul.f32 %v4731_v15, %v1991_v4  ;;  %v3741_v15 = vld [vmem:[#allocation3 + $0xc8] sm:$0xff]  }
 0x893   :  { %3584 = vmatprep.mubr.bf16.mxu1 %v2046_v3  ;;  %v2048_v33 = vpack.c.bf16 %v2037_v38, %v2036_v17  ;;  %v2040_v59 = vmax.f32 %v2024_v28, 0.0  ;;  %v2007_v60 = vmul.f32 %v4737_v12, %v1991_v4  ;;  %3598 = vmatprep.subr.bf16.mxu0 %v3741_v15  ;;  %v3743_v12 = vld [vmem:[#allocation3 + $0xd8] sm:$0xff]   ;;  %v3744_v4 = vld [vmem:[#allocation3 + $0xe0] sm:$0xff]  }
 0x894   :  { %v2049_v56 = vpack.c.bf16 %v2039_v51, %v2038_v49  ;;  %v2026_v48 = vadd.f32 %v2011_v43, %v2006_v50  ;;  %3599 = vmatpush3.bf16.msra.mxu0 %v3741_v15 }
 0x895   :  { %v2050_v6 = vpack.c.bf16 %v2041_v18, %v2040_v59  ;;  %v2027_v47 = vadd.f32 %v2011_v43, %v2007_v60  ;;  %3600 = vmatprep.subr.bf16.mxu0 %v3742_v32  ;;  %v3745_v43 = vld [vmem:[#allocation3 + $0xe8] sm:$0xff]  }
 0x896   :  { %v2042_v53 = vmax.f32 %v2026_v48, 0.0 }
 0x897   :  { %v2043_v22 = vmax.f32 %v2027_v47, 0.0 }
 0x898   :  { %3601 = vmatpush3.bf16.msra.mxu0 %v3742_v32 }
 0x899   :  { %v2051_v34 = vpack.c.bf16 %v2043_v22, %v2042_v53  ;;  %3602 = vmatprep.subr.bf16.mxu0 %v3743_v12 }
 0x89a   :  { %3585 = vmatmul.mubr.bf16.gmra.mrb[52].mxu1 %v2047_v1 }
 0x89b   :  { %3588 = vmatprep.mubr.bf16.mxu1 %v2048_v33 }
 0x89c   :  { %3603 = vmatpush3.bf16.msra.mxu0 %v3743_v12 }
 0x89d   :  { %3604 = vmatprep.subr.bf16.mxu0 %v3744_v4 }
 0x8a0   :  { %3605 = vmatpush3.bf16.msra.mxu0 %v3744_v4 }
 0x8a1   :  { %3606 = vmatprep.subr.bf16.mxu0 %v3745_v43 }
 0x8a2   :  { %3589 = vmatmul.mubr.bf16.gmra.mrb[56].mxu1 %v2049_v56 }
 0x8a3   :  { %3592 = vmatprep.mubr.bf16.mxu1 %v2050_v6 }
 0x8a4   :  { %3607 = vmatpush3.bf16.msra.mxu0 %v3745_v43 }
 0x8a5   :  { %3608 = vmatprep.subr.bf16.mxu0 %v3746_v55 }
 0x8a8   :  { %3609 = vmatpush3.bf16.msra.mxu0 %v3746_v55 }
 0x8a9   :  { %3610 = vmatprep.subr.bf16.mxu0 %v3747_v46 }
 0x8aa   :  { %3593 = vmatmul.mubr.bf16.gmra.mrb[60].mxu1 %v2051_v34 }
 0x8ac   :  { %3611 = vmatpush3.bf16.msra.mxu0 %v3747_v46 }
 0x965   :  { %v4784_v29 = vpop.f32.mrb[48].mxu1 }
 0x966   :  { %v4786_v7 = vpop.f32.mrb[49].mxu1 }
 0x967   :  { %v4788_v35 = vpop.f32.mrb[50].mxu1 }
 0x968   :  { %v4790_v45 = vpop.f32.mrb[51].mxu1 }
 0x969   :  { %v2216_v0 = vadd.f32 %v4790_v45, %v4786_v7 }
 0x96b   :  { %v2217_v10 = vadd.f32 %v4784_v29, %v2216_v0 }
 0x96d   :  { %v4795_v40 = vpop.f32.mrb[52].mxu1  ;;  %v2218_v44 = vadd.f32 %v4788_v35, %v2217_v10 }
 0x96e   :  { %v4798_v54 = vpop.f32.mrb[53].mxu1 }
 0x96f   :  { %v2219_v57 = vadd.f32 %v2218_v44, %v4798_v54  ;;  %v4801_v62 = vpop.f32.mrb[54].mxu1 }
 0x970   :  { %v4803_v13 = vpop.f32.mrb[55].mxu1 }
 0x971   :  { %v2220_v8 = vadd.f32 %v2219_v57, %v4803_v13 }
 0x973   :  { %v2221_v11 = vadd.f32 %v4795_v40, %v2220_v8 }
 0x975   :  { %v4807_v42 = vpop.f32.mrb[56].mxu1  ;;  %v2222_v9 = vadd.f32 %v4801_v62, %v2221_v11 }
 0x976   :  { %v4810_v41 = vpop.f32.mrb[57].mxu1 }
 0x977   :  { %v2223_v39 = vadd.f32 %v2222_v9, %v4810_v41  ;;  %v4813_v58 = vpop.f32.mrb[58].mxu1 }
 0x978   :  { %v4815_v36 = vpop.f32.mrb[59].mxu1 }
 0x979   :  { %v2224_v37 = vadd.f32 %v2223_v39, %v4815_v36 }
 0x97b   :  { %v2225_v16 = vadd.f32 %v4807_v42, %v2224_v37 }
 0x97d   :  { %v4819_v5 = vpop.f32.mrb[60].mxu1  ;;  %v2226_v61 = vadd.f32 %v4813_v58, %v2225_v16 }
 0x97e   :  { %v4822_v3 = vpop.f32.mrb[61].mxu1 }
 0x97f   :  { %v2227_v26 = vadd.f32 %v2226_v61, %v4822_v3  ;;  %v4825_v63 = vpop.f32.mrb[62].mxu1 }
 0x980   :  { %v4827_v1 = vpop.f32.mrb[63].mxu1 }
 0x981   :  { %v2228_v17 = vadd.f32 %v2227_v26, %v4827_v1 }
 0x983   :  { %v2229_v38 = vadd.f32 %v4819_v5, %v2228_v17 }
 0x985   :  { %v2230_v28 = vadd.f32 %v4825_v63, %v2229_v38 }
 0x987   :  { %v2231_v49 = vrot.slane %v2230_v28, 4 }
 0x989   :  { %v2232_v51 = vadd.f32 %v2231_v49, %v2230_v28 }
 0x98b   :  { %v2233_v18 = vrot.slane %v2232_v51, 2 }
 0x98d   :  { %v2234_v50 = vadd.f32 %v2233_v18, %v2232_v51 }
 0x98f   :  { %v2235_v33 = vrot.slane %v2234_v50, 1 }
 0x991   :  { %v2236_v59 = vadd.f32 %v2235_v33, %v2234_v50 }
 0x993   :  { %v2237_v60 = vmul.f32 0.0078125, %v2236_v59 }
 0x995   :  { %v2238_v56 = vsub.f32 %v4786_v7, %v2237_v60  ;;  %v2239_v48 = vsub.f32 %v4790_v45, %v2237_v60  ;;  %v2240_v6 = vsub.f32 %v4784_v29, %v2237_v60  ;;  %v2241_v47 = vsub.f32 %v4788_v35, %v2237_v60 }
 0x996   :  { %v2242_v53 = vsub.f32 %v4798_v54, %v2237_v60  ;;  %v2243_v22 = vsub.f32 %v4803_v13, %v2237_v60  ;;  %v2244_v34 = vsub.f32 %v4795_v40, %v2237_v60  ;;  %v2245_v14 = vsub.f32 %v4801_v62, %v2237_v60 }
 0x997   :  { %v2246_v15 = vsub.f32 %v4810_v41, %v2237_v60  ;;  %v2247_v32 = vsub.f32 %v4815_v36, %v2237_v60  ;;  %v2248_v12 = vsub.f32 %v4807_v42, %v2237_v60  ;;  %v2249_v4 = vsub.f32 %v4813_v58, %v2237_v60 }
 0x998   :  { %v2250_v43 = vsub.f32 %v4822_v3, %v2237_v60  ;;  %v2251_v55 = vsub.f32 %v4827_v1, %v2237_v60  ;;  %v2252_v46 = vsub.f32 %v4819_v5, %v2237_v60  ;;  %v2253_v0 = vsub.f32 %v4825_v63, %v2237_v60 }
 0x999   :  { %v2254_v10 = vmul.f32 %v2238_v56, %v2238_v56  ;;  %v2255_v44 = vmul.f32 %v2239_v48, %v2239_v48  ;;  %v2256_v57 = vmul.f32 %v2240_v6, %v2240_v6  ;;  %v2257_v11 = vmul.f32 %v2241_v47, %v2241_v47 }
 0x99a   :  { %v2258_v39 = vmul.f32 %v2242_v53, %v2242_v53  ;;  %v2259_v16 = vmul.f32 %v2243_v22, %v2243_v22  ;;  %v2260_v26 = vmul.f32 %v2244_v34, %v2244_v34  ;;  %v2261_v38 = vmul.f32 %v2245_v14, %v2245_v14 }
 0x99b   :  { %v2270_v8 = vadd.f32 %v2255_v44, %v2254_v10  ;;  %v2262_v49 = vmul.f32 %v2246_v15, %v2246_v15  ;;  %v2263_v18 = vmul.f32 %v2247_v32, %v2247_v32  ;;  %v2264_v33 = vmul.f32 %v2248_v12, %v2248_v12 }
 0x99c   :  { %v2265_v56 = vmul.f32 %v2249_v4, %v2249_v4  ;;  %v2266_v6 = vmul.f32 %v2250_v43, %v2250_v43  ;;  %v2267_v47 = vmul.f32 %v2251_v55, %v2251_v55  ;;  %v2268_v53 = vmul.f32 %v2252_v46, %v2252_v46  ;;  %v2214_v4 = vld [vmem:[%s5286_s9 + $0x2] sm:$0x1] }
 0x99d   :  { %v2271_v9 = vadd.f32 %v2270_v8, %v2256_v57  ;;  %v2269_v22 = vmul.f32 %v2253_v0, %v2253_v0  ;;  %v2215_v46 = vld [vmem:[%s5287_s10 + $0x2] sm:$0x1] }
 0x99f   :  { %v2272_v37 = vadd.f32 %v2271_v9, %v2257_v11 }
 0x9a1   :  { %v2273_v61 = vadd.f32 %v2272_v37, %v2258_v39 }
 0x9a3   :  { %v2274_v17 = vadd.f32 %v2273_v61, %v2259_v16 }
 0x9a5   :  { %v2275_v28 = vadd.f32 %v2274_v17, %v2260_v26 }
 0x9a7   :  { %v2276_v51 = vadd.f32 %v2275_v28, %v2261_v38 }
 0x9a9   :  { %v2277_v50 = vadd.f32 %v2276_v51, %v2262_v49 }
 0x9ab   :  { %v2278_v59 = vadd.f32 %v2277_v50, %v2263_v18 }
 0x9ad   :  { %v2279_v48 = vadd.f32 %v2278_v59, %v2264_v33 }
 0x9af   :  { %v2280_v10 = vadd.f32 %v2279_v48, %v2265_v56 }
 0x9b1   :  { %v2281_v44 = vadd.f32 %v2280_v10, %v2266_v6 }
 0x9b3   :  { %v2282_v57 = vadd.f32 %v2281_v44, %v2267_v47  ;;  %v5444_v44 = vmax.f32 %v4596_v25, 0.0 }
 0x9b5   :  { %v2283_v8 = vadd.f32 %v2282_v57, %v2268_v53  ;;  %v5445_v57 = vmax.f32 %v4600_v30, 0.0 }
 0x9b7   :  { %v2284_v34 = vadd.f32 %v2283_v8, %v2269_v22 }
 0x9b9   :  { %v2285_v11 = vrot.slane %v2284_v34, 4 }
 0x9bb   :  { %v2286_v14 = vadd.f32 %v2285_v11, %v2284_v34 }
 0x9bd   :  { %v2287_v9 = vrot.slane %v2286_v14, 2 }
 0x9bf   :  { %v2288_v15 = vadd.f32 %v2287_v9, %v2286_v14 }
 0x9c1   :  { %v2289_v39 = vrot.slane %v2288_v15, 1 }
 0x9c3   :  { %v2290_v32 = vadd.f32 %v2289_v39, %v2288_v15 }
 0x9c5   :  { %v2291_v37 = vmul.f32 0.0078125, %v2290_v32 }
 0x9c7   :  { %v2292_v12 = vadd.f32 1e-05, %v2291_v37  ;;  %v5448_v37 = vmax.f32 %v4626_v31, 0.0 }
 0x9c9   :  { %3766 = vrsqrt.f32 %v2292_v12 }
 0x9d3   :  { %v3767_v43 = vpop.eup %3766 }
 0x9d4   :  { %v2294_v55 = vmul.f32 %v3767_v43, %v2214_v4 }
 0x9d6   :  { %v2295_v0 = vmul.f32 %v2294_v55, %v2237_v60  ;;  %v2300_v16 = vrot.slane %v2294_v55, %v4184_v24  ;;  %v5449_v55 = vmax.f32 %v4634_v21, 0.0 }
 0x9d8   :  { %v2296_v61 = vsub.f32 %v2215_v46, %v2295_v0  ;;  %v2314_v26 = vmul.f32 %v2300_v16, %v4827_v1  ;;  %v2301_v17 = vmul.f32 %v2300_v16, %v4786_v7  ;;  %v2302_v38 = vmul.f32 %v2300_v16, %v4790_v45 }
 0x9d9   :  { %v2303_v28 = vmul.f32 %v4784_v29, %v2300_v16  ;;  %v2304_v49 = vmul.f32 %v4788_v35, %v2300_v16  ;;  %v2305_v51 = vmul.f32 %v2300_v16, %v4798_v54  ;;  %v2306_v18 = vmul.f32 %v2300_v16, %v4803_v13 }
 0x9da   :  { %v2320_v50 = vrot.slane %v2296_v61, %v4184_v24  ;;  %v2307_v60 = vmul.f32 %v4795_v40, %v2300_v16  ;;  %v2308_v33 = vmul.f32 %v4801_v62, %v2300_v16  ;;  %v2309_v1 = vmul.f32 %v2300_v16, %v4810_v41 }
 0x9db   :  { %v2310_v7 = vmul.f32 %v2300_v16, %v4815_v36  ;;  %v2311_v45 = vmul.f32 %v4807_v42, %v2300_v16  ;;  %v2312_v29 = vmul.f32 %v4813_v58, %v2300_v16  ;;  %v2313_v35 = vmul.f32 %v2300_v16, %v4822_v3 }
 0x9dc   :  { %v2334_v59 = vadd.f32 %v2320_v50, %v2314_v26  ;;  %v2321_v54 = vadd.f32 %v2320_v50, %v2301_v17  ;;  %v2322_v56 = vadd.f32 %v2320_v50, %v2302_v38  ;;  %v2323_v13 = vadd.f32 %v2320_v50, %v2303_v28 }
 0x9dd   :  { %v2324_v48 = vadd.f32 %v2320_v50, %v2304_v49  ;;  %v2325_v6 = vadd.f32 %v2320_v50, %v2305_v51  ;;  %v2326_v10 = vadd.f32 %v2320_v50, %v2306_v18  ;;  %v2327_v40 = vadd.f32 %v2320_v50, %v2307_v60  ;;  %v5451_v60 = vld [vmem:[#allocation9_spill] sm:$0xff] }
 0x9de   :  { %v5441_v62 = vmax.f32 %v4584_v27, 0.0  ;;  %v5442_v41 = vmax.f32 %v4588_v23, 0.0  ;;  %v5443_v42 = vmax.f32 %v4592_v20, 0.0  ;;  %v2328_v3 = vadd.f32 %v2320_v50, %v2308_v33 }
 0x9df   :  { %v4884_v53 = vadd.f32 %v2324_v48, %v5444_v44  ;;  %v4888_v22 = vadd.f32 %v2325_v6, %v5445_v57  ;;  %v5446_v27 = vmax.f32 %v4604_v2, 0.0  ;;  %v5447_v2 = vmax.f32 %v4618_v52, 0.0 }
 0x9e0   :  { %v4872_v47 = vadd.f32 %v2321_v54, %v5441_v62  ;;  %v4876_v36 = vadd.f32 %v2322_v56, %v5442_v41  ;;  %v4880_v58 = vadd.f32 %v2323_v13, %v5443_v42  ;;  %v2329_v15 = vadd.f32 %v2320_v50, %v2309_v1  ;;  %v5463_v62 = vld [vmem:[#allocation12_spill] sm:$0xff] }
 0x9e1   :  { %v4892_v8 = vadd.f32 %v2326_v10, %v5446_v27  ;;  %v5370_v11 = vmax.f32 %v4884_v53, 0.0  ;;  %v5367_v25 = vmax.f32 %v4888_v22, 0.0  ;;  %v4906_v9 = vadd.f32 %v2327_v40, %v5447_v2 }
 0x9e2   :  { %v5371_v23 = vmax.f32 %v4872_v47, 0.0  ;;  %v5369_v34 = vmax.f32 %v4876_v36, 0.0  ;;  %v5372_v20 = vmax.f32 %v4880_v58, 0.0  ;;  %v2330_v39 = vadd.f32 %v2320_v50, %v2310_v7 }
 0x9e3   :  { %v5368_v14 = vmax.f32 %v4892_v8, 0.0  ;;  %v4914_v12 = vadd.f32 %v2328_v3, %v5448_v37  ;;  %v2331_v4 = vadd.f32 %v2320_v50, %v2311_v45  ;;  %v2332_v43 = vadd.f32 %v2320_v50, %v2312_v29  ;;  %v5457_v45 = vld [vmem:[#allocation11_spill] sm:$0xff]  ;;  %v3751_v37 = vld [vmem:[#allocation5 + $0xd8] sm:$0xff]  }
 0x9e4   :  { %v2369_v30 = vpack.c.bf16 %v5369_v34, %v5371_v23  ;;  %v2370_v32 = vpack.c.bf16 %v5370_v11, %v5372_v20  ;;  %v4922_v46 = vadd.f32 %v2329_v15, %v5449_v55  ;;  %v5450_v0 = vmax.f32 %v4638_v19, 0.0  ;;  %v3748_v15 = vld [vmem:[#allocation5 + $0xc0] sm:$0xff]  }
 0x9e5   :  { %v2371_v52 = vpack.c.bf16 %v5368_v14, %v5367_v25  ;;  %v2333_v26 = vadd.f32 %v2320_v50, %v2313_v35  ;;  %v2315_v31 = vmul.f32 %v4819_v5, %v2300_v16  ;;  %v2316_v17 = vmul.f32 %v4825_v63, %v2300_v16  ;;  %v5454_v63 = vld [vmem:[#allocation10_spill] sm:$0xff]  ;;  %3628 = vmatprep.subr.bf16.mxu0 %v3748_v15 }
 0x9e6   :  { %3612 = vmatprep.mubr.bf16.mxu0 %v2369_v30  ;;  %v4926_v61 = vadd.f32 %v2330_v39, %v5450_v0  ;;  %v5365_v38 = vmax.f32 %v4906_v9, 0.0  ;;  %v5366_v28 = vmax.f32 %v4914_v12, 0.0  ;;  %v5363_v21 = vmax.f32 %v4922_v46, 0.0  ;;  %v5460_v35 = vld [vmem:[#allocation14_spill] sm:$0xff]  ;;  %3660 = vmatprep.subr.bf16.mxu1 %v3748_v15  ;;  %v3755_v0 = vld [vmem:[#allocation5 + $0xf8] sm:$0xff]  }
 0x9e7   :  { %3613 = vmatmul.mubr.bf16.vlgmr.msra.gmra.mrb[64].mxu0 %v2370_v32  ;;  %v2335_v49 = vadd.f32 %v2320_v50, %v2315_v31  ;;  %v2336_v18 = vadd.f32 %v2320_v50, %v2316_v17  ;;  %v5452_v5 = vmax.f32 %v5451_v60, 0.0  ;;  %v5455_v16 = vmax.f32 %v5454_v63, 0.0  ;;  %3668 = vmatpush3.bf16.msra.mxu1 %v3748_v15  ;;  %v3749_v39 = vld [vmem:[#allocation5 + $0xc8] sm:$0xff]   ;;  %v3750_v32 = vld [vmem:[#allocation5 + $0xd0] sm:$0xff]  }
 0x9e8   :  { %3616 = vmatprep.mubr.bf16.mxu0 %v2371_v52  ;;  %v5364_v51 = vmax.f32 %v4926_v61, 0.0  ;;  %v2372_v19 = vpack.c.bf16 %v5366_v28, %v5365_v38  ;;  %v5458_v50 = vmax.f32 %v5457_v45, 0.0  ;;  %v5461_v54 = vmax.f32 %v5460_v35, 0.0  ;;  %3629 = vmatpush3.bf16.msra.mxu0 %v3748_v15  ;;  %v3754_v52 = vld [vmem:[#allocation5 + $0xf0] sm:$0xff]  }
 0x9e9   :  { %v4940_v33 = vadd.f32 %v2331_v4, %v5452_v5  ;;  %v4944_v1 = vadd.f32 %v2332_v43, %v5455_v16  ;;  %v5464_v41 = vmax.f32 %v5463_v62, 0.0  ;;  %3630 = vmatprep.subr.bf16.mxu0 %v3749_v39  ;;  %3661 = vmatprep.subr.bf16.mxu1 %v3749_v39  ;;  %v3752_v4 = vld [vmem:[#allocation5 + $0xe0] sm:$0xff]   ;;  %v3753_v43 = vld [vmem:[#allocation5 + $0xe8] sm:$0xff]  }
 0x9ea   :  { %v2373_v7 = vpack.c.bf16 %v5364_v51, %v5363_v21  ;;  %v4952_v29 = vadd.f32 %v2333_v26, %v5458_v50  ;;  %v4956_v56 = vadd.f32 %v2334_v59, %v5461_v54  ;;  %v5466_v59 = vld [vmem:[#allocation13_spill] sm:$0xff] }
 0x9eb   :  { %5453 = vst [vmem:[#allocation9_spill] sm:$0xff] %v4940_v33  ;;  %5456 = vst [vmem:[#allocation10_spill] sm:$0xff] %v4944_v1  ;;  %v5361_v13 = vmax.f32 %v4940_v33, 0.0  ;;  %v5362_v48 = vmax.f32 %v4944_v1, 0.0  ;;  %v4968_v42 = vadd.f32 %v2335_v49, %v5464_v41  ;;  %v5467_v3 = vmax.f32 %v5466_v59, 0.0  ;;  %3669 = vmatpush3.bf16.msra.mxu1 %v3749_v39 }
 0x9ec   :  { %5459 = vst [vmem:[#allocation11_spill] sm:$0xff] %v4952_v29  ;;  %5462 = vst [vmem:[#allocation14_spill] sm:$0xff] %v4956_v56  ;;  %v5359_v6 = vmax.f32 %v4952_v29, 0.0  ;;  %v5360_v10 = vmax.f32 %v4956_v56, 0.0  ;;  %3631 = vmatpush3.bf16.msra.mxu0 %v3749_v39  ;;  %3662 = vmatprep.subr.bf16.mxu1 %v3750_v32 }
 0x9ed   :  { %v2374_v40 = vpack.c.bf16 %v5362_v48, %v5361_v13  ;;  %5465 = vst [vmem:[#allocation12_spill] sm:$0xff] %v4968_v42  ;;  %v4972_v44 = vadd.f32 %v2336_v18, %v5467_v3  ;;  %v5357_v27 = vmax.f32 %v4968_v42, 0.0  ;;  %3632 = vmatprep.subr.bf16.mxu0 %v3750_v32 }
 0x9ee   :  { %v2375_v57 = vpack.c.bf16 %v5360_v10, %v5359_v6 }
 0x9ef   :  { %3617 = vmatmul.mubr.bf16.gmra.mrb[68].mxu0 %v2372_v19  ;;  %5468 = vst [vmem:[#allocation13_spill] sm:$0xff] %v4972_v44  ;;  %v5358_v30 = vmax.f32 %v4972_v44, 0.0  ;;  %3670 = vmatpush3.bf16.msra.mxu1 %v3750_v32 }
 0x9f0   :  { %3620 = vmatprep.mubr.bf16.mxu0 %v2373_v7  ;;  %3633 = vmatpush3.bf16.msra.mxu0 %v3750_v32 }
 0x9f1   :  { %v2376_v2 = vpack.c.bf16 %v5358_v30, %v5357_v27  ;;  %3634 = vmatprep.subr.bf16.mxu0 %v3751_v37  ;;  %3663 = vmatprep.subr.bf16.mxu1 %v3751_v37 }
 0x9f3   :  { %3671 = vmatpush3.bf16.msra.mxu1 %v3751_v37 }
 0x9f4   :  { %3635 = vmatpush3.bf16.msra.mxu0 %v3751_v37  ;;  %3664 = vmatprep.subr.bf16.mxu1 %v3752_v4 }
 0x9f5   :  { %3636 = vmatprep.subr.bf16.mxu0 %v3752_v4 }
 0x9f7   :  { %3621 = vmatmul.mubr.bf16.gmra.mrb[72].mxu0 %v2374_v40  ;;  %3672 = vmatpush3.bf16.msra.mxu1 %v3752_v4 }
 0x9f8   :  { %3624 = vmatprep.mubr.bf16.mxu0 %v2375_v57  ;;  %3637 = vmatpush3.bf16.msra.mxu0 %v3752_v4 }
 0x9f9   :  { %3638 = vmatprep.subr.bf16.mxu0 %v3753_v43  ;;  %3665 = vmatprep.subr.bf16.mxu1 %v3753_v43 }
 0x9fb   :  { %3673 = vmatpush3.bf16.msra.mxu1 %v3753_v43 }
 0x9fc   :  { %3639 = vmatpush3.bf16.msra.mxu0 %v3753_v43  ;;  %3666 = vmatprep.subr.bf16.mxu1 %v3754_v52 }
 0x9fd   :  { %3640 = vmatprep.subr.bf16.mxu0 %v3754_v52 }
 0x9ff   :  { %3625 = vmatmul.mubr.bf16.gmra.mrb[76].mxu0 %v2376_v2  ;;  %3674 = vmatpush3.bf16.msra.mxu1 %v3754_v52 }
 0xa00   :  { %3641 = vmatpush3.bf16.msra.mxu0 %v3754_v52  ;;  %3667 = vmatprep.subr.bf16.mxu1 %v3755_v0 }
 0xa01   :  { %3642 = vmatprep.subr.bf16.mxu0 %v3755_v0 }
 0xa03   :  { %3675 = vmatpush3.bf16.msra.mxu1 %v3755_v0 }
 0xa04   :  { %3643 = vmatpush3.bf16.msra.mxu0 %v3755_v0 }
 0xaba   :  { %v4984_v55 = vpop.f32.mrb[64].mxu0 }
 0xabb   :  { %v4986_v26 = vpop.f32.mrb[65].mxu0 }
 0xabc   :  { %v4988_v31 = vpop.f32.mrb[66].mxu0 }
 0xabd   :  { %v4990_v17 = vpop.f32.mrb[67].mxu0 }
 0xabe   :  { %v2541_v49 = vadd.f32 %v4990_v17, %v4986_v26 }
 0xac0   :  { %v2542_v18 = vadd.f32 %v4984_v55, %v2541_v49 }
 0xac2   :  { %v4995_v19 = vpop.f32.mrb[68].mxu0  ;;  %v2543_v60 = vadd.f32 %v4988_v31, %v2542_v18 }
 0xac3   :  { %v4998_v5 = vpop.f32.mrb[69].mxu0 }
 0xac4   :  { %v2544_v63 = vadd.f32 %v2543_v60, %v4998_v5  ;;  %v5001_v16 = vpop.f32.mrb[70].mxu0 }
 0xac5   :  { %v5003_v7 = vpop.f32.mrb[71].mxu0 }
 0xac6   :  { %v2545_v45 = vadd.f32 %v2544_v63, %v5003_v7 }
 0xac8   :  { %v2546_v50 = vadd.f32 %v4995_v19, %v2545_v45 }
 0xaca   :  { %v5007_v35 = vpop.f32.mrb[72].mxu0  ;;  %v2547_v54 = vadd.f32 %v5001_v16, %v2546_v50 }
 0xacb   :  { %v5010_v40 = vpop.f32.mrb[73].mxu0 }
 0xacc   :  { %v2548_v62 = vadd.f32 %v2547_v54, %v5010_v40  ;;  %v5013_v41 = vpop.f32.mrb[74].mxu0 }
 0xacd   :  { %v5015_v59 = vpop.f32.mrb[75].mxu0 }
 0xace   :  { %v2549_v3 = vadd.f32 %v2548_v62, %v5015_v59 }
 0xad0   :  { %v2550_v57 = vadd.f32 %v5007_v35, %v2549_v3 }
 0xad2   :  { %v5019_v2 = vpop.f32.mrb[76].mxu0  ;;  %v2551_v15 = vadd.f32 %v5013_v41, %v2550_v57 }
 0xad3   :  { %v5022_v39 = vpop.f32.mrb[77].mxu0 }
 0xad4   :  { %v2552_v32 = vadd.f32 %v2551_v15, %v5022_v39  ;;  %v5025_v37 = vpop.f32.mrb[78].mxu0 }
 0xad5   :  { %v5027_v4 = vpop.f32.mrb[79].mxu0 }
 0xad6   :  { %v2553_v43 = vadd.f32 %v2552_v32, %v5027_v4 }
 0xad8   :  { %v2554_v52 = vadd.f32 %v5019_v2, %v2553_v43 }
 0xada   :  { %v2555_v0 = vadd.f32 %v5025_v37, %v2554_v52 }
 0xadc   :  { %v2556_v49 = vrot.slane %v2555_v0, 4 }
 0xade   :  { %v2557_v18 = vadd.f32 %v2556_v49, %v2555_v0 }
 0xae0   :  { %v2558_v60 = vrot.slane %v2557_v18, 2 }
 0xae2   :  { %v2559_v63 = vadd.f32 %v2558_v60, %v2557_v18 }
 0xae4   :  { %v2560_v45 = vrot.slane %v2559_v63, 1 }
 0xae6   :  { %v2561_v50 = vadd.f32 %v2560_v45, %v2559_v63 }
 0xae8   :  { %v2562_v54 = vmul.f32 0.0078125, %v2561_v50 }
 0xaea   :  { %v2563_v62 = vsub.f32 %v4986_v26, %v2562_v54  ;;  %v2564_v3 = vsub.f32 %v4990_v17, %v2562_v54  ;;  %v2565_v57 = vsub.f32 %v4984_v55, %v2562_v54  ;;  %v2566_v15 = vsub.f32 %v4988_v31, %v2562_v54 }
 0xaeb   :  { %v2567_v32 = vsub.f32 %v4998_v5, %v2562_v54  ;;  %v2568_v43 = vsub.f32 %v5003_v7, %v2562_v54  ;;  %v2569_v52 = vsub.f32 %v4995_v19, %v2562_v54  ;;  %v2570_v0 = vsub.f32 %v5001_v16, %v2562_v54 }
 0xaec   :  { %v2571_v49 = vsub.f32 %v5010_v40, %v2562_v54  ;;  %v2572_v18 = vsub.f32 %v5015_v59, %v2562_v54  ;;  %v2573_v60 = vsub.f32 %v5007_v35, %v2562_v54  ;;  %v2574_v63 = vsub.f32 %v5013_v41, %v2562_v54 }
 0xaed   :  { %v2575_v45 = vsub.f32 %v5022_v39, %v2562_v54  ;;  %v2576_v50 = vsub.f32 %v5027_v4, %v2562_v54  ;;  %v2577_v27 = vsub.f32 %v5019_v2, %v2562_v54  ;;  %v2578_v30 = vsub.f32 %v5025_v37, %v2562_v54 }
 0xaee   :  { %v2579_v6 = vmul.f32 %v2563_v62, %v2563_v62  ;;  %v2580_v10 = vmul.f32 %v2564_v3, %v2564_v3  ;;  %v2581_v13 = vmul.f32 %v2565_v57, %v2565_v57  ;;  %v2582_v21 = vmul.f32 %v2566_v15, %v2566_v15 }
 0xaef   :  { %v2583_v38 = vmul.f32 %v2567_v32, %v2567_v32  ;;  %v2584_v25 = vmul.f32 %v2568_v43, %v2568_v43  ;;  %v2585_v34 = vmul.f32 %v2569_v52, %v2569_v52  ;;  %v2586_v23 = vmul.f32 %v2570_v0, %v2570_v0 }
 0xaf0   :  { %v2595_v48 = vadd.f32 %v2580_v10, %v2579_v6  ;;  %v2587_v42 = vmul.f32 %v2571_v49, %v2571_v49  ;;  %v2588_v29 = vmul.f32 %v2572_v18, %v2572_v18  ;;  %v2589_v33 = vmul.f32 %v2573_v60, %v2573_v60 }
 0xaf1   :  { %v2590_v62 = vmul.f32 %v2574_v63, %v2574_v63  ;;  %v2591_v57 = vmul.f32 %v2575_v45, %v2575_v45  ;;  %v2592_v10 = vmul.f32 %v2576_v50, %v2576_v50 }
 0xaf2   :  { %v2596_v51 = vadd.f32 %v2595_v48, %v2581_v13  ;;  %v2593_v48 = vmul.f32 %v2577_v27, %v2577_v27 }
 0xaf4   :  { %v2597_v28 = vadd.f32 %v2596_v51, %v2582_v21  ;;  %v2594_v51 = vmul.f32 %v2578_v30, %v2578_v30 }
 0xaf6   :  { %v2598_v14 = vadd.f32 %v2597_v28, %v2583_v38 }
 0xaf8   :  { %v2599_v11 = vadd.f32 %v2598_v14, %v2584_v25 }
 0xafa   :  { %v2600_v20 = vadd.f32 %v2599_v11, %v2585_v34 }
 0xafc   :  { %v2601_v44 = vadd.f32 %v2600_v20, %v2586_v23 }
 0xafe   :  { %v2602_v56 = vadd.f32 %v2601_v44, %v2587_v42 }
 0xb00   :  { %v2603_v1 = vadd.f32 %v2602_v56, %v2588_v29  ;;  %v2540_v56 = vld [vmem:[%s5284_s7 + $0x3] sm:$0x1] }
 0xb02   :  { %v2604_v3 = vadd.f32 %v2603_v1, %v2589_v33  ;;  %v2539_v33 = vld [vmem:[%s5283_s6 + $0x3] sm:$0x1] }
 0xb04   :  { %v2605_v6 = vadd.f32 %v2604_v3, %v2590_v62 }
 0xb06   :  { %v2606_v13 = vadd.f32 %v2605_v6, %v2591_v57 }
 0xb08   :  { %v2607_v21 = vadd.f32 %v2606_v13, %v2592_v10 }
 0xb0a   :  { %v2608_v38 = vadd.f32 %v2607_v21, %v2593_v48 }
 0xb0c   :  { %v2609_v28 = vadd.f32 %v2608_v38, %v2594_v51 }
 0xb0e   :  { %v2610_v25 = vrot.slane %v2609_v28, 4 }
 0xb10   :  { %v2611_v14 = vadd.f32 %v2610_v25, %v2609_v28 }
 0xb12   :  { %v2612_v34 = vrot.slane %v2611_v14, 2 }
 0xb14   :  { %v2613_v11 = vadd.f32 %v2612_v34, %v2611_v14 }
 0xb16   :  { %v2614_v23 = vrot.slane %v2613_v11, 1 }
 0xb18   :  { %v2615_v20 = vadd.f32 %v2614_v23, %v2613_v11 }
 0xb1a   :  { %v2616_v42 = vmul.f32 0.0078125, %v2615_v20 }
 0xb1c   :  { %v2617_v44 = vadd.f32 1e-05, %v2616_v42 }
 0xb1e   :  { %3768 = vrsqrt.f32 %v2617_v44 }
 0xb28   :  { %v3769_v1 = vpop.eup %3768 }
 0xb29   :  { %v2619_v29 = vmul.f32 %v3769_v1, %v2539_v33 }
 0xb2b   :  { %v2620_v27 = vmul.f32 %v2619_v29, %v2562_v54  ;;  %v2625_v30 = vrot.slane %v2619_v29, %v4184_v24 }
 0xb2d   :  { %v2621_v15 = vsub.f32 %v2540_v56, %v2620_v27  ;;  %v2639_v32 = vmul.f32 %v2625_v30, %v5027_v4  ;;  %v2626_v43 = vmul.f32 %v2625_v30, %v4986_v26  ;;  %v2627_v52 = vmul.f32 %v2625_v30, %v4990_v17 }
 0xb2e   :  { %v2630_v0 = vmul.f32 %v2625_v30, %v4998_v5  ;;  %v2631_v49 = vmul.f32 %v2625_v30, %v5003_v7  ;;  %v2628_v18 = vmul.f32 %v4984_v55, %v2625_v30  ;;  %v2629_v60 = vmul.f32 %v4988_v31, %v2625_v30 }
 0xb2f   :  { %v2645_v63 = vrot.slane %v2621_v15, %v4184_v24  ;;  %v2632_v54 = vmul.f32 %v4995_v19, %v2625_v30  ;;  %v2633_v45 = vmul.f32 %v5001_v16, %v2625_v30  ;;  %v2634_v4 = vmul.f32 %v2625_v30, %v5010_v40 }
 0xb30   :  { %v2635_v26 = vmul.f32 %v2625_v30, %v5015_v59  ;;  %v2636_v17 = vmul.f32 %v5007_v35, %v2625_v30  ;;  %v2637_v5 = vmul.f32 %v5013_v41, %v2625_v30  ;;  %v2638_v7 = vmul.f32 %v2625_v30, %v5022_v39 }
 0xb31   :  { %v2659_v50 = vadd.f32 %v2645_v63, %v2639_v32  ;;  %v2646_v55 = vadd.f32 %v2645_v63, %v2626_v43  ;;  %v2647_v62 = vadd.f32 %v2645_v63, %v2627_v52  ;;  %v2650_v31 = vadd.f32 %v2645_v63, %v2630_v0 }
 0xb32   :  { %v2651_v3 = vadd.f32 %v2645_v63, %v2631_v49  ;;  %v2648_v57 = vadd.f32 %v2645_v63, %v2628_v18  ;;  %v2649_v6 = vadd.f32 %v2645_v63, %v2629_v60  ;;  %v2652_v19 = vadd.f32 %v2645_v63, %v2632_v54 }
 0xb33   :  { %v2662_v10 = vmax.f32 %v2646_v55, 0.0  ;;  %v2663_v16 = vmax.f32 %v2647_v62, 0.0  ;;  %v2666_v13 = vmax.f32 %v2650_v31, 0.0  ;;  %v2653_v40 = vadd.f32 %v2645_v63, %v2633_v45 }
 0xb34   :  { %v2667_v48 = vmax.f32 %v2651_v3, 0.0  ;;  %v2664_v59 = vmax.f32 %v2648_v57, 0.0  ;;  %v2665_v21 = vmax.f32 %v2649_v6, 0.0  ;;  %v2668_v35 = vmax.f32 %v2652_v19, 0.0 }
 0xb35   :  { %v2678_v51 = vpack.c.bf16 %v2663_v16, %v2662_v10  ;;  %v2669_v41 = vmax.f32 %v2653_v40, 0.0  ;;  %v2654_v38 = vadd.f32 %v2645_v63, %v2634_v4  ;;  %v2655_v39 = vadd.f32 %v2645_v63, %v2635_v26 }
 0xb36   :  { %v2680_v28 = vpack.c.bf16 %v2667_v48, %v2666_v13  ;;  %v2679_v25 = vpack.c.bf16 %v2665_v21, %v2664_v59  ;;  %v2656_v14 = vadd.f32 %v2645_v63, %v2636_v17  ;;  %v2657_v34 = vadd.f32 %v2645_v63, %v2637_v5 }
 0xb37   :  { %3644 = vmatprep.mubr.bf16.mxu0 %v2678_v51  ;;  %v2681_v11 = vpack.c.bf16 %v2669_v41, %v2668_v35  ;;  %v2670_v23 = vmax.f32 %v2654_v38, 0.0  ;;  %v2671_v20 = vmax.f32 %v2655_v39, 0.0  ;;  %v2658_v42 = vadd.f32 %v2645_v63, %v2638_v7 }
 0xb38   :  { %3648 = vmatprep.mubr.bf16.mxu1 %v2680_v28  ;;  %3645 = vmatmul.mubr.bf16.vlgmr.msra.gmra.mrb[80].mxu0 %v2679_v25  ;;  %v2672_v44 = vmax.f32 %v2656_v14, 0.0  ;;  %v2673_v33 = vmax.f32 %v2657_v34, 0.0  ;;  %v2675_v1 = vmax.f32 %v2659_v50, 0.0  ;;  %v2640_v29 = vmul.f32 %v5019_v2, %v2625_v30 }
 0xb39   :  { %3649 = vmatmul.mubr.bf16.vlgmr.msra.gmra.mrb[64].mxu1 %v2681_v11  ;;  %v2682_v56 = vpack.c.bf16 %v2671_v20, %v2670_v23  ;;  %v2674_v27 = vmax.f32 %v2658_v42, 0.0  ;;  %v2641_v15 = vmul.f32 %v5025_v37, %v2625_v30 }
 0xb3a   :  { %v2683_v32 = vpack.c.bf16 %v2673_v33, %v2672_v44  ;;  %v2660_v43 = vadd.f32 %v2645_v63, %v2640_v29 }
 0xb3b   :  { %3652 = vmatprep.mubr.bf16.mxu1 %v2682_v56  ;;  %v2684_v52 = vpack.c.bf16 %v2675_v1, %v2674_v27  ;;  %v2661_v0 = vadd.f32 %v2645_v63, %v2641_v15 }
 0xb3c   :  { %v2676_v49 = vmax.f32 %v2660_v43, 0.0 }
 0xb3d   :  { %v2677_v18 = vmax.f32 %v2661_v0, 0.0 }
 0xb3f   :  { %v2685_v60 = vpack.c.bf16 %v2677_v18, %v2676_v49 }
 0xb41   :  { %3653 = vmatmul.mubr.bf16.gmra.mrb[68].mxu1 %v2683_v32 }
 0xb42   :  { %3656 = vmatprep.mubr.bf16.mxu1 %v2684_v52 }
 0xb49   :  { %3657 = vmatmul.mubr.bf16.gmra.mrb[72].mxu1 %v2685_v60 }
 0xc0b   :  { %v5072_v54 = vpop.f32.mrb[80].mxu0 }
 0xc0c   :  { %v5074_v45 = vpop.f32.mrb[64].mxu1  ;;  %v5076_v2 = vpop.f32.mrb[81].mxu0 }
 0xc0d   :  { %v5078_v4 = vpop.f32.mrb[65].mxu1  ;;  %v5080_v37 = vpop.f32.mrb[82].mxu0 }
 0xc0e   :  { %v5082_v30 = vpop.f32.mrb[66].mxu1  ;;  %v5084_v26 = vpop.f32.mrb[83].mxu0 }
 0xc0f   :  { %v2850_v63 = vadd.f32 %v5084_v26, %v5076_v2  ;;  %v5088_v17 = vpop.f32.mrb[67].mxu1 }
 0xc11   :  { %v2851_v5 = vadd.f32 %v5072_v54, %v2850_v63 }
 0xc13   :  { %v2852_v7 = vadd.f32 %v5080_v37, %v2851_v5 }
 0xc14   :  { %v5092_v50 = vpop.f32.mrb[68].mxu1 }
 0xc15   :  { %v2853_v55 = vadd.f32 %v2852_v7, %v5078_v4  ;;  %v5095_v62 = vpop.f32.mrb[69].mxu1 }
 0xc16   :  { %v5097_v31 = vpop.f32.mrb[70].mxu1 }
 0xc17   :  { %v2854_v3 = vadd.f32 %v2853_v55, %v5088_v17  ;;  %v5100_v57 = vpop.f32.mrb[71].mxu1 }
 0xc19   :  { %v2855_v6 = vadd.f32 %v5074_v45, %v2854_v3 }
 0xc1b   :  { %v2856_v19 = vadd.f32 %v5082_v30, %v2855_v6 }
 0xc1c   :  { %v5104_v10 = vpop.f32.mrb[72].mxu1 }
 0xc1d   :  { %v2857_v16 = vadd.f32 %v2856_v19, %v5095_v62  ;;  %v5107_v13 = vpop.f32.mrb[73].mxu1 }
 0xc1e   :  { %v5109_v40 = vpop.f32.mrb[74].mxu1 }
 0xc1f   :  { %v2858_v48 = vadd.f32 %v2857_v16, %v5100_v57  ;;  %v5112_v59 = vpop.f32.mrb[75].mxu1 }
 0xc21   :  { %v2859_v21 = vadd.f32 %v5092_v50, %v2858_v48 }
 0xc23   :  { %v2860_v35 = vadd.f32 %v5097_v31, %v2859_v21 }
 0xc25   :  { %v2861_v51 = vadd.f32 %v2860_v35, %v5107_v13 }
 0xc27   :  { %v2862_v41 = vadd.f32 %v2861_v51, %v5112_v59 }
 0xc29   :  { %v2863_v38 = vadd.f32 %v5104_v10, %v2862_v41 }
 0xc2b   :  { %v2864_v39 = vadd.f32 %v5109_v40, %v2863_v38 }
 0xc2d   :  { %v2865_v28 = vrot.slane %v2864_v39, 4 }
 0xc2f   :  { %v2866_v25 = vadd.f32 %v2865_v28, %v2864_v39 }
 0xc31   :  { %v2867_v14 = vrot.slane %v2866_v25, 2 }
 0xc33   :  { %v2868_v34 = vadd.f32 %v2867_v14, %v2866_v25 }
 0xc35   :  { %v2869_v11 = vrot.slane %v2868_v34, 1 }
 0xc37   :  { %v2870_v23 = vadd.f32 %v2869_v11, %v2868_v34 }
 0xc39   :  { %v2871_v20 = vmul.f32 0.0078125, %v2870_v23 }
 0xc3b   :  { %v2872_v42 = vsub.f32 %v5076_v2, %v2871_v20  ;;  %v2873_v44 = vsub.f32 %v5084_v26, %v2871_v20  ;;  %v2874_v33 = vsub.f32 %v5072_v54, %v2871_v20  ;;  %v2875_v1 = vsub.f32 %v5080_v37, %v2871_v20 }
 0xc3c   :  { %v2876_v29 = vsub.f32 %v5078_v4, %v2871_v20  ;;  %v2877_v56 = vsub.f32 %v5088_v17, %v2871_v20  ;;  %v2878_v27 = vsub.f32 %v5074_v45, %v2871_v20  ;;  %v2879_v15 = vsub.f32 %v5082_v30, %v2871_v20 }
 0xc3d   :  { %v2880_v32 = vsub.f32 %v5095_v62, %v2871_v20  ;;  %v2881_v43 = vsub.f32 %v5100_v57, %v2871_v20  ;;  %v2882_v52 = vsub.f32 %v5092_v50, %v2871_v20  ;;  %v2883_v0 = vsub.f32 %v5097_v31, %v2871_v20 }
 0xc3e   :  { %v2884_v49 = vsub.f32 %v5107_v13, %v2871_v20  ;;  %v2885_v18 = vsub.f32 %v5112_v59, %v2871_v20  ;;  %v2886_v60 = vsub.f32 %v5104_v10, %v2871_v20  ;;  %v2887_v63 = vsub.f32 %v5109_v40, %v2871_v20 }
 0xc3f   :  { %v2888_v5 = vmul.f32 %v2872_v42, %v2872_v42  ;;  %v2889_v7 = vmul.f32 %v2873_v44, %v2873_v44  ;;  %v2890_v55 = vmul.f32 %v2874_v33, %v2874_v33  ;;  %v2891_v6 = vmul.f32 %v2875_v1, %v2875_v1 }
 0xc40   :  { %v2892_v16 = vmul.f32 %v2876_v29, %v2876_v29  ;;  %v2893_v21 = vmul.f32 %v2877_v56, %v2877_v56  ;;  %v2894_v51 = vmul.f32 %v2878_v27, %v2878_v27  ;;  %v2895_v38 = vmul.f32 %v2879_v15, %v2879_v15 }
 0xc41   :  { %v2904_v3 = vadd.f32 %v2889_v7, %v2888_v5  ;;  %v2896_v28 = vmul.f32 %v2880_v32, %v2880_v32  ;;  %v2897_v14 = vmul.f32 %v2881_v43, %v2881_v43  ;;  %v2898_v11 = vmul.f32 %v2882_v52, %v2882_v52 }
 0xc42   :  { %v2899_v42 = vmul.f32 %v2883_v0, %v2883_v0  ;;  %v2900_v33 = vmul.f32 %v2884_v49, %v2884_v49  ;;  %v2901_v1 = vmul.f32 %v2885_v18, %v2885_v18  ;;  %v2902_v29 = vmul.f32 %v2886_v60, %v2886_v60  ;;  %v2848_v0 = vld [vmem:[%s5286_s9 + $0x3] sm:$0x1] }
 0xc43   :  { %v2905_v19 = vadd.f32 %v2904_v3, %v2890_v55  ;;  %v2903_v56 = vmul.f32 %v2887_v63, %v2887_v63  ;;  %v2849_v60 = vld [vmem:[%s5287_s10 + $0x3] sm:$0x1] }
 0xc45   :  { %v2906_v48 = vadd.f32 %v2905_v19, %v2891_v6 }
 0xc47   :  { %v2907_v35 = vadd.f32 %v2906_v48, %v2892_v16 }
 0xc49   :  { %v2908_v41 = vadd.f32 %v2907_v35, %v2893_v21 }
 0xc4b   :  { %v2909_v39 = vadd.f32 %v2908_v41, %v2894_v51 }
 0xc4d   :  { %v2910_v25 = vadd.f32 %v2909_v39, %v2895_v38 }
 0xc4f   :  { %v2911_v34 = vadd.f32 %v2910_v25, %v2896_v28 }
 0xc51   :  { %v2912_v23 = vadd.f32 %v2911_v34, %v2897_v14 }
 0xc53   :  { %v2913_v44 = vadd.f32 %v2912_v23, %v2898_v11 }
 0xc55   :  { %v2914_v5 = vadd.f32 %v2913_v44, %v2899_v42 }
 0xc57   :  { %v2915_v7 = vadd.f32 %v2914_v5, %v2900_v33 }
 0xc59   :  { %v2916_v55 = vadd.f32 %v2915_v7, %v2901_v1  ;;  %v5472_v7 = vmax.f32 %v4876_v36, 0.0 }
 0xc5b   :  { %v2917_v3 = vadd.f32 %v2916_v55, %v2902_v29 }
 0xc5d   :  { %v2918_v27 = vadd.f32 %v2917_v3, %v2903_v56 }
 0xc5f   :  { %v2919_v6 = vrot.slane %v2918_v27, 4 }
 0xc61   :  { %v2920_v15 = vadd.f32 %v2919_v6, %v2918_v27 }
 0xc63   :  { %v2921_v19 = vrot.slane %v2920_v15, 2 }
 0xc65   :  { %v2922_v32 = vadd.f32 %v2921_v19, %v2920_v15 }
 0xc67   :  { %v2923_v16 = vrot.slane %v2922_v32, 1 }
 0xc69   :  { %v2924_v43 = vadd.f32 %v2923_v16, %v2922_v32  ;;  %v5475_v32 = vmax.f32 %v4914_v12, 0.0 }
 0xc6b   :  { %v2925_v48 = vmul.f32 0.0078125, %v2924_v43  ;;  %v5476_v43 = vmax.f32 %v4906_v9, 0.0 }
 0xc6d   :  { %v2926_v52 = vadd.f32 1e-05, %v2925_v48 }
 0xc6f   :  { %3770 = vrsqrt.f32 %v2926_v52 }
 0xc79   :  { %v3771_v49 = vpop.eup %3770 }
 0xc7a   :  { %v2928_v18 = vmul.f32 %v3771_v49, %v2848_v0 }
 0xc7c   :  { %v2929_v63 = vmul.f32 %v2928_v18, %v2871_v20  ;;  %v2934_v21 = vrot.slane %v2928_v18, %v4184_v24 }
 0xc7e   :  { %v2930_v35 = vsub.f32 %v2849_v60, %v2929_v63  ;;  %v2948_v51 = vmul.f32 %v2934_v21, %v5112_v59  ;;  %v2937_v41 = vmul.f32 %v5072_v54, %v2934_v21  ;;  %v2935_v38 = vmul.f32 %v2934_v21, %v5076_v2 }
 0xc7f   :  { %v2938_v39 = vmul.f32 %v5080_v37, %v2934_v21  ;;  %v2936_v28 = vmul.f32 %v2934_v21, %v5084_v26  ;;  %v2940_v25 = vmul.f32 %v2934_v21, %v5088_v17  ;;  %v2939_v14 = vmul.f32 %v2934_v21, %v5078_v4 }
 0xc80   :  { %v2954_v34 = vrot.slane %v2930_v35, %v4184_v24  ;;  %v2942_v20 = vmul.f32 %v5082_v30, %v2934_v21  ;;  %v2941_v11 = vmul.f32 %v5074_v45, %v2934_v21  ;;  %v2944_v59 = vmul.f32 %v2934_v21, %v5100_v57 }
 0xc81   :  { %v2943_v54 = vmul.f32 %v2934_v21, %v5095_v62  ;;  %v2946_v2 = vmul.f32 %v5097_v31, %v2934_v21  ;;  %v2945_v37 = vmul.f32 %v5092_v50, %v2934_v21  ;;  %v2947_v26 = vmul.f32 %v2934_v21, %v5107_v13  ;;  %v5167_v13 = vld [vmem:[%s5288_s11] ss:$0 sm:$0xff] }
 0xc82   :  { %v2968_v23 = vadd.f32 %v2954_v34, %v2948_v51  ;;  %v2957_v17 = vadd.f32 %v2954_v34, %v2937_v41  ;;  %v2955_v42 = vadd.f32 %v2954_v34, %v2935_v38  ;;  %v2958_v4 = vadd.f32 %v2954_v34, %v2938_v39 }
 0xc83   :  { %v2956_v44 = vadd.f32 %v2954_v34, %v2936_v28  ;;  %v2960_v24 = vadd.f32 %v2954_v34, %v2940_v25  ;;  %v2959_v33 = vadd.f32 %v2954_v34, %v2939_v14  ;;  %v2962_v30 = vadd.f32 %v2954_v34, %v2942_v20 }
 0xc84   :  { %v5469_v45 = vmax.f32 %v4880_v58, 0.0  ;;  %v5470_v57 = vmax.f32 %v4872_v47, 0.0  ;;  %v5471_v31 = vmax.f32 %v4884_v53, 0.0  ;;  %v2961_v50 = vadd.f32 %v2954_v34, %v2941_v11 }
 0xc85   :  { %v2972_v29 = vadd.f32 %v2956_v44, %v5472_v7  ;;  %v5473_v58 = vmax.f32 %v4892_v8, 0.0  ;;  %v5474_v47 = vmax.f32 %v4888_v22, 0.0  ;;  %v2978_v16 = vadd.f32 %v2962_v30, %v5475_v32 }
 0xc86   :  { %v2973_v5 = vadd.f32 %v2957_v17, %v5469_v45  ;;  %v2971_v62 = vadd.f32 %v2955_v42, %v5470_v57  ;;  %v2974_v1 = vadd.f32 %v2958_v4, %v5471_v31  ;;  %v2977_v48 = vadd.f32 %v2961_v50, %v5476_v43  ;;  %v5485_v4 = vld [vmem:[#allocation11_spill] sm:$0xff]  ;;  %v5487_v50 = vld [vmem:[#allocation13_spill] sm:$0xff] }
 0xc87   :  { %v2976_v3 = vadd.f32 %v2960_v24, %v5473_v58  ;;  %v2975_v27 = vadd.f32 %v2959_v33, %v5474_v47  ;;  %v2988_v19 = vmax.f32 %v2972_v29, 0.0  ;;  %v2964_v8 = vadd.f32 %v2954_v34, %v2944_v59  ;;  %v5479_v59 = vld [vmem:[#allocation10_spill] sm:$0xff]  ;;  %v5489_v29 = vld [vmem:[#allocation12_spill] sm:$0xff] }
 0xc88   :  { %v2989_v55 = vmax.f32 %v2973_v5, 0.0  ;;  %v2987_v56 = vmax.f32 %v2971_v62, 0.0  ;;  %v2990_v15 = vmax.f32 %v2974_v1, 0.0  ;;  %v2963_v52 = vadd.f32 %v2954_v34, %v2943_v54 }
 0xc89   :  { %v2992_v36 = vmax.f32 %v2976_v3, 0.0  ;;  %v2991_v0 = vmax.f32 %v2975_v27, 0.0  ;;  %v2966_v22 = vadd.f32 %v2954_v34, %v2946_v2  ;;  %v2965_v49 = vadd.f32 %v2954_v34, %v2945_v37  ;;  %v5481_v37 = vld [vmem:[#allocation9_spill] sm:$0xff] }
 0xc8a   :  { %v3012_v53 = vmul.f32 %v5167_v13, %v2989_v55  ;;  %v3010_v6 = vmul.f32 %v5167_v13, %v2987_v56  ;;  %v2967_v18 = vadd.f32 %v2954_v34, %v2947_v26  ;;  %v3013_v60 = vmul.f32 %v5167_v13, %v2990_v15  ;;  %v3191_v15 = vld [vmem:[#allocation2] ss:$0 sm:$0xff] }
 0xc8b   :  { %v3011_v63 = vmul.f32 %v5167_v13, %v2988_v19  ;;  %v2950_v35 = vmul.f32 %v5109_v40, %v2934_v21  ;;  %v2949_v12 = vmul.f32 %v5104_v10, %v2934_v21  ;;  %v2994_v9 = vmax.f32 %v2978_v16, 0.0 }
 0xc8c   :  { %3030 = vadd.xlane.f32.xlu1 %v3012_v53  ;;  %3026 = vadd.xlane.f32.xlu0 %v3010_v6  ;;  %v2993_v38 = vmax.f32 %v2977_v48, 0.0  ;;  %v3015_v39 = vmul.f32 %v5167_v13, %v2992_v36  ;;  %v3014_v28 = vmul.f32 %v5167_v13, %v2991_v0  ;;  %v5477_v25 = vmax.f32 %v4926_v61, 0.0  ;;  %v5483_v61 = vld [vmem:[#allocation14_spill] sm:$0xff] }
 0xc8d   :  { %v2970_v51 = vadd.f32 %v2954_v34, %v2950_v35  ;;  %v2969_v41 = vadd.f32 %v2954_v34, %v2949_v12  ;;  %v5478_v20 = vmax.f32 %v4922_v46, 0.0  ;;  %v3017_v10 = vmul.f32 %v5167_v13, %v2994_v9 }
 0xc8e   :  { %v2980_v14 = vadd.f32 %v2964_v8, %v5477_v25  ;;  %v3016_v40 = vmul.f32 %v5167_v13, %v2993_v38  ;;  %v5480_v54 = vmax.f32 %v5479_v59, 0.0  ;;  %v5482_v26 = vmax.f32 %v5481_v37, 0.0 }
 0xc8f   :  { %v2979_v11 = vadd.f32 %v2963_v52, %v5478_v20  ;;  %v5484_v42 = vmax.f32 %v5483_v61, 0.0  ;;  %v5486_v44 = vmax.f32 %v5485_v4, 0.0  ;;  %v5488_v7 = vmax.f32 %v5487_v50, 0.0 }
 0xc90   :  { %3032 = vadd.xlane.f32.xlu1 %v3013_v60  ;;  %3028 = vadd.xlane.f32.xlu0 %v3011_v63  ;;  %v2996_v21 = vmax.f32 %v2980_v14, 0.0  ;;  %v2982_v2 = vadd.f32 %v2966_v22, %v5480_v54  ;;  %v2981_v17 = vadd.f32 %v2965_v49, %v5482_v26  ;;  %v5490_v55 = vmax.f32 %v5489_v29, 0.0 }
 0xc91   :  { %v2995_v34 = vmax.f32 %v2979_v11, 0.0  ;;  %v2984_v46 = vadd.f32 %v2968_v23, %v5484_v42  ;;  %v2983_v24 = vadd.f32 %v2967_v18, %v5486_v44  ;;  %v2986_v23 = vadd.f32 %v2970_v51, %v5488_v7 }
 0xc92   :  { %v3019_v33 = vmul.f32 %v5167_v13, %v2996_v21  ;;  %v2998_v45 = vmax.f32 %v2982_v2, 0.0  ;;  %v2997_v5 = vmax.f32 %v2981_v17, 0.0  ;;  %v2985_v56 = vadd.f32 %v2969_v41, %v5490_v55 }
 0xc93   :  { %v3018_v30 = vmul.f32 %v5167_v13, %v2995_v34  ;;  %v3000_v57 = vmax.f32 %v2984_v46, 0.0  ;;  %v2999_v62 = vmax.f32 %v2983_v24, 0.0  ;;  %v3002_v47 = vmax.f32 %v2986_v23, 0.0 }
 0xc94   :  { %3036 = vadd.xlane.f32.xlu1 %v3015_v39  ;;  %3034 = vadd.xlane.f32.xlu0 %v3014_v28  ;;  %v3021_v31 = vmul.f32 %v5167_v13, %v2998_v45  ;;  %v3020_v1 = vmul.f32 %v5167_v13, %v2997_v5  ;;  %v3001_v27 = vmax.f32 %v2985_v56, 0.0 }
 0xc95   :  { %v3023_v58 = vmul.f32 %v5167_v13, %v3000_v57  ;;  %v3022_v3 = vmul.f32 %v5167_v13, %v2999_v62  ;;  %v3025_v53 = vmul.f32 %v5167_v13, %v3002_v47 }
 0xc96   :  { %v3024_v6 = vmul.f32 %v5167_v13, %v3001_v27 }
 0xc98   :  { %3040 = vadd.xlane.f32.xlu1 %v3017_v10  ;;  %3038 = vadd.xlane.f32.xlu0 %v3016_v40 }
 0xc9c   :  { %3044 = vadd.xlane.f32.xlu1 %v3019_v33  ;;  %3042 = vadd.xlane.f32.xlu0 %v3018_v30 }
 0xca0   :  { %3048 = vadd.xlane.f32.xlu1 %v3021_v31  ;;  %3046 = vadd.xlane.f32.xlu0 %v3020_v1 }
 0xca4   :  { %3052 = vadd.xlane.f32.xlu1 %v3023_v58  ;;  %3050 = vadd.xlane.f32.xlu0 %v3022_v3 }
 0xca8   :  { %3056 = vadd.xlane.f32.xlu1 %v3025_v53  ;;  %3054 = vadd.xlane.f32.xlu0 %v3024_v6 }
 0xd19   :  { %v3031_v19 = vpop.xlane.xlu1 %3030  ;;  %v3027_v32 = vpop.xlane.xlu0 %3026 }
 0xd1a   :  { %v3067_v16 = vadd.f32 %v3191_v15, %v3031_v19  ;;  %v3065_v36 = vadd.f32 %v3191_v15, %v3027_v32 }
 0xd1c   :  { %3084 = vst.msk [vmem:[%s5290_s13 + $0x10] sm:$0xff] %vm3081_vm1, %v3067_v16  ;;  %3082 = vst.msk [vmem:[%s5290_s13] sm:$0xff] %vm3081_vm1, %v3065_v36 }
 0xd1d   :  { %v3033_v43 = vpop.xlane.xlu1 %3032  ;;  %v3029_v13 = vpop.xlane.xlu0 %3028 }
 0xd1e   :  { %v3068_v48 = vadd.f32 %v3191_v15, %v3033_v43  ;;  %v3066_v8 = vadd.f32 %v3191_v15, %v3029_v13 }
 0xd20   :  { %3085 = vst.msk [vmem:[%s5290_s13 + $0x18] sm:$0xff] %vm3081_vm1, %v3068_v48  ;;  %3083 = vst.msk [vmem:[%s5290_s13 + $0x8] sm:$0xff] %vm3081_vm1, %v3066_v8 }
 0xd21   :  { %v3037_v52 = vpop.xlane.xlu1 %3036  ;;  %v3035_v0 = vpop.xlane.xlu0 %3034 }
 0xd22   :  { %v3070_v22 = vadd.f32 %v3191_v15, %v3037_v52  ;;  %v3069_v49 = vadd.f32 %v3191_v15, %v3035_v0 }
 0xd24   :  { %3087 = vst.msk [vmem:[%s5290_s13 + $0x28] sm:$0xff] %vm3081_vm1, %v3070_v22  ;;  %3086 = vst.msk [vmem:[%s5290_s13 + $0x20] sm:$0xff] %vm3081_vm1, %v3069_v49 }
 0xd25   :  { %v3041_v18 = vpop.xlane.xlu1 %3040  ;;  %v3039_v60 = vpop.xlane.xlu0 %3038 }
 0xd26   :  { %v3072_v63 = vadd.f32 %v3191_v15, %v3041_v18  ;;  %v3071_v35 = vadd.f32 %v3191_v15, %v3039_v60 }
 0xd28   :  { %3089 = vst.msk [vmem:[%s5290_s13 + $0x38] sm:$0xff] %vm3081_vm1, %v3072_v63  ;;  %3088 = vst.msk [vmem:[%s5290_s13 + $0x30] sm:$0xff] %vm3081_vm1, %v3071_v35 }
 0xd29   :  { %v3045_v12 = vpop.xlane.xlu1 %3044  ;;  %v3043_v51 = vpop.xlane.xlu0 %3042 }
 0xd2a   :  { %v3074_v41 = vadd.f32 %v3191_v15, %v3045_v12  ;;  %v3073_v9 = vadd.f32 %v3191_v15, %v3043_v51 }
 0xd2c   :  { %3091 = vst.msk [vmem:[%s5290_s13 + $0x48] sm:$0xff] %vm3081_vm1, %v3074_v41  ;;  %3090 = vst.msk [vmem:[%s5290_s13 + $0x40] sm:$0xff] %vm3081_vm1, %v3073_v9 }
 0xd2d   :  { %v3049_v38 = vpop.xlane.xlu1 %3048  ;;  %v3047_v39 = vpop.xlane.xlu0 %3046 }
 0xd2e   :  { %v3076_v28 = vadd.f32 %v3191_v15, %v3049_v38  ;;  %v3075_v25 = vadd.f32 %v3191_v15, %v3047_v39 }
 0xd30   :  { %3093 = vst.msk [vmem:[%s5290_s13 + $0x58] sm:$0xff] %vm3081_vm1, %v3076_v28  ;;  %3092 = vst.msk [vmem:[%s5290_s13 + $0x50] sm:$0xff] %vm3081_vm1, %v3075_v25 }
 0xd31   :  { %v3053_v14 = vpop.xlane.xlu1 %3052  ;;  %v3051_v20 = vpop.xlane.xlu0 %3050 }
 0xd32   :  { %v3078_v11 = vadd.f32 %v3191_v15, %v3053_v14  ;;  %v3077_v10 = vadd.f32 %v3191_v15, %v3051_v20 }
 0xd34   :  { %3095 = vst.msk [vmem:[%s5290_s13 + $0x68] sm:$0xff] %vm3081_vm1, %v3078_v11  ;;  %3094 = vst.msk [vmem:[%s5290_s13 + $0x60] sm:$0xff] %vm3081_vm1, %v3077_v10 }
 0xd35   :  { %v3057_v40 = vpop.xlane.xlu1 %3056  ;;  %v3055_v21 = vpop.xlane.xlu0 %3054 }
 0xd36   :  { %v3080_v34 = vadd.f32 %v3191_v15, %v3057_v40  ;;  %v3079_v59 = vadd.f32 %v3191_v15, %v3055_v21 }
 0xd38   :  { %3097 = vst.msk [vmem:[%s5290_s13 + $0x78] sm:$0xff] %vm3081_vm1, %v3080_v34  ;;  %3096 = vst.msk [vmem:[%s5290_s13 + $0x70] sm:$0xff] %vm3081_vm1, %v3079_v59 }
 0xd39   :  { %3102 = vsyncpa [#allocation4], 1 }
 0xd3a   :  { %3103 = vsyncpa [#allocation6], 1 }

</bundles_post_ra>
